<compile_context>
chip_gen: v7x
topology: tpu7x:2x2x1
jax: 0.10.0
libtpu: 0.0.40
codegen_flags: <defaults>
</compile_context>

<pallas_src>
import functools
from itertools import permutations

import jax
import jax.numpy as jnp
from jax.experimental import pallas as pl
from jax.experimental.pallas import tpu as pltpu


COMPUTE_DTYPE = jnp.bfloat16     # NLM intermediates / kernel outputs stay bf16 end-to-end
_PALLAS_MIN_ROWS = 1024          # below this, pallas_call launch overhead dominates -> jnp


# ----------------------------------------------------------------------------
# Pallas kernels
# ----------------------------------------------------------------------------

def _round_up(x, m):
    return ((x + m - 1) // m) * m


def _pick_tm(M, tm_pref=4096):
    """Row-tile selection.

    * Big tiles amortize the ~0.35 us/step pipeline overhead (tm=4096 -> 9 steps for the
      M=35152 arity-3 calls instead of ~69 at tm=512).
    * At least 2 row tiles per call so the "parallel" grid axis can shard across v7x's two
      TensorCores (v5e/v6e have one TC, so this only costs a slightly smaller tile there).
    * Multiple of 16 for bf16 sublane packing.
    * VMEM is not the limiter: at K<=~420 bf16 a (4096, K) double-buffered input block is
      ~3.4 MB/buffer, well under the 32 MiB scoped limit on v5e/v6e/v7x.
    """
    tm = min(tm_pref, _round_up((M + 1) // 2, 16))
    return max(tm, 16)


def _mlp_kernel(x_ref, w1_ref, b1_ref, w2_ref, b2_ref, o_ref):
    """o = sigmoid(relu(x @ w1 + b1) @ w2 + b2)   (bf16 MXU operands, f32 accumulation)."""
    h = jnp.dot(x_ref[...], w1_ref[...], preferred_element_type=jnp.float32)
    h = jnp.maximum(h + b1_ref[...], 0.0)
    acc = jnp.dot(h.astype(w2_ref.dtype), w2_ref[...],
                  preferred_element_type=jnp.float32)
    o_ref[...] = jax.nn.sigmoid(acc + b2_ref[...]).astype(o_ref.dtype)


def _mlp_residual_kernel(x_ref, w1_ref, b1_ref, w2_ref, b2_ref, res_ref, o_ref):
    """o = concat([sigmoid(relu(x @ w1 + b1) @ w2 + b2), res], -1).

    Residual concat fused into the kernel: one lane-denser output store, and the XLA concat
    pass over the full arity-2/3 tensor disappears.
    """
    h = jnp.dot(x_ref[...], w1_ref[...], preferred_element_type=jnp.float32)
    h = jnp.maximum(h + b1_ref[...], 0.0)
    acc = jnp.dot(h.astype(w2_ref.dtype), w2_ref[...],
                  preferred_element_type=jnp.float32)
    y = jax.nn.sigmoid(acc + b2_ref[...]).astype(o_ref.dtype)
    o_ref[...] = jnp.concatenate([y, res_ref[...]], axis=-1)


def pallas_mlp(x, w1, b1, w2, b2, residual=None):
    """Fused NLM MLP on an [M, K] row-major matrix, bf16 in / bf16 out.

    Optional residual [M, C] is concatenated to the output inside the kernel ->
    output [M, O + C].  Partial last row tile is handled by Pallas masking.
    """
    M, K = x.shape
    H = w1.shape[1]
    O = w2.shape[1]
    tm = _pick_tm(M)
    grid = (pl.cdiv(M, tm),)

    x = x.astype(COMPUTE_DTYPE)
    w1 = w1.astype(COMPUTE_DTYPE)
    w2 = w2.astype(COMPUTE_DTYPE)
    b1 = b1.reshape(1, H).astype(jnp.float32)
    b2 = b2.reshape(1, O).astype(jnp.float32)

    common_specs = [
        pl.BlockSpec((tm, K), lambda i: (i, 0)),
        pl.BlockSpec((K, H), lambda i: (0, 0)),
        pl.BlockSpec((1, H), lambda i: (0, 0)),
        pl.BlockSpec((H, O), lambda i: (0, 0)),
        pl.BlockSpec((1, O), lambda i: (0, 0)),
    ]
    # 32 MiB scoped VMEM: >= the ~9 MB worst-case working set, needed on v5e (16 MiB scoped
    # default), comfortable on v6e (128 MiB physical) and v7x (64 MiB physical).
    params = pltpu.CompilerParams(
        dimension_semantics=("parallel",),
        vmem_limit_bytes=32 * 1024 * 1024,
    )

    if residual is None:
        return pl.pallas_call(
            _mlp_kernel,
            out_shape=jax.ShapeDtypeStruct((M, O), COMPUTE_DTYPE),
            grid=grid,
            in_specs=common_specs,
            out_specs=pl.BlockSpec((tm, O), lambda i: (i, 0)),
            compiler_params=params,
        )(x, w1, b1, w2, b2)

    C = residual.shape[1]
    return pl.pallas_call(
        _mlp_residual_kernel,
        out_shape=jax.ShapeDtypeStruct((M, O + C), COMPUTE_DTYPE),
        grid=grid,
        in_specs=common_specs + [pl.BlockSpec((tm, C), lambda i: (i, 0))],
        out_specs=pl.BlockSpec((tm, O + C), lambda i: (i, 0)),
        compiler_params=params,
    )(x, w1, b1, w2, b2, residual.astype(COMPUTE_DTYPE))


def _mlp_small(x, w1, b1, w2, b2, residual=None):
    """Tiny-M path: a pallas_call's fixed dispatch + pipeline cost dwarfs the compute at
    these shapes, so leave it to XLA fusion."""
    h = jnp.maximum(x.astype(jnp.float32) @ w1 + b1, 0.0)
    y = jax.nn.sigmoid(h @ w2 + b2).astype(COMPUTE_DTYPE)
    if residual is not None:
        y = jnp.concatenate([y, residual.astype(COMPUTE_DTYPE)], axis=-1)
    return y


def apply_nlm_mlp(x, w1, b1, w2, b2, residual=None):
    """Dispatch the fused (Linear+ReLU -> Linear+sigmoid [-> residual concat]) block."""
    lead = x.shape[:-1]
    M = 1
    for d in lead:
        M *= d
    x2 = x.reshape(M, x.shape[-1])
    res2 = None if residual is None else residual.reshape(M, residual.shape[-1])
    if M < _PALLAS_MIN_ROWS:
        y = _mlp_small(x2, w1, b1, w2, b2, res2)
    else:
        y = pallas_mlp(x2, w1, b1, w2, b2, res2)
    return y.reshape(lead + (y.shape[-1],))


# ----------------------------------------------------------------------------
# Deterministic parameter construction
# ----------------------------------------------------------------------------

class KeyGen:
    def __init__(self, seed):
        self._key = jax.random.PRNGKey(seed)

    def __call__(self):
        self._key, sub = jax.random.split(self._key)
        return sub


def make_linear(kg, in_dim, out_dim, scale=0.1):
    w = scale * jax.random.normal(kg(), (in_dim, out_dim), dtype=jnp.float32)
    b = jnp.zeros((out_dim,), dtype=jnp.float32)
    return w, b


# ----------------------------------------------------------------------------
# Model pieces (glue in XLA, bf16; dense compute in Pallas)
# ----------------------------------------------------------------------------

def stabilize(states, w=5):
    """Width-5 moving average over time with replication padding (matches module.stabilize)."""
    pad = w // 2
    padded = jnp.pad(states, ((0, 0), (pad, pad), (0, 0), (0, 0)), mode="edge")
    T = states.shape[1]
    res = padded[:, 0:T] / w
    for k in range(1, w):
        res = res + padded[:, k:k + T] / w
    return res


def soft_cmp(values, thresholds, beta):
    """Soft comparison predicates (lane-sparse -> XLA fusion); emitted directly in bf16."""
    return jax.nn.sigmoid(beta * (values[..., None] - thresholds)).astype(COMPUTE_DTYPE)


def nlm_expand(f, n):
    """arity r -> r+1: broadcast a new object dim just before the channel dim."""
    return jnp.broadcast_to(jnp.expand_dims(f, -2), f.shape[:-1] + (n, f.shape[-1]))


def nlm_reduce(f, exclude_self):
    """arity r+1 -> r: max & min over the last object dim (axis -2), self-excluding."""
    n_obj = f.ndim - 3
    if exclude_self and n_obj >= 2:
        N = f.shape[-2]
        assert N >= 2, "exclude_self reduction needs at least 2 objects"
        idx = jnp.arange(N)
        grids = jnp.meshgrid(*([idx] * n_obj), indexing="ij")
        last = grids[-1]
        eq_any = jnp.zeros_like(last, dtype=bool)
        for g in grids[:-1]:
            eq_any = eq_any | (g == last)
        keep = (~eq_any).reshape((1, 1) + (N,) * n_obj + (1,))
        fmax = jnp.max(jnp.where(keep, f, -jnp.inf), axis=-2)
        fmin = jnp.min(jnp.where(keep, f, jnp.inf), axis=-2)
    else:
        fmax = jnp.max(f, axis=-2)
        fmin = jnp.min(f, axis=-2)
    return jnp.concatenate([fmax, fmin], axis=-1)


def nlm_permute(f):
    """Concatenate all permutations of the object dims along the channel dim (arity >= 2)."""
    # TODO(synk): the 6-way arity-3 permutation is still materialized in XLA (now in bf16,
    # halving its HBM traffic).  Fully killing it would require feeding the 6 permuted row
    # views into the kernel via gathered row tiles against K-slices of W1.
    n_obj = f.ndim - 3
    if n_obj < 2:
        return f
    obj_axes = list(range(2, 2 + n_obj))
    outs = []
    for perm in permutations(obj_axes):
        axes = (0, 1) + tuple(perm) + (f.ndim - 1,)
        outs.append(jnp.transpose(f, axes))
    return jnp.concatenate(outs, axis=-1)


def logic_machine(inputs, n_objects, depth, breadth, output_dim, hidden_dim, kg,
                  exclude_self=True, residual=True, permute=True):
    """Neural Logic Machine: depth layers over arities 0..breadth (fused MLP Pallas kernel,
    residual concat fused into the kernel for the large arities)."""
    fs = list(inputs)
    for _ in range(depth):
        new_fs = []
        for r in range(breadth + 1):
            parts = []
            if r > 0 and fs[r - 1] is not None:
                parts.append(nlm_expand(fs[r - 1], n_objects))
            if fs[r] is not None:
                parts.append(fs[r])
            if r < breadth and fs[r + 1] is not None:
                parts.append(nlm_reduce(fs[r + 1], exclude_self))
            if not parts:
                new_fs.append(None)
                continue
            x = jnp.concatenate(parts, axis=-1)
            if permute and r >= 2:
                x = nlm_permute(x)
            w1, b1 = make_linear(kg, x.shape[-1], hidden_dim)
            w2, b2 = make_linear(kg, hidden_dim, output_dim)
            res = fs[r] if (residual and fs[r] is not None) else None
            new_fs.append(apply_nlm_mlp(x, w1, b1, w2, b2, residual=res))
        fs = new_fs
    return fs


def temporal_logic_machine(h, depth, out_dim, kg):
    # TODO(synk): exact TemporalLogicMachineDPV2 source unavailable; reconstructed as depth
    # stacked layers of [h, eventually(h), always(h)] -> Linear -> sigmoid (DP over time).
    # Only B*T = 16 rows -> far too small for a pallas_call; left to XLA fusion.
    h = h.astype(jnp.float32)
    for _ in range(depth):
        ev = jax.lax.cummax(h, axis=1, reverse=True)   # "eventually" (future)
        al = jax.lax.cummin(h, axis=1, reverse=True)   # "always" (future)
        x = jnp.concatenate([h, ev, al], axis=-1)
        w, b = make_linear(kg, x.shape[-1], out_dim)
        h = jax.nn.sigmoid(x @ w + b)
    return h


# ----------------------------------------------------------------------------
# NLTL_TSv3 forward (input_transformer='joint' branch)
# ----------------------------------------------------------------------------

DEFAULT_CONFIG = {
    "name": "NLTL_TSv3", "length": 8, "n_frames": 8, "state_dim": 3, "type_dim": 13,
    "h_dim": 128, "image_dim": None, "n_actions": 19, "input_transformer": "joint",
    "depth": 3, "logic_output_dims": 16, "logic_hidden_dim": [32],
    "image_feature_dim": 500, "cmp_dim": 5, "logic_layer_permute": True,
}


def nltl_tsv3_forward(trajectories, actions, beta, config):
    kg = KeyGen(42)                     # deterministic synthetic parameters

    traj = trajectories.astype(jnp.float32)
    B, T, N, S = traj.shape
    assert S == config["state_dim"]
    assert N == config["type_dim"]
    assert actions.shape == (B,)

    cmp_dim = config["cmp_dim"]
    depth = config["depth"]
    breadth = 3
    out_dim = config["logic_output_dims"]
    hidden_dim = config["logic_hidden_dim"][0]
    n_actions = config["n_actions"]

    # stabilize: moving average over time (ReplicationPad2d equivalent) -- tiny, f32.
    states = stabilize(traj, w=5)

    # --- InputTransformToyotaJoint (reconstruction) ---------------------------------
    # TODO(synk): original InputTransformToyotaJoint source unavailable; reconstructed as
    # soft threshold comparisons on joint coordinates (unary) and pairwise joint distances
    # (binary), plus the one-hot type tensor appended to the unary predicates.
    thr_unary = jnp.linspace(-1.0, 1.0, cmp_dim).astype(jnp.float32)
    thr_binary = jnp.linspace(0.5, 2.5, cmp_dim).astype(jnp.float32)

    unary_cmp = soft_cmp(states, thr_unary, beta)                     # [B,T,N,S,cmp] bf16
    unary = unary_cmp.reshape(B, T, N, S * cmp_dim)
    types = jnp.eye(N, dtype=COMPUTE_DTYPE)                           # self.types = eye(type_dim)
    types_bt = jnp.broadcast_to(types[None, None], (B, T, N, N))      # add_unary_tensor
    unary = jnp.concatenate([unary, types_bt], axis=-1)               # [B,T,N,15+13] bf16

    diff = states[:, :, :, None, :] - states[:, :, None, :, :]
    dist = jnp.sqrt(jnp.sum(diff * diff, axis=-1) + 1e-8)             # [B,T,N,N] f32
    binary = soft_cmp(dist, thr_binary, beta)                         # [B,T,N,N,cmp] bf16

    nlm_inputs = [None, unary, binary, None]                          # arities 0..breadth

    # --- LogicMachine ----------------------------------------------------------------
    fs = logic_machine(nlm_inputs, N, depth, breadth, out_dim, hidden_dim, kg,
                       exclude_self=True, residual=True,
                       permute=config["logic_layer_permute"])
    nltl_input = fs[0]                                                # [B,T,feature_dim] bf16
    feature_dim = nltl_input.shape[-1]

    # --- TemporalLogicMachineDPV2 ------------------------------------------------------
    nltl_output = temporal_logic_machine(nltl_input, 3, feature_dim, kg)

    # features = nltl_output.max(dim=1)[0]  (tiny [B,T,F] reduction -> XLA fusion)
    features = jnp.max(nltl_output, axis=1)                           # [B, feature_dim] f32
    assert features.ndim == 2 and features.shape == (B, feature_dim)

    # decoder: [B, F] @ [F, n_actions] is far below any TPU tile -> plain jnp.
    dec_out = 1 if n_actions == 2 else n_actions
    wd, bd = make_linear(kg, feature_dim, dec_out)
    output = features @ wd + bd                                       # [B, dec_out]
    if n_actions == 2:
        output = jnp.concatenate([-output, output], axis=1)

    # model_loss = L1(decoder.weight, 0) * 0.0  (identically zero per batch element)
    model_loss = jnp.zeros((B,), jnp.float32)

    return {"output": output, "target": actions, "loss": model_loss}


# ----------------------------------------------------------------------------
# Main
# ----------------------------------------------------------------------------

if __name__ == "__main__":
    config = dict(DEFAULT_CONFIG)
    B = 2
    T = config["length"]           # 8 (small)
    N = config["type_dim"]         # 13 agents/joints (n_agents must equal type_dim)
    S = config["state_dim"]        # 3

    key = jax.random.PRNGKey(0)
    k_traj, k_act = jax.random.split(key)
    trajectories = jax.random.normal(k_traj, (B, T, N, S), dtype=jnp.float32)
    actions = jax.random.randint(k_act, (B,), 0, config["n_actions"])

    forward = jax.jit(functools.partial(nltl_tsv3_forward, config=config))
    result = forward(trajectories, actions, jnp.float32(4.0))
    jax.block_until_ready(result["output"])

    assert result["output"].shape == (B, config["n_actions"])
    assert result["target"].shape == (B,)
    assert result["loss"].shape == (B,)
    print("KERNEL_OK")
</pallas_src>

<mosaic_0001>
module attributes {stable_mosaic.version = 11 : i64} {
  func.func @_mlp_residual_kernel(%arg0: i32, %arg1: memref<1360x66xbf16, #tpu.memory_space<vmem>>, %arg2: memref<66x32xbf16, #tpu.memory_space<vmem>>, %arg3: memref<1x32xf32, #tpu.memory_space<vmem>>, %arg4: memref<32x16xbf16, #tpu.memory_space<vmem>>, %arg5: memref<1x16xf32, #tpu.memory_space<vmem>>, %arg6: memref<1360x5xbf16, #tpu.memory_space<vmem>>, %arg7: memref<1360x21xbf16, #tpu.memory_space<vmem>>) attributes {dimension_semantics = [#tpu.dimension_semantics<parallel>], iteration_bounds = array<i64: 2>, scalar_prefetch = 0 : i64, scratch_operands = 0 : i64, tpu.core_type = #tpu.core_type<tc>, window_params = [{transform_indices = @transform_0, window_bounds = array<i64: 1360, 66>}, {pipeline_mode = #tpu.pipeline_mode<synchronous>, transform_indices = @transform_1, window_bounds = array<i64: 66, 32>}, {pipeline_mode = #tpu.pipeline_mode<synchronous>, transform_indices = @transform_2, window_bounds = array<i64: 1, 32>}, {pipeline_mode = #tpu.pipeline_mode<synchronous>, transform_indices = @transform_3, window_bounds = array<i64: 32, 16>}, {pipeline_mode = #tpu.pipeline_mode<synchronous>, transform_indices = @transform_4, window_bounds = array<i64: 1, 16>}, {transform_indices = @transform_5, window_bounds = array<i64: 1360, 5>}, {transform_indices = @transform_6, window_bounds = array<i64: 1360, 21>}]} {
    %c0 = arith.constant 0 : index
    %c0_0 = arith.constant 0 : index
    %0 = vector.load %arg1[%c0, %c0_0] : memref<1360x66xbf16, #tpu.memory_space<vmem>>, vector<1360x66xbf16>
    %c0_1 = arith.constant 0 : index
    %c0_2 = arith.constant 0 : index
    %1 = vector.load %arg2[%c0_1, %c0_2] : memref<66x32xbf16, #tpu.memory_space<vmem>>, vector<66x32xbf16>
    %cst = arith.constant dense<0.000000e+00> : vector<1360x32xf32>
    %2 = tpu.matmul %0, %1, %cst {dimension_numbers = #tpu.dot_dimension_numbers<[1], [0], [0], [1], [0, 0, 1, 1], [], []>} : vector<1360x66xbf16>, vector<66x32xbf16>, vector<1360x32xf32> -> vector<1360x32xf32>
    %c0_3 = arith.constant 0 : index
    %c0_4 = arith.constant 0 : index
    %3 = vector.load %arg3[%c0_3, %c0_4] : memref<1x32xf32, #tpu.memory_space<vmem>>, vector<1x32xf32>
    %4 = vector.broadcast %3 : vector<1x32xf32> to vector<1360x32xf32>
    %5 = arith.addf %2, %4 : vector<1360x32xf32>
    %cst_5 = arith.constant 0.000000e+00 : f32
    %6 = vector.broadcast %cst_5 : f32 to vector<1360x32xf32>
    %7 = arith.maximumf %5, %6 : vector<1360x32xf32>
    %8 = arith.truncf %7 : vector<1360x32xf32> to vector<1360x32xbf16>
    %c0_6 = arith.constant 0 : index
    %c0_7 = arith.constant 0 : index
    %9 = vector.load %arg4[%c0_6, %c0_7] : memref<32x16xbf16, #tpu.memory_space<vmem>>, vector<32x16xbf16>
    %cst_8 = arith.constant dense<0.000000e+00> : vector<1360x16xf32>
    %10 = tpu.matmul %8, %9, %cst_8 {dimension_numbers = #tpu.dot_dimension_numbers<[1], [0], [0], [1], [0, 0, 1, 1], [], []>} : vector<1360x32xbf16>, vector<32x16xbf16>, vector<1360x16xf32> -> vector<1360x16xf32>
    %c0_9 = arith.constant 0 : index
    %c0_10 = arith.constant 0 : index
    %11 = vector.load %arg5[%c0_9, %c0_10] : memref<1x16xf32, #tpu.memory_space<vmem>>, vector<1x16xf32>
    %12 = vector.broadcast %11 : vector<1x16xf32> to vector<1360x16xf32>
    %13 = arith.addf %10, %12 : vector<1360x16xf32>
    %14 = arith.negf %13 : vector<1360x16xf32>
    %15 = math.exp %14 : vector<1360x16xf32>
    %cst_11 = arith.constant 1.000000e+00 : f32
    %16 = vector.broadcast %cst_11 : f32 to vector<1360x16xf32>
    %17 = arith.addf %16, %15 : vector<1360x16xf32>
    %18 = arith.divf %16, %17 : vector<1360x16xf32>
    %19 = arith.truncf %18 : vector<1360x16xf32> to vector<1360x16xbf16>
    %c0_12 = arith.constant 0 : index
    %c0_13 = arith.constant 0 : index
    %20 = vector.load %arg6[%c0_12, %c0_13] : memref<1360x5xbf16, #tpu.memory_space<vmem>>, vector<1360x5xbf16>
    %21 = tpu.concatenate %19, %20 in 1 : vector<1360x16xbf16>, vector<1360x5xbf16> -> vector<1360x21xbf16>
    %c0_14 = arith.constant 0 : index
    %c0_15 = arith.constant 0 : index
    %22 = vector.load %arg7[%c0_14, %c0_15] : memref<1360x21xbf16, #tpu.memory_space<vmem>>, vector<1360x21xbf16>
    tpu.vector_store %arg7[%c0_14, %c0_15], %21 {strides = array<i32>} : memref<1360x21xbf16, #tpu.memory_space<vmem>>, vector<1360x21xbf16>,
    return
  }
  func.func @transform_0(%arg0: i32) -> (i32, i32) {
    %c0_i32 = arith.constant 0 : i32
    %c0_i32_0 = arith.constant 0 : i32
    return %arg0, %c0_i32 : i32, i32
  }
  func.func @transform_1(%arg0: i32) -> (i32, i32) {
    %c0_i32 = arith.constant 0 : i32
    %c0_i32_0 = arith.constant 0 : i32
    %c0_i32_1 = arith.constant 0 : i32
    return %c0_i32, %c0_i32_0 : i32, i32
  }
  func.func @transform_2(%arg0: i32) -> (i32, i32) {
    %c0_i32 = arith.constant 0 : i32
    %c0_i32_0 = arith.constant 0 : i32
    %c0_i32_1 = arith.constant 0 : i32
    return %c0_i32, %c0_i32_0 : i32, i32
  }
  func.func @transform_3(%arg0: i32) -> (i32, i32) {
    %c0_i32 = arith.constant 0 : i32
    %c0_i32_0 = arith.constant 0 : i32
    %c0_i32_1 = arith.constant 0 : i32
    return %c0_i32, %c0_i32_0 : i32, i32
  }
  func.func @transform_4(%arg0: i32) -> (i32, i32) {
    %c0_i32 = arith.constant 0 : i32
    %c0_i32_0 = arith.constant 0 : i32
    %c0_i32_1 = arith.constant 0 : i32
    return %c0_i32, %c0_i32_0 : i32, i32
  }
  func.func @transform_5(%arg0: i32) -> (i32, i32) {
    %c0_i32 = arith.constant 0 : i32
    %c0_i32_0 = arith.constant 0 : i32
    return %arg0, %c0_i32 : i32, i32
  }
  func.func @transform_6(%arg0: i32) -> (i32, i32) {
    %c0_i32 = arith.constant 0 : i32
    %c0_i32_0 = arith.constant 0 : i32
    return %arg0, %c0_i32 : i32, i32
  }
}

</mosaic_0001>

<bundles_post_ra>
// kernel: nltl_tsv3_forward.1
= control target key start
LH: loop header
LB: loop body
LE: loop exit
PB: predicated region body
PF: predicated region fallthrough
CT: control target
= control target key end

     0   :  { %s9213_s21 = smov 0   ;;  %s9215_s22 = smov 0   ;;  %s11087_s0 = inlined_call_operand.vmem [shape: bf16[2704,66], index: 0, kind: input, shape index: {}]   ;;  %s11088_s1 = inlined_call_operand.vmem [shape: bf16[66,32], index: 1, kind: input, shape index: {}]   ;;  %s11089_s2 = inlined_call_operand.vmem [shape: f32[1,32], index: 2, kind: input, shape index: {}]   ;;  %s11090_s3 = inlined_call_operand.vmem [shape: bf16[32,16], index: 3, kind: input, shape index: {}]   ;;  %s11091_s4 = inlined_call_operand.vmem [shape: f32[1,16], index: 4, kind: input, shape index: {}]   ;;  %s11092_s5 = inlined_call_operand.vmem [shape: bf16[2704,5], index: 5, kind: input, shape index: {}]   ;;  %s11093_s6 = inlined_call_operand.vmem [shape: bf16[2704,21], index: 6, kind: output, shape index: {}]  }
   0x1   :  { %s9217_s23 = smov 0  }
   0x2 LB: > { %s9226_s24 = sadd.s32 4294967295, %s9141_s23   ;;  %s9228_s25 = sadd.s32 1, %s9141_s23   ;;  %s9141_s23 = sphi %s9217_s23, %s11100_s23   ;;  %s9137_s22 = sphi %s9215_s22, %s11099_s22   ;;  %s9133_s21 = sphi %s9213_s21, %s11098_s21  }
   0x3   : > { %s156_s26 = ssub.s32 %s9141_s23, %s9228_s25  ;;  %s159_s27 = sadd.s32 1, %s9137_s22 }
   0x4   : > { %p157_p0 = scmp.eq.s32.totalorder %s156_s26, 0  ;;  %p169_p1 = scmp.ne.s32.totalorder %s9137_s22, %s9133_s21 }
   0x5   : > { %p170_p2 = scmp.eq.s32.totalorder %s9226_s24, 1  ;;  %p6547_p3 = scmp.ge.s32.totalorder %s9141_s23, 1 }
   0x6   : > { %s9236_s28 = scalar_select %p157_p0, %s9137_s22, %s159_s27  }
   0x7   : > { %p9238_p4 = por %p170_p2, %p169_p1  ;;  %p240_p5 = scmp.lt.s32.totalorder %s9141_s23, 3 }
   0x9   : > { %p241_p6 = pnand %p6547_p3, %p240_p5 }
   0xa   : > { %v8220_v0 = vld [vmem:[%s11088_s1] sm:$0xff] (!%p241_p6)   ;;  %v9175_v1 = vmov (!%p241_p6), 0.0   ;;  %v8221_v2 = vld [vmem:[%s11088_s1 + $0x8] sm:$0xff] (!%p241_p6)   ;;  %vm9176_vm0 = vmmov (!%p241_p6), 0   ;;  %s9254_s10 = smul.u32 (!%p241_p6), 170, %s9226_s24  ;;  %v8222_v3 = vld [vmem:[%s11088_s1 + $0x10] sm:$0xff] (!%p241_p6)  }
   0xb   : > { %244 = sbr.rel (%p241_p6) target bundleno = 1262 (0x4ee), region = 44  ;;  %7434 = vmatprep.subr.bf16.mxu0 (!%p241_p6), %v9175_v1  ;;  %7784 = vmatprep.subr.bf16.mxu1 (!%p241_p6), %v9175_v1  ;;  %v8223_v4 = vld [vmem:[%s11088_s1 + $0x18] sm:$0xff] (!%p241_p6)   ;;  %v8224_v5 = vld [vmem:[%s11088_s1 + $0x20] ss:$0 sps:$4 sm:$0x11] (!%p241_p6)   ;;  %vm1210_vm1 = vcmask (!%p241_p6), 1040384  }
   0xc   : > { %7435 = vmatpush3.bf16.msra.mxu0 (!%p241_p6), %v8220_v0  ;;  %7444 = vmatprep.mubr.msk.bf16.mxu0 (!%p241_p6), %vm9176_vm0, %v9175_v1  ;;  %p287_p7 = scmp.lt.s32.totalorder (!%p241_p6), %s9254_s10, 337  ;;  %v1212_v6 = vsel (!%p241_p6), %vm1210_vm1, %v8224_v5, 0  ;;  %vm954_vm2 = vcmask (!%p241_p6), 539648   ;;  %v8252_v18 = vld [vmem:[%s11090_s3] sm:$0xff] (!%p241_p6)   ;;  %v8254_v20 = vld [vmem:[%s11090_s3 + $0x8] sm:$0xff] (!%p241_p6)   ;;  %vm2205_vm3 = vcmask (!%p241_p6), 261120  }
   0xd   : > { %7436 = vmatprep.subr.bf16.mxu0 (!%p241_p6), %v9175_v1  ;;  %7788 = vmatprep.mubr.msk.bf16.mxu1 (!%p241_p6), %vm9176_vm0, %v9175_v1  ;;  %v9398_v36 = vld [vmem:[%s11089_s2] ss:$0 sm:$0xff] (!%p241_p6)  ;;  %s279_s19 = sand.u32 (!%p241_p6), 1, %s9133_s21   ;;  %vm5044_vm4 = vcmask (!%p241_p6), 130048   ;;  %vm5895_vm5 = vcmask (!%p241_p6), 166912  }
   0xe   : > { %7785 = vmatpush3.bf16.msra.mxu1 (!%p241_p6), %v8252_v18  ;;  %s9767_s21 = smul.u32 (!%p241_p6), 680, %s279_s19 }
   0xf   : > { %7786 = vmatprep.subr.bf16.mxu1 (!%p241_p6), %v9175_v1 }
  0x10   : > { %7437 = vmatpush3.bf16.msra.mxu0 (!%p241_p6), %v8221_v2  ;;  %s9781_s20 = scalar_lea.vmem (!%p241_p6), [#allocation2], %s9767_s21  }
  0x11   : > { %7438 = vmatprep.subr.bf16.mxu0 (!%p241_p6), %v9175_v1 }
  0x12   : > { %s9264_s13 = scalar_select %p287_p7, %s9254_s10, 337  ;;  %7787 = vmatpush3.bf16.msra.mxu1 %v8254_v20 }
  0x13   : > { %s6074_s27 = ssub.s32 (%p9238_p4), 338, %s9254_s10  ;;  %s7254_s30 = smul.u32 (%p9238_p4), 680, %s9226_s24 }
  0x14   : > { %s6548_s14 = sshll.u32 %s9264_s13, 2  ;;  %7439 = vmatpush3.bf16.msra.mxu0 %v8222_v3  ;;  %s9177_s13 = smov 16  }
  0x15   : > { %s9278_s23 = scalar_lea.vmem %s11087_s0, %s6548_s14  ;;  %7440 = vmatprep.subr.bf16.mxu0 %v9175_v1  ;;  %s9414_s15 = scalar_lea.vmem %s11092_s5, %s6548_s14 }
  0x16   : > { %v8225_v7 = vld [vmem:[%s9278_s23] sm:$0xff]   ;;  %v8226_v8 = vld [vmem:[%s9278_s23 + $0x8] sm:$0xff]   ;;  %v8227_v9 = vld [vmem:[%s9278_s23 + $0x10] sm:$0xff]   ;;  %p6075_p8 = scmp.lt.s32.totalorder (%p9238_p4), %s6074_s27, 170  ;;  %s10895_s9 = scalar_lea.vmem (%p9238_p4), %s11093_s6, %s7254_s30  }
  0x17   : > { %v8228_v10 = vld [vmem:[%s9278_s23 + $0x18] sm:$0xff]   ;;  %v8229_v11 = vld [vmem:[%s9278_s23 + $0x20] sm:$0xff]   ;;  %v8230_v12 = vld [vmem:[%s9278_s23 + $0x28] sm:$0xff]  }
  0x18   : > { %7441 = vmatpush3.bf16.msra.mxu0 %v8223_v4  ;;  %v8231_v13 = vld [vmem:[%s9278_s23 + $0x30] sm:$0xff]   ;;  %v8232_v14 = vld [vmem:[%s9278_s23 + $0x38] sm:$0xff]   ;;  %v8233_v15 = vld [vmem:[%s9278_s23 + $0x40] sm:$0xff]  }
  0x19   : > { %7442 = vmatprep.subr.bf16.mxu0 %v9175_v1  ;;  %v8234_v16 = vld [vmem:[%s9278_s23 + $0x48] sm:$0xff]   ;;  %v8235_v17 = vld [vmem:[%s9278_s23 + $0x50] sm:$0xff]   ;;  %v8236_v19 = vld [vmem:[%s9278_s23 + $0x58] sm:$0xff]  }
  0x1a   : > { %v8237_v21 = vld [vmem:[%s9278_s23 + $0x60] sm:$0xff]   ;;  %v8238_v22 = vld [vmem:[%s9278_s23 + $0x68] sm:$0xff]   ;;  %v8239_v23 = vld [vmem:[%s9278_s23 + $0x70] sm:$0xff]  }
  0x1b   : > { %v8240_v24 = vld [vmem:[%s9278_s23 + $0x78] sm:$0xff]   ;;  %v8241_v25 = vld [vmem:[%s9278_s23 + $0x80] sm:$0xff]   ;;  %v8242_v26 = vld [vmem:[%s9278_s23 + $0x88] sm:$0xff]  }
  0x1c   : > { %7443 = vmatpush3.bf16.msra.mxu0 %v1212_v6  ;;  %v8243_v27 = vld [vmem:[%s9278_s23 + $0x90] sm:$0xff]   ;;  %v8244_v28 = vld [vmem:[%s9278_s23 + $0x98] sm:$0xff]   ;;  %v8245_v29 = vld [vmem:[%s9278_s23 + $0xa0] sm:$0xff]  }
  0x1d   : > { %v8246_v30 = vld [vmem:[%s9278_s23 + $0xa8] sm:$0xff]   ;;  %v8247_v31 = vld [vmem:[%s9278_s23 + $0xb0] sm:$0xff]   ;;  %v8248_v32 = vld [vmem:[%s9278_s23 + $0xb8] sm:$0xff]  }
  0x1e   : > { %v8249_v33 = vld [vmem:[%s9278_s23 + $0xc0] sm:$0xff]   ;;  %v8250_v34 = vld [vmem:[%s9278_s23 + $0xc8] sm:$0xff]   ;;  %v8251_v35 = vld [vmem:[%s9278_s23 + $0xd0] sm:$0xff]  }
  0x1f   : > { %7445 = vmatmul.mubr.msk.bf16.vlgmr.msra.gmra.mrb[0].mxu0 %vm954_vm2, %v8225_v7  ;;  %v8253_v40 = vld [vmem:[%s9278_s23 + $0xd8] sm:$0xff]   ;;  %v8255_v47 = vld [vmem:[%s9278_s23 + $0xe0] sm:$0xff]   ;;  %v8273_v59 = vld [vmem:[%s9414_s15 + $0x8] sm:$0xff]  }
  0x20   : > { %7448 = vmatprep.mubr.msk.bf16.mxu0 %vm9176_vm0, %v9175_v1  ;;  %v8271_v49 = vld [vmem:[%s9414_s15] sm:$0xff]   ;;  %v8256_v62 = vld [vmem:[%s9278_s23 + $0xe8] sm:$0xff]   ;;  %v8275_v7 = vld [vmem:[%s9414_s15 + $0x10] sm:$0xff]  }
  0x21   : > { %4874 = vrot.lane.b32.xlu0 %v8271_v49, %s9177_s13  ;;  %4878 = vrot.lane.b32.xlu1 %v8275_v7, %s9177_s13  ;;  %v8277_v18 = vld [vmem:[%s9414_s15 + $0x18] sm:$0xff]  }
  0x25   : > { %4876 = vrot.lane.b32.xlu0 %v8273_v59, %s9177_s13  ;;  %4880 = vrot.lane.b32.xlu1 %v8277_v18, %s9177_s13 }
  0x27   : > { %7449 = vmatmul.mubr.msk.bf16.gmra.mrb[4].mxu0 %vm954_vm2, %v8226_v8 }
  0x28   : > { %7452 = vmatprep.mubr.msk.bf16.mxu0 %vm9176_vm0, %v9175_v1 }
  0x2f   : > { %7453 = vmatmul.mubr.msk.bf16.gmra.mrb[8].mxu0 %vm954_vm2, %v8227_v9 }
  0x30   : > { %7456 = vmatprep.mubr.msk.bf16.mxu0 %vm9176_vm0, %v9175_v1 }
  0x37   : > { %7457 = vmatmul.mubr.msk.bf16.gmra.mrb[12].mxu0 %vm954_vm2, %v8228_v10  ;;  %v8257_v10 = vld [vmem:[%s9278_s23 + $0xf0] sm:$0xff]  }
  0x38   : > { %7460 = vmatprep.mubr.msk.bf16.mxu0 %vm9176_vm0, %v9175_v1 }
  0x3f   : > { %7461 = vmatmul.mubr.msk.bf16.gmra.mrb[16].mxu0 %vm954_vm2, %v8229_v11 }
  0x40   : > { %7464 = vmatprep.mubr.msk.bf16.mxu0 %vm9176_vm0, %v9175_v1 }
  0x47   : > { %7465 = vmatmul.mubr.msk.bf16.gmra.mrb[20].mxu0 %vm954_vm2, %v8230_v12 }
  0x48   : > { %7468 = vmatprep.mubr.msk.bf16.mxu0 %vm9176_vm0, %v9175_v1 }
  0x4f   : > { %7469 = vmatmul.mubr.msk.bf16.gmra.mrb[24].mxu0 %vm954_vm2, %v8231_v13 }
  0x50   : > { %7472 = vmatprep.mubr.msk.bf16.mxu0 %vm9176_vm0, %v9175_v1 }
  0x57   : > { %7473 = vmatmul.mubr.msk.bf16.gmra.mrb[28].mxu0 %vm954_vm2, %v8232_v14 }
  0x58   : > { %7476 = vmatprep.mubr.msk.bf16.mxu0 %vm9176_vm0, %v9175_v1 }
  0x5f   : > { %7477 = vmatmul.mubr.msk.bf16.gmra.mrb[32].mxu0 %vm954_vm2, %v8233_v15 }
  0x60   : > { %7480 = vmatprep.mubr.msk.bf16.mxu0 %vm9176_vm0, %v9175_v1 }
  0x67   : > { %7481 = vmatmul.mubr.msk.bf16.gmra.mrb[36].mxu0 %vm954_vm2, %v8234_v16 }
  0x68   : > { %7484 = vmatprep.mubr.msk.bf16.mxu0 %vm9176_vm0, %v9175_v1 }
  0x6f   : > { %7485 = vmatmul.mubr.msk.bf16.gmra.mrb[40].mxu0 %vm954_vm2, %v8235_v17 }
  0x70   : > { %7488 = vmatprep.mubr.msk.bf16.mxu0 %vm9176_vm0, %v9175_v1 }
  0x77   : > { %7489 = vmatmul.mubr.msk.bf16.gmra.mrb[44].mxu0 %vm954_vm2, %v8236_v19 }
  0x78   : > { %7492 = vmatprep.mubr.msk.bf16.mxu0 %vm9176_vm0, %v9175_v1 }
  0x7f   : > { %7493 = vmatmul.mubr.msk.bf16.gmra.mrb[48].mxu0 %vm954_vm2, %v8237_v21  ;;  %v8258_v21 = vld [vmem:[%s9278_s23 + $0xf8] sm:$0xff]  }
  0x80   : > { %7496 = vmatprep.mubr.msk.bf16.mxu0 %vm9176_vm0, %v9175_v1 }
  0x87   : > { %7497 = vmatmul.mubr.msk.bf16.gmra.mrb[52].mxu0 %vm954_vm2, %v8238_v22 }
  0x88   : > { %7500 = vmatprep.mubr.msk.bf16.mxu0 %vm9176_vm0, %v9175_v1 }
  0x8f   : > { %7501 = vmatmul.mubr.msk.bf16.gmra.mrb[56].mxu0 %vm954_vm2, %v8239_v23 }
  0x90   : > { %7504 = vmatprep.mubr.msk.bf16.mxu0 %vm9176_vm0, %v9175_v1 }
  0x97   : > { %7505 = vmatmul.mubr.msk.bf16.gmra.mrb[60].mxu0 %vm954_vm2, %v8240_v24 }
  0x98   : > { %7508 = vmatprep.mubr.msk.bf16.mxu0 %vm9176_vm0, %v9175_v1 }
  0x9f   : > { %7509 = vmatmul.mubr.msk.bf16.gmra.mrb[64].mxu0 %vm954_vm2, %v8241_v25 }
  0xa0   : > { %7512 = vmatprep.mubr.msk.bf16.mxu0 %vm9176_vm0, %v9175_v1 }
  0xa7   : > { %7513 = vmatmul.mubr.msk.bf16.gmra.mrb[68].mxu0 %vm954_vm2, %v8242_v26 }
  0xa8   : > { %7516 = vmatprep.mubr.msk.bf16.mxu0 %vm9176_vm0, %v9175_v1 }
  0xaf   : > { %7517 = vmatmul.mubr.msk.bf16.gmra.mrb[72].mxu0 %vm954_vm2, %v8243_v27 }
  0xb0   : > { %7520 = vmatprep.mubr.msk.bf16.mxu0 %vm9176_vm0, %v9175_v1 }
  0xb7   : > { %7521 = vmatmul.mubr.msk.bf16.gmra.mrb[76].mxu0 %vm954_vm2, %v8244_v28 }
  0xb8   : > { %7524 = vmatprep.mubr.msk.bf16.mxu0 %vm9176_vm0, %v9175_v1 }
  0xbf   : > { %7525 = vmatmul.mubr.msk.bf16.gmra.mrb[80].mxu0 %vm954_vm2, %v8245_v29  ;;  %v8279_v29 = vld [vmem:[%s9414_s15 + $0x20] sm:$0xff]  }
  0xc0   : > { %7528 = vmatprep.mubr.msk.bf16.mxu0 %vm9176_vm0, %v9175_v1  ;;  %4882 = vrot.lane.b32.xlu0 %v8279_v29, %s9177_s13 }
  0xc7   : > { %7529 = vmatmul.mubr.msk.bf16.gmra.mrb[84].mxu0 %vm954_vm2, %v8246_v30 }
  0xc8   : > { %7532 = vmatprep.mubr.msk.bf16.mxu0 %vm9176_vm0, %v9175_v1 }
  0xcf   : > { %7533 = vmatmul.mubr.msk.bf16.gmra.mrb[88].mxu0 %vm954_vm2, %v8247_v31 }
  0xd0   : > { %7536 = vmatprep.mubr.msk.bf16.mxu0 %vm9176_vm0, %v9175_v1 }
  0xd7   : > { %7537 = vmatmul.mubr.msk.bf16.gmra.mrb[92].mxu0 %vm954_vm2, %v8248_v32  ;;  %v8259_v32 = vld [vmem:[%s9278_s23 + $0x100] sm:$0xff]  }
  0xd8   : > { %7540 = vmatprep.mubr.msk.bf16.mxu0 %vm9176_vm0, %v9175_v1 }
  0xdf   : > { %7541 = vmatmul.mubr.msk.bf16.gmra.mrb[96].mxu0 %vm954_vm2, %v8249_v33 }
  0xe0   : > { %7544 = vmatprep.mubr.msk.bf16.mxu0 %vm9176_vm0, %v9175_v1 }
  0xe7   : > { %7545 = vmatmul.mubr.msk.bf16.gmra.mrb[100].mxu0 %vm954_vm2, %v8250_v34 }
  0xe8   : > { %7548 = vmatprep.mubr.msk.bf16.mxu0 %vm9176_vm0, %v9175_v1 }
  0xef   : > { %7549 = vmatmul.mubr.msk.bf16.gmra.mrb[104].mxu0 %vm954_vm2, %v8251_v35 }
  0xf0   : > { %7552 = vmatprep.mubr.msk.bf16.mxu0 %vm9176_vm0, %v9175_v1 }
  0xf2   : > { %v1248_v37 = vpop.f32.mrb[0].mxu0 }
  0xf3   : > { %v1249_v38 = vadd.f32 %v9398_v36, %v1248_v37  ;;  %v7446_v39 = vpop.f32.mrb[1].mxu0 }
  0xf4   : > { %v1251_v41 = vpop.f32.mrb[2].mxu0 }
  0xf5   : > { %v1252_v42 = vadd.f32 %v9398_v36, %v1251_v41  ;;  %v7447_v43 = vpop.f32.mrb[3].mxu0  ;;  %v1927_v44 = vmax.f32 %v1249_v38, 0.0  ;;  %v8281_v41 = vld [vmem:[%s9414_s15 + $0x28] sm:$0xff]  }
  0xf6   : > { %4884 = vrot.lane.b32.xlu1 %v8281_v41, %s9177_s13 }
  0xf7   : > { %v1928_v45 = vmax.f32 %v1252_v42, 0.0  ;;  %7553 = vmatmul.mubr.msk.bf16.gmra.mrb[108].mxu0 %vm954_vm2, %v8253_v40 }
  0xf8   : > { %7556 = vmatprep.mubr.msk.bf16.mxu0 %vm9176_vm0, %v9175_v1 }
  0xf9   : > { %v2097_v46 = vpack.c.bf16 %v1928_v45, %v1927_v44  ;;  %v8260_v44 = vld [vmem:[%s9278_s23 + $0x108] sm:$0xff]  }
  0xfa   : > { %v1256_v48 = vpop.f32.mrb[4].mxu0 }
  0xfb   : > { %v1257_v50 = vadd.f32 %v9398_v36, %v1256_v48  ;;  %v7450_v51 = vpop.f32.mrb[5].mxu0  ;;  %7789 = vmatmul.mubr.msk.bf16.vlgmr.msra.gmra.mrb[0].mxu1 %vm2205_vm3, %v2097_v46 }
  0xfc   : > { %v1259_v52 = vpop.f32.mrb[6].mxu0  ;;  %7792 = vmatprep.mubr.msk.bf16.mxu1 %vm9176_vm0, %v9175_v1 }
  0xfd   : > { %v1260_v53 = vadd.f32 %v9398_v36, %v1259_v52  ;;  %v7451_v54 = vpop.f32.mrb[7].mxu0  ;;  %v1929_v55 = vmax.f32 %v1257_v50, 0.0  ;;  %v8283_v52 = vld [vmem:[%s9414_s15 + $0x30] sm:$0xff]  }
  0xfe   : > { %4886 = vrot.lane.b32.xlu0 %v8283_v52, %s9177_s13 }
  0xff   : > { %v1930_v56 = vmax.f32 %v1260_v53, 0.0  ;;  %7557 = vmatmul.mubr.msk.bf16.gmra.mrb[112].mxu0 %vm954_vm2, %v8255_v47 }
 0x100   : > { %7560 = vmatprep.mubr.msk.bf16.mxu0 %vm9176_vm0, %v9175_v1 }
 0x101   : > { %v2098_v57 = vpack.c.bf16 %v1930_v56, %v1929_v55  ;;  %v8261_v55 = vld [vmem:[%s9278_s23 + $0x110] sm:$0xff]  }
 0x102   : > { %v1264_v58 = vpop.f32.mrb[8].mxu0 }
 0x103   : > { %v1265_v60 = vadd.f32 %v9398_v36, %v1264_v58  ;;  %v7454_v61 = vpop.f32.mrb[9].mxu0  ;;  %7793 = vmatmul.mubr.msk.bf16.gmra.mrb[4].mxu1 %vm2205_vm3, %v2098_v57 }
 0x104   : > { %v1267_v63 = vpop.f32.mrb[10].mxu0  ;;  %7796 = vmatprep.mubr.msk.bf16.mxu1 %vm9176_vm0, %v9175_v1 }
 0x105   : > { %v1268_v0 = vadd.f32 %v9398_v36, %v1267_v63  ;;  %v7455_v2 = vpop.f32.mrb[11].mxu0  ;;  %v1931_v3 = vmax.f32 %v1265_v60, 0.0  ;;  %v8285_v63 = vld [vmem:[%s9414_s15 + $0x38] sm:$0xff]  }
 0x106   : > { %4888 = vrot.lane.b32.xlu1 %v8285_v63, %s9177_s13 }
 0x107   : > { %v1932_v4 = vmax.f32 %v1268_v0, 0.0  ;;  %7561 = vmatmul.mubr.msk.bf16.gmra.mrb[116].mxu0 %vm954_vm2, %v8256_v62 }
 0x108   : > { %7564 = vmatprep.mubr.msk.bf16.mxu0 %vm9176_vm0, %v9175_v1 }
 0x109   : > { %v2099_v5 = vpack.c.bf16 %v1932_v4, %v1931_v3  ;;  %v8262_v3 = vld [vmem:[%s9278_s23 + $0x118] sm:$0xff]  }
 0x10a   : > { %v1272_v6 = vpop.f32.mrb[12].mxu0 }
 0x10b   : > { %v1273_v8 = vadd.f32 %v9398_v36, %v1272_v6  ;;  %v7458_v9 = vpop.f32.mrb[13].mxu0  ;;  %7797 = vmatmul.mubr.msk.bf16.gmra.mrb[8].mxu1 %vm2205_vm3, %v2099_v5 }
 0x10c   : > { %v1275_v11 = vpop.f32.mrb[14].mxu0  ;;  %7800 = vmatprep.mubr.msk.bf16.mxu1 %vm9176_vm0, %v9175_v1 }
 0x10d   : > { %v1276_v12 = vadd.f32 %v9398_v36, %v1275_v11  ;;  %v7459_v13 = vpop.f32.mrb[15].mxu0  ;;  %v1933_v14 = vmax.f32 %v1273_v8, 0.0  ;;  %v8287_v11 = vld [vmem:[%s9414_s15 + $0x40] sm:$0xff]  }
 0x10e   : > { %4890 = vrot.lane.b32.xlu0 %v8287_v11, %s9177_s13 }
 0x10f   : > { %v1934_v15 = vmax.f32 %v1276_v12, 0.0  ;;  %7565 = vmatmul.mubr.msk.bf16.gmra.mrb[120].mxu0 %vm954_vm2, %v8257_v10 }
 0x110   : > { %7568 = vmatprep.mubr.msk.bf16.mxu0 %vm9176_vm0, %v9175_v1 }
 0x111   : > { %v2100_v16 = vpack.c.bf16 %v1934_v15, %v1933_v14  ;;  %v8263_v14 = vld [vmem:[%s9278_s23 + $0x120] sm:$0xff]  }
 0x112   : > { %v1280_v17 = vpop.f32.mrb[16].mxu0 }
 0x113   : > { %v1281_v19 = vadd.f32 %v9398_v36, %v1280_v17  ;;  %v7462_v20 = vpop.f32.mrb[17].mxu0  ;;  %7801 = vmatmul.mubr.msk.bf16.gmra.mrb[12].mxu1 %vm2205_vm3, %v2100_v16 }
 0x114   : > { %v1283_v22 = vpop.f32.mrb[18].mxu0  ;;  %7804 = vmatprep.mubr.msk.bf16.mxu1 %vm9176_vm0, %v9175_v1 }
 0x115   : > { %v1284_v23 = vadd.f32 %v9398_v36, %v1283_v22  ;;  %v7463_v24 = vpop.f32.mrb[19].mxu0  ;;  %v1935_v25 = vmax.f32 %v1281_v19, 0.0  ;;  %v8289_v22 = vld [vmem:[%s9414_s15 + $0x48] sm:$0xff]  }
 0x116   : > { %4892 = vrot.lane.b32.xlu1 %v8289_v22, %s9177_s13 }
 0x117   : > { %v1936_v26 = vmax.f32 %v1284_v23, 0.0  ;;  %7569 = vmatmul.mubr.msk.bf16.gmra.mrb[124].mxu0 %vm954_vm2, %v8258_v21 }
 0x118   : > { %7572 = vmatprep.mubr.msk.bf16.mxu0 %vm9176_vm0, %v9175_v1 }
 0x119   : > { %v2101_v27 = vpack.c.bf16 %v1936_v26, %v1935_v25  ;;  %v8264_v25 = vld [vmem:[%s9278_s23 + $0x128] sm:$0xff]  }
 0x11a   : > { %v1288_v28 = vpop.f32.mrb[20].mxu0 }
 0x11b   : > { %v1289_v30 = vadd.f32 %v9398_v36, %v1288_v28  ;;  %v7466_v31 = vpop.f32.mrb[21].mxu0  ;;  %7805 = vmatmul.mubr.msk.bf16.gmra.mrb[16].mxu1 %vm2205_vm3, %v2101_v27 }
 0x11c   : > { %v1291_v33 = vpop.f32.mrb[22].mxu0  ;;  %7808 = vmatprep.mubr.msk.bf16.mxu1 %vm9176_vm0, %v9175_v1 }
 0x11d   : > { %v1292_v34 = vadd.f32 %v9398_v36, %v1291_v33  ;;  %v7467_v35 = vpop.f32.mrb[23].mxu0  ;;  %v1937_v37 = vmax.f32 %v1289_v30, 0.0  ;;  %v8291_v33 = vld [vmem:[%s9414_s15 + $0x50] sm:$0xff]  }
 0x11e   : > { %4894 = vrot.lane.b32.xlu0 %v8291_v33, %s9177_s13 }
 0x11f   : > { %v1938_v38 = vmax.f32 %v1292_v34, 0.0  ;;  %7573 = vmatmul.mubr.msk.bf16.gmra.mrb[128].mxu0 %vm954_vm2, %v8259_v32 }
 0x120   : > { %7576 = vmatprep.mubr.msk.bf16.mxu0 %vm9176_vm0, %v9175_v1 }
 0x121   : > { %v2102_v39 = vpack.c.bf16 %v1938_v38, %v1937_v37  ;;  %v8265_v37 = vld [vmem:[%s9278_s23 + $0x130] sm:$0xff]  }
 0x122   : > { %v1296_v40 = vpop.f32.mrb[24].mxu0 }
 0x123   : > { %v1297_v42 = vadd.f32 %v9398_v36, %v1296_v40  ;;  %v7470_v43 = vpop.f32.mrb[25].mxu0  ;;  %7809 = vmatmul.mubr.msk.bf16.gmra.mrb[20].mxu1 %vm2205_vm3, %v2102_v39 }
 0x124   : > { %v1299_v45 = vpop.f32.mrb[26].mxu0  ;;  %7812 = vmatprep.mubr.msk.bf16.mxu1 %vm9176_vm0, %v9175_v1 }
 0x125   : > { %v1300_v46 = vadd.f32 %v9398_v36, %v1299_v45  ;;  %v7471_v47 = vpop.f32.mrb[27].mxu0  ;;  %v1939_v48 = vmax.f32 %v1297_v42, 0.0  ;;  %v8293_v45 = vld [vmem:[%s9414_s15 + $0x58] sm:$0xff]  }
 0x126   : > { %4896 = vrot.lane.b32.xlu1 %v8293_v45, %s9177_s13 }
 0x127   : > { %v1940_v49 = vmax.f32 %v1300_v46, 0.0  ;;  %7577 = vmatmul.mubr.msk.bf16.gmra.mrb[132].mxu0 %vm954_vm2, %v8260_v44 }
 0x128   : > { %7580 = vmatprep.mubr.msk.bf16.mxu0 %vm9176_vm0, %v9175_v1 }
 0x129   : > { %v2103_v50 = vpack.c.bf16 %v1940_v49, %v1939_v48  ;;  %v8266_v48 = vld [vmem:[%s9278_s23 + $0x138] sm:$0xff]  }
 0x12a   : > { %v1304_v51 = vpop.f32.mrb[28].mxu0 }
 0x12b   : > { %v1305_v53 = vadd.f32 %v9398_v36, %v1304_v51  ;;  %v7474_v54 = vpop.f32.mrb[29].mxu0  ;;  %7813 = vmatmul.mubr.msk.bf16.gmra.mrb[24].mxu1 %vm2205_vm3, %v2103_v50 }
 0x12c   : > { %v1307_v56 = vpop.f32.mrb[30].mxu0  ;;  %7816 = vmatprep.mubr.msk.bf16.mxu1 %vm9176_vm0, %v9175_v1 }
 0x12d   : > { %v1308_v57 = vadd.f32 %v9398_v36, %v1307_v56  ;;  %v7475_v58 = vpop.f32.mrb[31].mxu0  ;;  %v1941_v59 = vmax.f32 %v1305_v53, 0.0  ;;  %v8295_v56 = vld [vmem:[%s9414_s15 + $0x60] sm:$0xff]  }
 0x12e   : > { %4898 = vrot.lane.b32.xlu0 %v8295_v56, %s9177_s13 }
 0x12f   : > { %v1942_v60 = vmax.f32 %v1308_v57, 0.0  ;;  %7581 = vmatmul.mubr.msk.bf16.gmra.mrb[136].mxu0 %vm954_vm2, %v8261_v55 }
 0x130   : > { %7584 = vmatprep.mubr.msk.bf16.mxu0 %vm9176_vm0, %v9175_v1 }
 0x131   : > { %v2104_v61 = vpack.c.bf16 %v1942_v60, %v1941_v59  ;;  %v8267_v59 = vld [vmem:[%s9278_s23 + $0x140] sm:$0xff]  }
 0x132   : > { %v1312_v62 = vpop.f32.mrb[32].mxu0 }
 0x133   : > { %v1313_v0 = vadd.f32 %v9398_v36, %v1312_v62  ;;  %v7478_v2 = vpop.f32.mrb[33].mxu0  ;;  %7817 = vmatmul.mubr.msk.bf16.gmra.mrb[28].mxu1 %vm2205_vm3, %v2104_v61 }
 0x134   : > { %v1315_v4 = vpop.f32.mrb[34].mxu0  ;;  %7820 = vmatprep.mubr.msk.bf16.mxu1 %vm9176_vm0, %v9175_v1 }
 0x135   : > { %v1316_v5 = vadd.f32 %v9398_v36, %v1315_v4  ;;  %v7479_v6 = vpop.f32.mrb[35].mxu0  ;;  %v1943_v7 = vmax.f32 %v1313_v0, 0.0  ;;  %v8297_v4 = vld [vmem:[%s9414_s15 + $0x68] sm:$0xff]  }
 0x136   : > { %4900 = vrot.lane.b32.xlu1 %v8297_v4, %s9177_s13 }
 0x137   : > { %v1944_v8 = vmax.f32 %v1316_v5, 0.0  ;;  %7585 = vmatmul.mubr.msk.bf16.gmra.mrb[140].mxu0 %vm954_vm2, %v8262_v3 }
 0x138   : > { %7588 = vmatprep.mubr.msk.bf16.mxu0 %vm9176_vm0, %v9175_v1 }
 0x139   : > { %v2105_v9 = vpack.c.bf16 %v1944_v8, %v1943_v7  ;;  %v8268_v7 = vld [vmem:[%s9278_s23 + $0x148] sm:$0xff]  }
 0x13a   : > { %v1320_v10 = vpop.f32.mrb[36].mxu0 }
 0x13b   : > { %v1321_v12 = vadd.f32 %v9398_v36, %v1320_v10  ;;  %v7482_v13 = vpop.f32.mrb[37].mxu0  ;;  %7821 = vmatmul.mubr.msk.bf16.gmra.mrb[32].mxu1 %vm2205_vm3, %v2105_v9 }
 0x13c   : > { %v1323_v15 = vpop.f32.mrb[38].mxu0  ;;  %7824 = vmatprep.mubr.msk.bf16.mxu1 %vm9176_vm0, %v9175_v1 }
 0x13d   : > { %v1324_v16 = vadd.f32 %v9398_v36, %v1323_v15  ;;  %v7483_v17 = vpop.f32.mrb[39].mxu0  ;;  %v1945_v18 = vmax.f32 %v1321_v12, 0.0  ;;  %v8299_v15 = vld [vmem:[%s9414_s15 + $0x70] sm:$0xff]  }
 0x13e   : > { %4902 = vrot.lane.b32.xlu0 %v8299_v15, %s9177_s13 }
 0x13f   : > { %v1946_v19 = vmax.f32 %v1324_v16, 0.0  ;;  %7589 = vmatmul.mubr.msk.bf16.gmra.mrb[144].mxu0 %vm954_vm2, %v8263_v14 }
 0x140   : > { %7592 = vmatprep.mubr.msk.bf16.mxu0 %vm9176_vm0, %v9175_v1 }
 0x141   : > { %v2106_v20 = vpack.c.bf16 %v1946_v19, %v1945_v18  ;;  %v8269_v18 = vld [vmem:[%s9278_s23 + $0x150] sm:$0xff]  }
 0x142   : > { %v1328_v21 = vpop.f32.mrb[40].mxu0 }
 0x143   : > { %v1329_v23 = vadd.f32 %v9398_v36, %v1328_v21  ;;  %v7486_v24 = vpop.f32.mrb[41].mxu0  ;;  %7825 = vmatmul.mubr.msk.bf16.gmra.mrb[36].mxu1 %vm2205_vm3, %v2106_v20 }
 0x144   : > { %v1331_v26 = vpop.f32.mrb[42].mxu0  ;;  %7828 = vmatprep.mubr.msk.bf16.mxu1 %vm9176_vm0, %v9175_v1 }
 0x145   : > { %v1332_v27 = vadd.f32 %v9398_v36, %v1331_v26  ;;  %v7487_v28 = vpop.f32.mrb[43].mxu0  ;;  %v1947_v29 = vmax.f32 %v1329_v23, 0.0  ;;  %v8301_v26 = vld [vmem:[%s9414_s15 + $0x78] sm:$0xff]  }
 0x146   : > { %4904 = vrot.lane.b32.xlu1 %v8301_v26, %s9177_s13 }
 0x147   : > { %v1948_v30 = vmax.f32 %v1332_v27, 0.0  ;;  %7593 = vmatmul.mubr.msk.bf16.gmra.mrb[148].mxu0 %vm954_vm2, %v8264_v25 }
 0x148   : > { %7596 = vmatprep.mubr.msk.bf16.mxu0 %vm9176_vm0, %v9175_v1 }
 0x149   : > { %v2107_v31 = vpack.c.bf16 %v1948_v30, %v1947_v29  ;;  %v8270_v29 = vld [vmem:[%s9278_s23 + $0x158] sm:$0xff]  }
 0x14a   : > { %v1336_v32 = vpop.f32.mrb[44].mxu0 }
 0x14b   : > { %v1337_v34 = vadd.f32 %v9398_v36, %v1336_v32  ;;  %v7490_v35 = vpop.f32.mrb[45].mxu0  ;;  %7829 = vmatmul.mubr.msk.bf16.gmra.mrb[40].mxu1 %vm2205_vm3, %v2107_v31 }
 0x14c   : > { %v1339_v38 = vpop.f32.mrb[46].mxu0  ;;  %7832 = vmatprep.mubr.msk.bf16.mxu1 %vm9176_vm0, %v9175_v1 }
 0x14d   : > { %v1340_v39 = vadd.f32 %v9398_v36, %v1339_v38  ;;  %v7491_v40 = vpop.f32.mrb[47].mxu0  ;;  %v1949_v41 = vmax.f32 %v1337_v34, 0.0  ;;  %v8303_v38 = vld [vmem:[%s9414_s15 + $0x80] sm:$0xff]  }
 0x14e   : > { %4906 = vrot.lane.b32.xlu0 %v8303_v38, %s9177_s13 }
 0x14f   : > { %v1950_v42 = vmax.f32 %v1340_v39, 0.0  ;;  %7597 = vmatmul.mubr.msk.bf16.gmra.mrb[152].mxu0 %vm954_vm2, %v8265_v37 }
 0x150   : > { %7600 = vmatprep.mubr.msk.bf16.mxu0 %vm9176_vm0, %v9175_v1 }
 0x151   : > { %v2108_v43 = vpack.c.bf16 %v1950_v42, %v1949_v41  ;;  %v8272_v41 = vld [vmem:[%s9278_s23 + $0x160] sm:$0xff]  }
 0x152   : > { %v1344_v44 = vpop.f32.mrb[48].mxu0 }
 0x153   : > { %v1345_v46 = vadd.f32 %v9398_v36, %v1344_v44  ;;  %v7494_v47 = vpop.f32.mrb[49].mxu0  ;;  %7833 = vmatmul.mubr.msk.bf16.gmra.mrb[44].mxu1 %vm2205_vm3, %v2108_v43 }
 0x154   : > { %v1347_v49 = vpop.f32.mrb[50].mxu0  ;;  %7836 = vmatprep.mubr.msk.bf16.mxu1 %vm9176_vm0, %v9175_v1 }
 0x155   : > { %v1348_v50 = vadd.f32 %v9398_v36, %v1347_v49  ;;  %v7495_v51 = vpop.f32.mrb[51].mxu0  ;;  %v1951_v52 = vmax.f32 %v1345_v46, 0.0  ;;  %v8305_v49 = vld [vmem:[%s9414_s15 + $0x88] sm:$0xff]  }
 0x156   : > { %4908 = vrot.lane.b32.xlu1 %v8305_v49, %s9177_s13 }
 0x157   : > { %v1952_v53 = vmax.f32 %v1348_v50, 0.0  ;;  %7601 = vmatmul.mubr.msk.bf16.gmra.mrb[156].mxu0 %vm954_vm2, %v8266_v48 }
 0x158   : > { %7604 = vmatprep.mubr.msk.bf16.mxu0 %vm9176_vm0, %v9175_v1 }
 0x159   : > { %v2109_v54 = vpack.c.bf16 %v1952_v53, %v1951_v52  ;;  %v8274_v52 = vld [vmem:[%s9278_s23 + $0x168] sm:$0xff]  }
 0x15a   : > { %v1352_v55 = vpop.f32.mrb[52].mxu0 }
 0x15b   : > { %v1353_v57 = vadd.f32 %v9398_v36, %v1352_v55  ;;  %v7498_v58 = vpop.f32.mrb[53].mxu0  ;;  %7837 = vmatmul.mubr.msk.bf16.gmra.mrb[48].mxu1 %vm2205_vm3, %v2109_v54 }
 0x15c   : > { %v1355_v60 = vpop.f32.mrb[54].mxu0  ;;  %7840 = vmatprep.mubr.msk.bf16.mxu1 %vm9176_vm0, %v9175_v1 }
 0x15d   : > { %v1356_v61 = vadd.f32 %v9398_v36, %v1355_v60  ;;  %v7499_v62 = vpop.f32.mrb[55].mxu0  ;;  %v1953_v63 = vmax.f32 %v1353_v57, 0.0  ;;  %v8307_v60 = vld [vmem:[%s9414_s15 + $0x90] sm:$0xff]  }
 0x15e   : > { %4910 = vrot.lane.b32.xlu0 %v8307_v60, %s9177_s13 }
 0x15f   : > { %v1954_v0 = vmax.f32 %v1356_v61, 0.0  ;;  %7605 = vmatmul.mubr.msk.bf16.gmra.mrb[160].mxu0 %vm954_vm2, %v8267_v59 }
 0x160   : > { %7608 = vmatprep.mubr.msk.bf16.mxu0 %vm9176_vm0, %v9175_v1 }
 0x161   : > { %v2110_v2 = vpack.c.bf16 %v1954_v0, %v1953_v63  ;;  %v8276_v63 = vld [vmem:[%s9278_s23 + $0x170] sm:$0xff]  }
 0x162   : > { %v1360_v3 = vpop.f32.mrb[56].mxu0 }
 0x163   : > { %v1361_v5 = vadd.f32 %v9398_v36, %v1360_v3  ;;  %v7502_v6 = vpop.f32.mrb[57].mxu0  ;;  %7841 = vmatmul.mubr.msk.bf16.gmra.mrb[52].mxu1 %vm2205_vm3, %v2110_v2 }
 0x164   : > { %v1363_v8 = vpop.f32.mrb[58].mxu0  ;;  %7844 = vmatprep.mubr.msk.bf16.mxu1 %vm9176_vm0, %v9175_v1 }
 0x165   : > { %v1364_v9 = vadd.f32 %v9398_v36, %v1363_v8  ;;  %v7503_v10 = vpop.f32.mrb[59].mxu0  ;;  %v1955_v11 = vmax.f32 %v1361_v5, 0.0  ;;  %v8309_v8 = vld [vmem:[%s9414_s15 + $0x98] sm:$0xff]  }
 0x166   : > { %4912 = vrot.lane.b32.xlu1 %v8309_v8, %s9177_s13 }
 0x167   : > { %v1956_v12 = vmax.f32 %v1364_v9, 0.0  ;;  %7609 = vmatmul.mubr.msk.bf16.gmra.mrb[164].mxu0 %vm954_vm2, %v8268_v7 }
 0x168   : > { %7612 = vmatprep.mubr.msk.bf16.mxu0 %vm9176_vm0, %v9175_v1 }
 0x169   : > { %v2111_v13 = vpack.c.bf16 %v1956_v12, %v1955_v11  ;;  %v8278_v11 = vld [vmem:[%s9278_s23 + $0x178] sm:$0xff]  }
 0x16a   : > { %v1368_v14 = vpop.f32.mrb[60].mxu0 }
 0x16b   : > { %v1369_v16 = vadd.f32 %v9398_v36, %v1368_v14  ;;  %v7506_v17 = vpop.f32.mrb[61].mxu0  ;;  %7845 = vmatmul.mubr.msk.bf16.gmra.mrb[56].mxu1 %vm2205_vm3, %v2111_v13 }
 0x16c   : > { %v1371_v19 = vpop.f32.mrb[62].mxu0  ;;  %7848 = vmatprep.mubr.msk.bf16.mxu1 %vm9176_vm0, %v9175_v1 }
 0x16d   : > { %v1372_v20 = vadd.f32 %v9398_v36, %v1371_v19  ;;  %v7507_v21 = vpop.f32.mrb[63].mxu0  ;;  %v1957_v22 = vmax.f32 %v1369_v16, 0.0  ;;  %v8311_v19 = vld [vmem:[%s9414_s15 + $0xa0] sm:$0xff]  }
 0x16e   : > { %4914 = vrot.lane.b32.xlu0 %v8311_v19, %s9177_s13 }
 0x16f   : > { %v1958_v23 = vmax.f32 %v1372_v20, 0.0  ;;  %7613 = vmatmul.mubr.msk.bf16.gmra.mrb[168].mxu0 %vm954_vm2, %v8269_v18 }
 0x170   : > { %7616 = vmatprep.mubr.msk.bf16.mxu0 %vm9176_vm0, %v9175_v1 }
 0x171   : > { %v2112_v24 = vpack.c.bf16 %v1958_v23, %v1957_v22  ;;  %v8280_v22 = vld [vmem:[%s9278_s23 + $0x180] sm:$0xff]  }
 0x172   : > { %v1376_v25 = vpop.f32.mrb[64].mxu0 }
 0x173   : > { %v1377_v27 = vadd.f32 %v9398_v36, %v1376_v25  ;;  %v7510_v28 = vpop.f32.mrb[65].mxu0  ;;  %7849 = vmatmul.mubr.msk.bf16.gmra.mrb[60].mxu1 %vm2205_vm3, %v2112_v24  ;;  %v9645_v24 = vld [vmem:[%s11089_s2] ss:$0 sm:$0xff] }
 0x174   : > { %v1379_v30 = vpop.f32.mrb[66].mxu0  ;;  %7852 = vmatprep.mubr.msk.bf16.mxu1 %vm9176_vm0, %v9175_v1 }
 0x175   : > { %v1380_v31 = vadd.f32 %v9398_v36, %v1379_v30  ;;  %v7511_v32 = vpop.f32.mrb[67].mxu0  ;;  %v1959_v33 = vmax.f32 %v1377_v27, 0.0  ;;  %v8313_v30 = vld [vmem:[%s9414_s15 + $0xa8] sm:$0xff]  }
 0x176   : > { %4916 = vrot.lane.b32.xlu1 %v8313_v30, %s9177_s13 }
 0x177   : > { %v1960_v34 = vmax.f32 %v1380_v31, 0.0  ;;  %7617 = vmatmul.mubr.msk.bf16.gmra.mrb[172].mxu0 %vm954_vm2, %v8270_v29 }
 0x178   : > { %7620 = vmatprep.mubr.msk.bf16.mxu0 %vm9176_vm0, %v9175_v1 }
 0x179   : > { %v2113_v35 = vpack.c.bf16 %v1960_v34, %v1959_v33  ;;  %v8282_v33 = vld [vmem:[%s9278_s23 + $0x188] sm:$0xff]  }
 0x17a   : > { %v1384_v37 = vpop.f32.mrb[68].mxu0 }
 0x17b   : > { %v1385_v39 = vadd.f32 %v9398_v36, %v1384_v37  ;;  %v7514_v40 = vpop.f32.mrb[69].mxu0  ;;  %7853 = vmatmul.mubr.msk.bf16.gmra.mrb[64].mxu1 %vm2205_vm3, %v2113_v35 }
 0x17c   : > { %v1387_v42 = vpop.f32.mrb[70].mxu0  ;;  %7856 = vmatprep.mubr.msk.bf16.mxu1 %vm9176_vm0, %v9175_v1 }
 0x17d   : > { %v1388_v43 = vadd.f32 %v9398_v36, %v1387_v42  ;;  %v7515_v44 = vpop.f32.mrb[71].mxu0  ;;  %v1961_v45 = vmax.f32 %v1385_v39, 0.0  ;;  %v8315_v42 = vld [vmem:[%s9414_s15 + $0xb0] sm:$0xff]  }
 0x17e   : > { %4918 = vrot.lane.b32.xlu0 %v8315_v42, %s9177_s13 }
 0x17f   : > { %v1962_v46 = vmax.f32 %v1388_v43, 0.0  ;;  %7621 = vmatmul.mubr.msk.bf16.gmra.mrb[176].mxu0 %vm954_vm2, %v8272_v41 }
 0x180   : > { %7624 = vmatprep.mubr.msk.bf16.mxu0 %vm9176_vm0, %v9175_v1 }
 0x181   : > { %v2114_v47 = vpack.c.bf16 %v1962_v46, %v1961_v45  ;;  %v8284_v45 = vld [vmem:[%s9278_s23 + $0x190] sm:$0xff]  }
 0x182   : > { %v1392_v48 = vpop.f32.mrb[72].mxu0 }
 0x183   : > { %v1393_v50 = vadd.f32 %v9398_v36, %v1392_v48  ;;  %v7518_v51 = vpop.f32.mrb[73].mxu0  ;;  %7857 = vmatmul.mubr.msk.bf16.gmra.mrb[68].mxu1 %vm2205_vm3, %v2114_v47 }
 0x184   : > { %v1395_v53 = vpop.f32.mrb[74].mxu0  ;;  %7860 = vmatprep.mubr.msk.bf16.mxu1 %vm9176_vm0, %v9175_v1 }
 0x185   : > { %v1396_v54 = vadd.f32 %v9398_v36, %v1395_v53  ;;  %v7519_v55 = vpop.f32.mrb[75].mxu0  ;;  %v1963_v56 = vmax.f32 %v1393_v50, 0.0  ;;  %v8317_v53 = vld [vmem:[%s9414_s15 + $0xb8] sm:$0xff]  }
 0x186   : > { %4920 = vrot.lane.b32.xlu1 %v8317_v53, %s9177_s13 }
 0x187   : > { %v1964_v57 = vmax.f32 %v1396_v54, 0.0  ;;  %7625 = vmatmul.mubr.msk.bf16.gmra.mrb[180].mxu0 %vm954_vm2, %v8274_v52 }
 0x188   : > { %7628 = vmatprep.mubr.msk.bf16.mxu0 %vm9176_vm0, %v9175_v1 }
 0x189   : > { %v2115_v58 = vpack.c.bf16 %v1964_v57, %v1963_v56  ;;  %v8286_v56 = vld [vmem:[%s9278_s23 + $0x198] sm:$0xff]  }
 0x18a   : > { %v1400_v59 = vpop.f32.mrb[76].mxu0 }
 0x18b   : > { %v1401_v61 = vadd.f32 %v9398_v36, %v1400_v59  ;;  %v7522_v62 = vpop.f32.mrb[77].mxu0  ;;  %7861 = vmatmul.mubr.msk.bf16.gmra.mrb[72].mxu1 %vm2205_vm3, %v2115_v58 }
 0x18c   : > { %v1403_v0 = vpop.f32.mrb[78].mxu0  ;;  %7864 = vmatprep.mubr.msk.bf16.mxu1 %vm9176_vm0, %v9175_v1 }
 0x18d   : > { %v1404_v2 = vadd.f32 %v9398_v36, %v1403_v0  ;;  %v7523_v3 = vpop.f32.mrb[79].mxu0  ;;  %v1965_v4 = vmax.f32 %v1401_v61, 0.0  ;;  %v8319_v0 = vld [vmem:[%s9414_s15 + $0xc0] sm:$0xff]  }
 0x18e   : > { %4922 = vrot.lane.b32.xlu0 %v8319_v0, %s9177_s13 }
 0x18f   : > { %v1966_v5 = vmax.f32 %v1404_v2, 0.0  ;;  %7629 = vmatmul.mubr.msk.bf16.gmra.mrb[184].mxu0 %vm954_vm2, %v8276_v63 }
 0x190   : > { %7632 = vmatprep.mubr.msk.bf16.mxu0 %vm9176_vm0, %v9175_v1 }
 0x191   : > { %v2116_v6 = vpack.c.bf16 %v1966_v5, %v1965_v4  ;;  %v8288_v4 = vld [vmem:[%s9278_s23 + $0x1a0] sm:$0xff]  }
 0x192   : > { %v1408_v7 = vpop.f32.mrb[80].mxu0 }
 0x193   : > { %v1409_v9 = vadd.f32 %v9398_v36, %v1408_v7  ;;  %v7526_v10 = vpop.f32.mrb[81].mxu0  ;;  %7865 = vmatmul.mubr.msk.bf16.gmra.mrb[76].mxu1 %vm2205_vm3, %v2116_v6 }
 0x194   : > { %v1411_v12 = vpop.f32.mrb[82].mxu0  ;;  %7868 = vmatprep.mubr.msk.bf16.mxu1 %vm9176_vm0, %v9175_v1 }
 0x195   : > { %v1412_v13 = vadd.f32 %v9398_v36, %v1411_v12  ;;  %v7527_v14 = vpop.f32.mrb[83].mxu0  ;;  %v1967_v15 = vmax.f32 %v1409_v9, 0.0  ;;  %v8321_v12 = vld [vmem:[%s9414_s15 + $0xc8] sm:$0xff]  }
 0x196   : > { %4924 = vrot.lane.b32.xlu1 %v8321_v12, %s9177_s13 }
 0x197   : > { %v1968_v16 = vmax.f32 %v1412_v13, 0.0  ;;  %7633 = vmatmul.mubr.msk.bf16.gmra.mrb[188].mxu0 %vm954_vm2, %v8278_v11 }
 0x198   : > { %7636 = vmatprep.mubr.msk.bf16.mxu0 %vm9176_vm0, %v9175_v1 }
 0x199   : > { %v2117_v17 = vpack.c.bf16 %v1968_v16, %v1967_v15  ;;  %v8290_v15 = vld [vmem:[%s9278_s23 + $0x1a8] sm:$0xff]  }
 0x19a   : > { %v1416_v18 = vpop.f32.mrb[84].mxu0 }
 0x19b   : > { %v1417_v20 = vadd.f32 %v9398_v36, %v1416_v18  ;;  %v7530_v21 = vpop.f32.mrb[85].mxu0  ;;  %7869 = vmatmul.mubr.msk.bf16.gmra.mrb[80].mxu1 %vm2205_vm3, %v2117_v17 }
 0x19c   : > { %v1419_v23 = vpop.f32.mrb[86].mxu0  ;;  %7872 = vmatprep.mubr.msk.bf16.mxu1 %vm9176_vm0, %v9175_v1 }
 0x19d   : > { %v1420_v25 = vadd.f32 %v9645_v24, %v1419_v23  ;;  %v7531_v36 = vpop.f32.mrb[87].mxu0  ;;  %v1969_v26 = vmax.f32 %v1417_v20, 0.0  ;;  %v8323_v23 = vld [vmem:[%s9414_s15 + $0xd0] sm:$0xff]  }
 0x19e   : > { %4926 = vrot.lane.b32.xlu0 %v8323_v23, %s9177_s13 }
 0x19f   : > { %v1970_v27 = vmax.f32 %v1420_v25, 0.0  ;;  %7637 = vmatmul.mubr.msk.bf16.gmra.mrb[192].mxu0 %vm954_vm2, %v8280_v22 }
 0x1a0   : > { %7640 = vmatprep.mubr.msk.bf16.mxu0 %vm9176_vm0, %v9175_v1 }
 0x1a1   : > { %v2118_v28 = vpack.c.bf16 %v1970_v27, %v1969_v26  ;;  %v8292_v26 = vld [vmem:[%s9278_s23 + $0x1b0] sm:$0xff]  }
 0x1a2   : > { %v1424_v29 = vpop.f32.mrb[88].mxu0 }
 0x1a3   : > { %v1425_v31 = vadd.f32 %v9645_v24, %v1424_v29  ;;  %v7534_v32 = vpop.f32.mrb[89].mxu0  ;;  %7873 = vmatmul.mubr.msk.bf16.gmra.mrb[84].mxu1 %vm2205_vm3, %v2118_v28  ;;  %v9713_v28 = vld [vmem:[%s11091_s4] ss:$0 sm:$0xff] }
 0x1a4   : > { %v1427_v34 = vpop.f32.mrb[90].mxu0  ;;  %7876 = vmatprep.mubr.msk.bf16.mxu1 %vm9176_vm0, %v9175_v1 }
 0x1a5   : > { %v1428_v35 = vadd.f32 %v9645_v24, %v1427_v34  ;;  %v7535_v37 = vpop.f32.mrb[91].mxu0  ;;  %v1971_v38 = vmax.f32 %v1425_v31, 0.0 }
 0x1a7   : > { %v1972_v39 = vmax.f32 %v1428_v35, 0.0  ;;  %7641 = vmatmul.mubr.msk.bf16.gmra.mrb[196].mxu0 %vm954_vm2, %v8282_v33 }
 0x1a8   : > { %7644 = vmatprep.mubr.msk.bf16.mxu0 %vm9176_vm0, %v9175_v1 }
 0x1a9   : > { %v2119_v40 = vpack.c.bf16 %v1972_v39, %v1971_v38 }
 0x1aa   : > { %v1432_v41 = vpop.f32.mrb[92].mxu0 }
 0x1ab   : > { %v1433_v43 = vadd.f32 %v9645_v24, %v1432_v41  ;;  %v7538_v44 = vpop.f32.mrb[93].mxu0  ;;  %7877 = vmatmul.mubr.msk.bf16.gmra.mrb[88].mxu1 %vm2205_vm3, %v2119_v40 }
 0x1ac   : > { %v1435_v46 = vpop.f32.mrb[94].mxu0  ;;  %7880 = vmatprep.mubr.msk.bf16.mxu1 %vm9176_vm0, %v9175_v1 }
 0x1ad   : > { %v1436_v47 = vadd.f32 %v9645_v24, %v1435_v46  ;;  %v7539_v48 = vpop.f32.mrb[95].mxu0  ;;  %v1973_v49 = vmax.f32 %v1433_v43, 0.0  ;;  %v8325_v43 = vld [vmem:[%s9414_s15 + $0xd8] sm:$0xff]  }
 0x1ae   : > { %4928 = vrot.lane.b32.xlu1 %v8325_v43, %s9177_s13 }
 0x1af   : > { %v1974_v50 = vmax.f32 %v1436_v47, 0.0  ;;  %7645 = vmatmul.mubr.msk.bf16.gmra.mrb[200].mxu0 %vm954_vm2, %v8284_v45  ;;  %v8294_v47 = vld [vmem:[%s9278_s23 + $0x1b8] sm:$0xff]  }
 0x1b0   : > { %7648 = vmatprep.mubr.msk.bf16.mxu0 %vm9176_vm0, %v9175_v1 }
 0x1b1   : > { %v2120_v51 = vpack.c.bf16 %v1974_v50, %v1973_v49 }
 0x1b2   : > { %v1440_v52 = vpop.f32.mrb[96].mxu0 }
 0x1b3   : > { %v1441_v54 = vadd.f32 %v9645_v24, %v1440_v52  ;;  %v7542_v55 = vpop.f32.mrb[97].mxu0  ;;  %7881 = vmatmul.mubr.msk.bf16.gmra.mrb[92].mxu1 %vm2205_vm3, %v2120_v51 }
 0x1b4   : > { %v1443_v57 = vpop.f32.mrb[98].mxu0  ;;  %7884 = vmatprep.mubr.msk.bf16.mxu1 %vm9176_vm0, %v9175_v1 }
 0x1b5   : > { %v1444_v58 = vadd.f32 %v9645_v24, %v1443_v57  ;;  %v7543_v59 = vpop.f32.mrb[99].mxu0  ;;  %v1975_v60 = vmax.f32 %v1441_v54, 0.0 }
 0x1b7   : > { %v1976_v61 = vmax.f32 %v1444_v58, 0.0  ;;  %7649 = vmatmul.mubr.msk.bf16.gmra.mrb[204].mxu0 %vm954_vm2, %v8286_v56 }
 0x1b8   : > { %7652 = vmatprep.mubr.msk.bf16.mxu0 %vm9176_vm0, %v9175_v1 }
 0x1b9   : > { %v2121_v62 = vpack.c.bf16 %v1976_v61, %v1975_v60 }
 0x1ba   : > { %v1448_v63 = vpop.f32.mrb[100].mxu0 }
 0x1bb   : > { %v1449_v2 = vadd.f32 %v9645_v24, %v1448_v63  ;;  %v7546_v3 = vpop.f32.mrb[101].mxu0  ;;  %7885 = vmatmul.mubr.msk.bf16.gmra.mrb[96].mxu1 %vm2205_vm3, %v2121_v62  ;;  %v8327_v62 = vld [vmem:[%s9414_s15 + $0xe0] sm:$0xff]  }
 0x1bc   : > { %v1451_v5 = vpop.f32.mrb[102].mxu0  ;;  %7888 = vmatprep.mubr.msk.bf16.mxu1 %vm9176_vm0, %v9175_v1  ;;  %v8296_v3 = vld [vmem:[%s9278_s23 + $0x1c0] sm:$0xff]   ;;  %4930 = vrot.lane.b32.xlu0 %v8327_v62, %s9177_s13 }
 0x1bd   : > { %v1452_v6 = vadd.f32 %v9645_v24, %v1451_v5  ;;  %v7547_v7 = vpop.f32.mrb[103].mxu0  ;;  %v1977_v8 = vmax.f32 %v1449_v2, 0.0 }
 0x1bf   : > { %v1978_v9 = vmax.f32 %v1452_v6, 0.0  ;;  %7653 = vmatmul.mubr.msk.bf16.gmra.mrb[208].mxu0 %vm954_vm2, %v8288_v4 }
 0x1c0   : > { %7656 = vmatprep.mubr.msk.bf16.mxu0 %vm9176_vm0, %v9175_v1 }
 0x1c1   : > { %v2122_v10 = vpack.c.bf16 %v1978_v9, %v1977_v8 }
 0x1c2   : > { %v1456_v11 = vpop.f32.mrb[104].mxu0 }
 0x1c3   : > { %v1457_v13 = vadd.f32 %v9645_v24, %v1456_v11  ;;  %v7550_v14 = vpop.f32.mrb[105].mxu0  ;;  %7889 = vmatmul.mubr.msk.bf16.gmra.mrb[100].mxu1 %vm2205_vm3, %v2122_v10 }
 0x1c4   : > { %v1459_v16 = vpop.f32.mrb[106].mxu0  ;;  %7892 = vmatprep.mubr.msk.bf16.mxu1 %vm9176_vm0, %v9175_v1 }
 0x1c5   : > { %v1460_v17 = vadd.f32 %v9645_v24, %v1459_v16  ;;  %v7551_v18 = vpop.f32.mrb[107].mxu0  ;;  %v1979_v19 = vmax.f32 %v1457_v13, 0.0 }
 0x1c7   : > { %v1980_v20 = vmax.f32 %v1460_v17, 0.0  ;;  %7657 = vmatmul.mubr.msk.bf16.gmra.mrb[212].mxu0 %vm954_vm2, %v8290_v15 }
 0x1c8   : > { %7660 = vmatprep.mubr.msk.bf16.mxu0 %vm9176_vm0, %v9175_v1 }
 0x1c9   : > { %v2123_v21 = vpack.c.bf16 %v1980_v20, %v1979_v19 }
 0x1ca   : > { %v1464_v22 = vpop.f32.mrb[108].mxu0 }
 0x1cb   : > { %v1465_v25 = vadd.f32 %v9645_v24, %v1464_v22  ;;  %v7554_v36 = vpop.f32.mrb[109].mxu0  ;;  %7893 = vmatmul.mubr.msk.bf16.gmra.mrb[104].mxu1 %vm2205_vm3, %v2123_v21  ;;  %v8329_v22 = vld [vmem:[%s9414_s15 + $0xe8] sm:$0xff]  }
 0x1cc   : > { %v1467_v27 = vpop.f32.mrb[110].mxu0  ;;  %7896 = vmatprep.mubr.msk.bf16.mxu1 %vm9176_vm0, %v9175_v1  ;;  %4932 = vrot.lane.b32.xlu1 %v8329_v22, %s9177_s13 }
 0x1cd   : > { %v1468_v29 = vadd.f32 %v9645_v24, %v1467_v27  ;;  %v7555_v30 = vpop.f32.mrb[111].mxu0  ;;  %v1981_v32 = vmax.f32 %v1465_v25, 0.0 }
 0x1ce   : > { %v2495_v31 = vpop.f32.mrb[0].mxu1 }
 0x1cf   : > { %v1982_v33 = vmax.f32 %v1468_v29, 0.0  ;;  %v2496_v34 = vadd.f32 %v9713_v28, %v2495_v31  ;;  %7661 = vmatmul.mubr.msk.bf16.gmra.mrb[216].mxu0 %vm954_vm2, %v8292_v26  ;;  %v7790_v35 = vpop.f32.mrb[1].mxu1  ;;  %v8298_v26 = vld [vmem:[%s9278_s23 + $0x1c8] sm:$0xff]  }
 0x1d0   : > { %v2498_v37 = vpop.f32.mrb[2].mxu1  ;;  %7664 = vmatprep.mubr.msk.bf16.mxu0 %vm9176_vm0, %v9175_v1 }
 0x1d1   : > { %v2124_v38 = vpack.c.bf16 %v1982_v33, %v1981_v32  ;;  %v6814_v39 = vmul.f32 -1.442695, %v2496_v34  ;;  %v2499_v40 = vadd.f32 %v9713_v28, %v2498_v37  ;;  %v7791_v41 = vpop.f32.mrb[3].mxu1 }
 0x1d2   : > { %v1472_v42 = vpop.f32.mrb[112].mxu0 }
 0x1d3   : > { %8397 = vpow2.f32 %v6814_v39  ;;  %v6815_v44 = vmul.f32 -1.442695, %v2499_v40  ;;  %v1473_v45 = vadd.f32 %v9645_v24, %v1472_v42  ;;  %v7558_v46 = vpop.f32.mrb[113].mxu0  ;;  %7897 = vmatmul.mubr.msk.bf16.gmra.mrb[108].mxu1 %vm2205_vm3, %v2124_v38 }
 0x1d4   : > { %v1475_v48 = vpop.f32.mrb[114].mxu0  ;;  %7900 = vmatprep.mubr.msk.bf16.mxu1 %vm9176_vm0, %v9175_v1 }
 0x1d5   : > { %8399 = vpow2.f32 %v6815_v44  ;;  %v1476_v49 = vadd.f32 %v9645_v24, %v1475_v48  ;;  %v7559_v50 = vpop.f32.mrb[115].mxu0  ;;  %v1983_v52 = vmax.f32 %v1473_v45, 0.0 }
 0x1d6   : > { %v2503_v51 = vpop.f32.mrb[4].mxu1 }
 0x1d7   : > { %v1984_v53 = vmax.f32 %v1476_v49, 0.0  ;;  %v2504_v54 = vadd.f32 %v9713_v28, %v2503_v51  ;;  %7665 = vmatmul.mubr.msk.bf16.gmra.mrb[220].mxu0 %vm954_vm2, %v8294_v47  ;;  %v7794_v55 = vpop.f32.mrb[5].mxu1  ;;  %v8331_v47 = vld [vmem:[%s9414_s15 + $0xf0] sm:$0xff]  }
 0x1d8   : > { %v2506_v56 = vpop.f32.mrb[6].mxu1  ;;  %7668 = vmatprep.mubr.msk.bf16.mxu0 %vm9176_vm0, %v9175_v1  ;;  %v4875_v55 = vpop.permute.xlu0 %4874  ;;  %4934 = vrot.lane.b32.xlu0 %v8331_v47, %s9177_s13 }
 0x1d9   : > { %v2125_v57 = vpack.c.bf16 %v1984_v53, %v1983_v52  ;;  %v6816_v58 = vmul.f32 -1.442695, %v2504_v54  ;;  %v2507_v59 = vadd.f32 %v9713_v28, %v2506_v56  ;;  %v7795_v60 = vpop.f32.mrb[7].mxu1  ;;  %v8300_v52 = vld [vmem:[%s9278_s23 + $0x1d0] sm:$0xff]  }
 0x1da   : > { %v1480_v61 = vpop.f32.mrb[116].mxu0 }
 0x1db   : > { %8401 = vpow2.f32 %v6816_v58  ;;  %v6817_v63 = vmul.f32 -1.442695, %v2507_v59  ;;  %v1481_v0 = vadd.f32 %v9645_v24, %v1480_v61  ;;  %v7562_v2 = vpop.f32.mrb[117].mxu0  ;;  %7901 = vmatmul.mubr.msk.bf16.gmra.mrb[112].mxu1 %vm2205_vm3, %v2125_v57 }
 0x1dc   : > { %v1483_v4 = vpop.f32.mrb[118].mxu0  ;;  %7904 = vmatprep.mubr.msk.bf16.mxu1 %vm9176_vm0, %v9175_v1  ;;  %v4877_v22 = vpop.permute.xlu0 %4876 }
 0x1dd   : > { %v8398_v5 = vpop.eup %8397  ;;  %8403 = vpow2.f32 %v6817_v63  ;;  %v1484_v6 = vadd.f32 %v9645_v24, %v1483_v4  ;;  %v7563_v7 = vpop.f32.mrb[119].mxu0  ;;  %v1985_v11 = vmax.f32 %v1481_v0, 0.0 }
 0x1de   : > { %v3684_v8 = vadd.f32 1.0, %v8398_v5  ;;  %v2511_v9 = vpop.f32.mrb[8].mxu1 }
 0x1df   : > { %v8400_v10 = vpop.eup %8399  ;;  %v1986_v12 = vmax.f32 %v1484_v6, 0.0  ;;  %v2512_v13 = vadd.f32 %v9713_v28, %v2511_v9  ;;  %7669 = vmatmul.mubr.msk.bf16.gmra.mrb[224].mxu0 %vm954_vm2, %v8296_v3  ;;  %v7798_v14 = vpop.f32.mrb[9].mxu1 }
 0x1e0   : > { %v3685_v15 = vadd.f32 1.0, %v8400_v10  ;;  %v2514_v16 = vpop.f32.mrb[10].mxu1  ;;  %7672 = vmatprep.mubr.msk.bf16.mxu0 %vm9176_vm0, %v9175_v1  ;;  %8405 = vrcp.f32 %v3684_v8  ;;  %v8333_v14 = vld [vmem:[%s9414_s15 + $0xf8] sm:$0xff]  }
 0x1e1   : > { %v2126_v17 = vpack.c.bf16 %v1986_v12, %v1985_v11  ;;  %v6818_v18 = vmul.f32 -1.442695, %v2512_v13  ;;  %v2515_v19 = vadd.f32 %v9713_v28, %v2514_v16  ;;  %v7799_v20 = vpop.f32.mrb[11].mxu1  ;;  %4936 = vrot.lane.b32.xlu1 %v8333_v14, %s9177_s13 }
 0x1e2   : > { %8407 = vrcp.f32 %v3685_v15  ;;  %v1488_v21 = vpop.f32.mrb[120].mxu0 }
 0x1e3   : > { %8409 = vpow2.f32 %v6818_v18  ;;  %v6819_v23 = vmul.f32 -1.442695, %v2515_v19  ;;  %v1489_v25 = vadd.f32 %v9645_v24, %v1488_v21  ;;  %v7566_v36 = vpop.f32.mrb[121].mxu0  ;;  %7905 = vmatmul.mubr.msk.bf16.gmra.mrb[116].mxu1 %vm2205_vm3, %v2126_v17  ;;  %v8302_v19 = vld [vmem:[%s9278_s23 + $0x1d8] sm:$0xff]  }
 0x1e4   : > { %v1491_v27 = vpop.f32.mrb[122].mxu0  ;;  %7908 = vmatprep.mubr.msk.bf16.mxu1 %vm9176_vm0, %v9175_v1 }
 0x1e5   : > { %v8402_v29 = vpop.eup %8401  ;;  %8411 = vpow2.f32 %v6819_v23  ;;  %v1492_v30 = vadd.f32 %v9645_v24, %v1491_v27  ;;  %v7567_v31 = vpop.f32.mrb[123].mxu0  ;;  %v1987_v35 = vmax.f32 %v1489_v25, 0.0 }
 0x1e6   : > { %v3686_v32 = vadd.f32 1.0, %v8402_v29  ;;  %v2519_v33 = vpop.f32.mrb[12].mxu1 }
 0x1e7   : > { %v8404_v34 = vpop.eup %8403  ;;  %v1988_v37 = vmax.f32 %v1492_v30, 0.0  ;;  %v2520_v38 = vadd.f32 %v9713_v28, %v2519_v33  ;;  %7673 = vmatmul.mubr.msk.bf16.gmra.mrb[228].mxu0 %vm954_vm2, %v8298_v26  ;;  %v7802_v39 = vpop.f32.mrb[13].mxu1 }
 0x1e8   : > { %v3687_v40 = vadd.f32 1.0, %v8404_v34  ;;  %v2522_v41 = vpop.f32.mrb[14].mxu1  ;;  %7676 = vmatprep.mubr.msk.bf16.mxu0 %vm9176_vm0, %v9175_v1  ;;  %8413 = vrcp.f32 %v3686_v32 }
 0x1e9   : > { %v2127_v42 = vpack.c.bf16 %v1988_v37, %v1987_v35  ;;  %v6820_v43 = vmul.f32 -1.442695, %v2520_v38  ;;  %v2523_v44 = vadd.f32 %v9713_v28, %v2522_v41  ;;  %v7803_v45 = vpop.f32.mrb[15].mxu1 }
 0x1ea   : > { %8415 = vrcp.f32 %v3687_v40  ;;  %v1496_v46 = vpop.f32.mrb[124].mxu0  ;;  %v8406_v48 = vpop.eup %8405 }
 0x1eb   : > { %8417 = vpow2.f32 %v6820_v43  ;;  %v6821_v49 = vmul.f32 -1.442695, %v2523_v44  ;;  %v1497_v50 = vadd.f32 %v9645_v24, %v1496_v46  ;;  %v7570_v51 = vpop.f32.mrb[125].mxu0  ;;  %7909 = vmatmul.mubr.msk.bf16.gmra.mrb[120].mxu1 %vm2205_vm3, %v2127_v42  ;;  %v8335_v46 = vld [vmem:[%s9414_s15 + $0x100] sm:$0xff]  }
 0x1ec   : > { %v8408_v53 = vpop.eup %8407  ;;  %v1499_v54 = vpop.f32.mrb[126].mxu0  ;;  %7912 = vmatprep.mubr.msk.bf16.mxu1 %vm9176_vm0, %v9175_v1  ;;  %v8304_v51 = vld [vmem:[%s9278_s23 + $0x1e0] sm:$0xff]   ;;  %4938 = vrot.lane.b32.xlu0 %v8335_v46, %s9177_s13 }
 0x1ed   : > { %v8410_v56 = vpop.eup %8409  ;;  %8419 = vpow2.f32 %v6821_v49  ;;  %v1500_v57 = vadd.f32 %v9645_v24, %v1499_v54  ;;  %v7571_v58 = vpop.f32.mrb[127].mxu0  ;;  %v4194_v59 = vpack.c.bf16 %v8408_v53, %v8406_v48  ;;  %v1989_v63 = vmax.f32 %v1497_v50, 0.0 }
 0x1ee   : > { %v3688_v60 = vadd.f32 1.0, %v8410_v56  ;;  %v2527_v61 = vpop.f32.mrb[16].mxu1  ;;  %v4879_v54 = vpop.permute.xlu1 %4878 }
 0x1ef   : > { %v8412_v62 = vpop.eup %8411  ;;  %v1990_v0 = vmax.f32 %v1500_v57, 0.0  ;;  %v5047_v2 = vsel %vm5044_vm4, %v4194_v59, %v4875_v55  ;;  %v2528_v3 = vadd.f32 %v9713_v28, %v2527_v61  ;;  %7677 = vmatmul.mubr.msk.bf16.gmra.mrb[232].mxu0 %vm954_vm2, %v8300_v52  ;;  %v7806_v4 = vpop.f32.mrb[17].mxu1 }
 0x1f0   : > { %v3689_v5 = vadd.f32 1.0, %v8412_v62  ;;  %v7069_v6 = vcombine.low %v5047_v2, %v5047_v2  ;;  %v7070_v7 = vcombine.high %v5047_v2, %v5047_v2  ;;  %v2530_v8 = vpop.f32.mrb[18].mxu1  ;;  %7680 = vmatprep.mubr.msk.bf16.mxu0 %vm9176_vm0, %v9175_v1  ;;  %8421 = vrcp.f32 %v3688_v60 }
 0x1f1   : > { %v2128_v9 = vpack.c.bf16 %v1990_v0, %v1989_v63  ;;  %v6822_v10 = vmul.f32 -1.442695, %v2528_v3  ;;  %v2531_v11 = vadd.f32 %v9713_v28, %v2530_v8  ;;  %v7807_v12 = vpop.f32.mrb[19].mxu1 }
 0x1f2   : > { %8423 = vrcp.f32 %v3689_v5  ;;  %5896 = vst.msk [vmem:[%s9781_s20] sm:$0xf] %vm5895_vm5, %v7069_v6  ;;  %5897 = vst.msk [vmem:[%s9781_s20 + $0x4] sm:$0xf] %vm5895_vm5, %v7070_v7  ;;  %v1504_v13 = vpop.f32.mrb[128].mxu0  ;;  %v8414_v15 = vpop.eup %8413 }
 0x1f3   : > { %8425 = vpow2.f32 %v6822_v10  ;;  %v6823_v16 = vmul.f32 -1.442695, %v2531_v11  ;;  %v1505_v17 = vadd.f32 %v9645_v24, %v1504_v13  ;;  %v7574_v18 = vpop.f32.mrb[129].mxu0  ;;  %7913 = vmatmul.mubr.msk.bf16.gmra.mrb[124].mxu1 %vm2205_vm3, %v2128_v9  ;;  %v8337_v13 = vld [vmem:[%s9414_s15 + $0x108] sm:$0xff]  }
 0x1f4   : > { %v8416_v20 = vpop.eup %8415  ;;  %v1507_v21 = vpop.f32.mrb[130].mxu0  ;;  %7916 = vmatprep.mubr.msk.bf16.mxu1 %vm9176_vm0, %v9175_v1  ;;  %v8306_v18 = vld [vmem:[%s9278_s23 + $0x1e8] sm:$0xff]   ;;  %4940 = vrot.lane.b32.xlu1 %v8337_v13, %s9177_s13 }
 0x1f5   : > { %v8418_v23 = vpop.eup %8417  ;;  %8427 = vpow2.f32 %v6823_v16  ;;  %v1508_v25 = vadd.f32 %v9645_v24, %v1507_v21  ;;  %v7575_v36 = vpop.f32.mrb[131].mxu0  ;;  %v4195_v26 = vpack.c.bf16 %v8416_v20, %v8414_v15  ;;  %v1991_v31 = vmax.f32 %v1505_v17, 0.0 }
 0x1f6   : > { %v3690_v27 = vadd.f32 1.0, %v8418_v23  ;;  %v2535_v29 = vpop.f32.mrb[20].mxu1  ;;  %v4881_v21 = vpop.permute.xlu1 %4880 }
 0x1f7   : > { %v8420_v30 = vpop.eup %8419  ;;  %v1992_v32 = vmax.f32 %v1508_v25, 0.0  ;;  %v5050_v33 = vsel %vm5044_vm4, %v4195_v26, %v4877_v22  ;;  %v2536_v34 = vadd.f32 %v9713_v28, %v2535_v29  ;;  %7681 = vmatmul.mubr.msk.bf16.gmra.mrb[236].mxu0 %vm954_vm2, %v8302_v19  ;;  %v7810_v35 = vpop.f32.mrb[21].mxu1 }
 0x1f8   : > { %v3691_v37 = vadd.f32 1.0, %v8420_v30  ;;  %v7071_v38 = vcombine.low %v5050_v33, %v5050_v33  ;;  %v7072_v39 = vcombine.high %v5050_v33, %v5050_v33  ;;  %v2538_v40 = vpop.f32.mrb[22].mxu1  ;;  %7684 = vmatprep.mubr.msk.bf16.mxu0 %vm9176_vm0, %v9175_v1  ;;  %8429 = vrcp.f32 %v3690_v27 }
 0x1f9   : > { %v2129_v41 = vpack.c.bf16 %v1992_v32, %v1991_v31  ;;  %v6824_v42 = vmul.f32 -1.442695, %v2536_v34  ;;  %v2539_v43 = vadd.f32 %v9713_v28, %v2538_v40  ;;  %v7811_v44 = vpop.f32.mrb[23].mxu1 }
 0x1fa   : > { %8431 = vrcp.f32 %v3691_v37  ;;  %5898 = vst.msk [vmem:[%s9781_s20 + $0x8] sm:$0xf] %vm5895_vm5, %v7071_v38  ;;  %5899 = vst.msk [vmem:[%s9781_s20 + $0xc] sm:$0xf] %vm5895_vm5, %v7072_v39  ;;  %v1512_v45 = vpop.f32.mrb[132].mxu0  ;;  %v8422_v47 = vpop.eup %8421 }
 0x1fb   : > { %8433 = vpow2.f32 %v6824_v42  ;;  %v6825_v48 = vmul.f32 -1.442695, %v2539_v43  ;;  %v1513_v49 = vadd.f32 %v9645_v24, %v1512_v45  ;;  %v7578_v50 = vpop.f32.mrb[133].mxu0  ;;  %7917 = vmatmul.mubr.msk.bf16.gmra.mrb[128].mxu1 %vm2205_vm3, %v2129_v41  ;;  %v8339_v45 = vld [vmem:[%s9414_s15 + $0x110] sm:$0xff]  }
 0x1fc   : > { %v8424_v52 = vpop.eup %8423  ;;  %v1515_v53 = vpop.f32.mrb[134].mxu0  ;;  %7920 = vmatprep.mubr.msk.bf16.mxu1 %vm9176_vm0, %v9175_v1  ;;  %v8308_v50 = vld [vmem:[%s9278_s23 + $0x1f0] sm:$0xff]   ;;  %4942 = vrot.lane.b32.xlu0 %v8339_v45, %s9177_s13 }
 0x1fd   : > { %v8426_v55 = vpop.eup %8425  ;;  %8435 = vpow2.f32 %v6825_v48  ;;  %v1516_v56 = vadd.f32 %v9645_v24, %v1515_v53  ;;  %v7579_v57 = vpop.f32.mrb[135].mxu0  ;;  %v4196_v58 = vpack.c.bf16 %v8424_v52, %v8422_v47  ;;  %v1993_v62 = vmax.f32 %v1513_v49, 0.0 }
 0x1fe   : > { %v3692_v59 = vadd.f32 1.0, %v8426_v55  ;;  %v2543_v60 = vpop.f32.mrb[24].mxu1  ;;  %v4883_v53 = vpop.permute.xlu0 %4882 }
 0x1ff   : > { %v8428_v61 = vpop.eup %8427  ;;  %v1994_v63 = vmax.f32 %v1516_v56, 0.0  ;;  %v5053_v0 = vsel %vm5044_vm4, %v4196_v58, %v4879_v54  ;;  %v2544_v2 = vadd.f32 %v9713_v28, %v2543_v60  ;;  %7685 = vmatmul.mubr.msk.bf16.gmra.mrb[240].mxu0 %vm954_vm2, %v8304_v51  ;;  %v7814_v3 = vpop.f32.mrb[25].mxu1 }
 0x200   : > { %v3693_v4 = vadd.f32 1.0, %v8428_v61  ;;  %v7073_v5 = vcombine.low %v5053_v0, %v5053_v0  ;;  %v7074_v6 = vcombine.high %v5053_v0, %v5053_v0  ;;  %v2546_v7 = vpop.f32.mrb[26].mxu1  ;;  %7688 = vmatprep.mubr.msk.bf16.mxu0 %vm9176_vm0, %v9175_v1  ;;  %8437 = vrcp.f32 %v3692_v59 }
 0x201   : > { %v2130_v8 = vpack.c.bf16 %v1994_v63, %v1993_v62  ;;  %v6826_v9 = vmul.f32 -1.442695, %v2544_v2  ;;  %v2547_v10 = vadd.f32 %v9713_v28, %v2546_v7  ;;  %v7815_v11 = vpop.f32.mrb[27].mxu1 }
 0x202   : > { %8439 = vrcp.f32 %v3693_v4  ;;  %5900 = vst.msk [vmem:[%s9781_s20 + $0x10] sm:$0xf] %vm5895_vm5, %v7073_v5  ;;  %5901 = vst.msk [vmem:[%s9781_s20 + $0x14] sm:$0xf] %vm5895_vm5, %v7074_v6  ;;  %v1520_v12 = vpop.f32.mrb[136].mxu0  ;;  %v8430_v14 = vpop.eup %8429 }
 0x203   : > { %8441 = vpow2.f32 %v6826_v9  ;;  %v6827_v15 = vmul.f32 -1.442695, %v2547_v10  ;;  %v1521_v16 = vadd.f32 %v9645_v24, %v1520_v12  ;;  %v7582_v17 = vpop.f32.mrb[137].mxu0  ;;  %7921 = vmatmul.mubr.msk.bf16.gmra.mrb[132].mxu1 %vm2205_vm3, %v2130_v8  ;;  %v8341_v12 = vld [vmem:[%s9414_s15 + $0x118] sm:$0xff]  }
 0x204   : > { %v8432_v19 = vpop.eup %8431  ;;  %v1523_v20 = vpop.f32.mrb[138].mxu0  ;;  %7924 = vmatprep.mubr.msk.bf16.mxu1 %vm9176_vm0, %v9175_v1  ;;  %v8310_v17 = vld [vmem:[%s9278_s23 + $0x1f8] sm:$0xff]   ;;  %4944 = vrot.lane.b32.xlu1 %v8341_v12, %s9177_s13 }
 0x205   : > { %v8434_v22 = vpop.eup %8433  ;;  %8443 = vpow2.f32 %v6827_v15  ;;  %v1524_v23 = vadd.f32 %v9645_v24, %v1523_v20  ;;  %v7583_v25 = vpop.f32.mrb[139].mxu0  ;;  %v4197_v36 = vpack.c.bf16 %v8432_v19, %v8430_v14  ;;  %v1995_v30 = vmax.f32 %v1521_v16, 0.0 }
 0x206   : > { %v3694_v26 = vadd.f32 1.0, %v8434_v22  ;;  %v2551_v27 = vpop.f32.mrb[28].mxu1  ;;  %v4885_v20 = vpop.permute.xlu1 %4884 }
 0x207   : > { %v8436_v29 = vpop.eup %8435  ;;  %v1996_v31 = vmax.f32 %v1524_v23, 0.0  ;;  %v5056_v32 = vsel %vm5044_vm4, %v4197_v36, %v4881_v21  ;;  %v2552_v33 = vadd.f32 %v9713_v28, %v2551_v27  ;;  %7689 = vmatmul.mubr.msk.bf16.gmra.mrb[244].mxu0 %vm954_vm2, %v8306_v18  ;;  %v7818_v34 = vpop.f32.mrb[29].mxu1 }
 0x208   : > { %v3695_v35 = vadd.f32 1.0, %v8436_v29  ;;  %v7075_v37 = vcombine.low %v5056_v32, %v5056_v32  ;;  %v7076_v38 = vcombine.high %v5056_v32, %v5056_v32  ;;  %v2554_v39 = vpop.f32.mrb[30].mxu1  ;;  %7692 = vmatprep.mubr.msk.bf16.mxu0 %vm9176_vm0, %v9175_v1  ;;  %8445 = vrcp.f32 %v3694_v26 }
 0x209   : > { %v2131_v40 = vpack.c.bf16 %v1996_v31, %v1995_v30  ;;  %v6828_v41 = vmul.f32 -1.442695, %v2552_v33  ;;  %v2555_v42 = vadd.f32 %v9713_v28, %v2554_v39  ;;  %v7819_v43 = vpop.f32.mrb[31].mxu1 }
 0x20a   : > { %8447 = vrcp.f32 %v3695_v35  ;;  %5902 = vst.msk [vmem:[%s9781_s20 + $0x18] sm:$0xf] %vm5895_vm5, %v7075_v37  ;;  %5903 = vst.msk [vmem:[%s9781_s20 + $0x1c] sm:$0xf] %vm5895_vm5, %v7076_v38  ;;  %v1528_v44 = vpop.f32.mrb[140].mxu0  ;;  %v8438_v46 = vpop.eup %8437 }
 0x20b   : > { %8449 = vpow2.f32 %v6828_v41  ;;  %v6829_v47 = vmul.f32 -1.442695, %v2555_v42  ;;  %v1529_v48 = vadd.f32 %v9645_v24, %v1528_v44  ;;  %v7586_v49 = vpop.f32.mrb[141].mxu0  ;;  %7925 = vmatmul.mubr.msk.bf16.gmra.mrb[136].mxu1 %vm2205_vm3, %v2131_v40  ;;  %v8343_v44 = vld [vmem:[%s9414_s15 + $0x120] sm:$0xff]  }
 0x20c   : > { %v8440_v51 = vpop.eup %8439  ;;  %v1531_v52 = vpop.f32.mrb[142].mxu0  ;;  %7928 = vmatprep.mubr.msk.bf16.mxu1 %vm9176_vm0, %v9175_v1  ;;  %v8312_v49 = vld [vmem:[%s9278_s23 + $0x200] sm:$0xff]   ;;  %4946 = vrot.lane.b32.xlu0 %v8343_v44, %s9177_s13 }
 0x20d   : > { %v8442_v54 = vpop.eup %8441  ;;  %8451 = vpow2.f32 %v6829_v47  ;;  %v1532_v55 = vadd.f32 %v9645_v24, %v1531_v52  ;;  %v7587_v56 = vpop.f32.mrb[143].mxu0  ;;  %v4198_v57 = vpack.c.bf16 %v8440_v51, %v8438_v46  ;;  %v1997_v61 = vmax.f32 %v1529_v48, 0.0 }
 0x20e   : > { %v3696_v58 = vadd.f32 1.0, %v8442_v54  ;;  %v2559_v59 = vpop.f32.mrb[32].mxu1  ;;  %v4887_v52 = vpop.permute.xlu0 %4886 }
 0x20f   : > { %v8444_v60 = vpop.eup %8443  ;;  %v1998_v62 = vmax.f32 %v1532_v55, 0.0  ;;  %v5059_v63 = vsel %vm5044_vm4, %v4198_v57, %v4883_v53  ;;  %v2560_v0 = vadd.f32 %v9713_v28, %v2559_v59  ;;  %7693 = vmatmul.mubr.msk.bf16.gmra.mrb[248].mxu0 %vm954_vm2, %v8308_v50  ;;  %v7822_v2 = vpop.f32.mrb[33].mxu1 }
 0x210   : > { %v3697_v3 = vadd.f32 1.0, %v8444_v60  ;;  %v7077_v4 = vcombine.low %v5059_v63, %v5059_v63  ;;  %v7078_v5 = vcombine.high %v5059_v63, %v5059_v63  ;;  %v2562_v6 = vpop.f32.mrb[34].mxu1  ;;  %7696 = vmatprep.mubr.msk.bf16.mxu0 %vm9176_vm0, %v9175_v1  ;;  %8453 = vrcp.f32 %v3696_v58 }
 0x211   : > { %v2132_v7 = vpack.c.bf16 %v1998_v62, %v1997_v61  ;;  %v6830_v8 = vmul.f32 -1.442695, %v2560_v0  ;;  %v2563_v9 = vadd.f32 %v9713_v28, %v2562_v6  ;;  %v7823_v10 = vpop.f32.mrb[35].mxu1 }
 0x212   : > { %8455 = vrcp.f32 %v3697_v3  ;;  %5904 = vst.msk [vmem:[%s9781_s20 + $0x20] sm:$0xf] %vm5895_vm5, %v7077_v4  ;;  %5905 = vst.msk [vmem:[%s9781_s20 + $0x24] sm:$0xf] %vm5895_vm5, %v7078_v5  ;;  %v1536_v11 = vpop.f32.mrb[144].mxu0  ;;  %v8446_v13 = vpop.eup %8445 }
 0x213   : > { %8457 = vpow2.f32 %v6830_v8  ;;  %v6831_v14 = vmul.f32 -1.442695, %v2563_v9  ;;  %v1537_v15 = vadd.f32 %v9645_v24, %v1536_v11  ;;  %v7590_v16 = vpop.f32.mrb[145].mxu0  ;;  %7929 = vmatmul.mubr.msk.bf16.gmra.mrb[140].mxu1 %vm2205_vm3, %v2132_v7  ;;  %v8345_v11 = vld [vmem:[%s9414_s15 + $0x128] sm:$0xff]  }
 0x214   : > { %v8448_v18 = vpop.eup %8447  ;;  %v1539_v19 = vpop.f32.mrb[146].mxu0  ;;  %7932 = vmatprep.mubr.msk.bf16.mxu1 %vm9176_vm0, %v9175_v1  ;;  %v8314_v16 = vld [vmem:[%s9278_s23 + $0x208] sm:$0xff]   ;;  %4948 = vrot.lane.b32.xlu1 %v8345_v11, %s9177_s13 }
 0x215   : > { %v8450_v21 = vpop.eup %8449  ;;  %8459 = vpow2.f32 %v6831_v14  ;;  %v1540_v22 = vadd.f32 %v9645_v24, %v1539_v19  ;;  %v7591_v23 = vpop.f32.mrb[147].mxu0  ;;  %v4199_v25 = vpack.c.bf16 %v8448_v18, %v8446_v13  ;;  %v1999_v29 = vmax.f32 %v1537_v15, 0.0 }
 0x216   : > { %v3698_v36 = vadd.f32 1.0, %v8450_v21  ;;  %v2567_v26 = vpop.f32.mrb[36].mxu1  ;;  %v4889_v19 = vpop.permute.xlu1 %4888 }
 0x217   : > { %v8452_v27 = vpop.eup %8451  ;;  %v2000_v30 = vmax.f32 %v1540_v22, 0.0  ;;  %v5062_v31 = vsel %vm5044_vm4, %v4199_v25, %v4885_v20  ;;  %v2568_v32 = vadd.f32 %v9713_v28, %v2567_v26  ;;  %7697 = vmatmul.mubr.msk.bf16.gmra.mrb[252].mxu0 %vm954_vm2, %v8310_v17  ;;  %v7826_v33 = vpop.f32.mrb[37].mxu1 }
 0x218   : > { %v3699_v34 = vadd.f32 1.0, %v8452_v27  ;;  %v7079_v35 = vcombine.low %v5062_v31, %v5062_v31  ;;  %v7080_v37 = vcombine.high %v5062_v31, %v5062_v31  ;;  %v2570_v38 = vpop.f32.mrb[38].mxu1  ;;  %7700 = vmatprep.mubr.msk.bf16.mxu0 %vm9176_vm0, %v9175_v1  ;;  %8461 = vrcp.f32 %v3698_v36 }
 0x219   : > { %v2133_v39 = vpack.c.bf16 %v2000_v30, %v1999_v29  ;;  %v6832_v40 = vmul.f32 -1.442695, %v2568_v32  ;;  %v2571_v41 = vadd.f32 %v9713_v28, %v2570_v38  ;;  %v7827_v42 = vpop.f32.mrb[39].mxu1 }
 0x21a   : > { %8463 = vrcp.f32 %v3699_v34  ;;  %5906 = vst.msk [vmem:[%s9781_s20 + $0x28] sm:$0xf] %vm5895_vm5, %v7079_v35  ;;  %5907 = vst.msk [vmem:[%s9781_s20 + $0x2c] sm:$0xf] %vm5895_vm5, %v7080_v37  ;;  %v1544_v43 = vpop.f32.mrb[148].mxu0  ;;  %v8454_v45 = vpop.eup %8453  ;;  %v8347_v42 = vld [vmem:[%s9414_s15 + $0x130] sm:$0xff]  }
 0x21b   : > { %8465 = vpow2.f32 %v6832_v40  ;;  %v6833_v46 = vmul.f32 -1.442695, %v2571_v41  ;;  %v1545_v47 = vadd.f32 %v9645_v24, %v1544_v43  ;;  %v7594_v48 = vpop.f32.mrb[149].mxu0  ;;  %7933 = vmatmul.mubr.msk.bf16.gmra.mrb[144].mxu1 %vm2205_vm3, %v2133_v39  ;;  %4950 = vrot.lane.b32.xlu0 %v8347_v42, %s9177_s13 }
 0x21c   : > { %v8456_v50 = vpop.eup %8455  ;;  %v1547_v51 = vpop.f32.mrb[150].mxu0  ;;  %7936 = vmatprep.mubr.msk.bf16.mxu1 %vm9176_vm0, %v9175_v1  ;;  %v8316_v48 = vld [vmem:[%s9278_s23 + $0x210] sm:$0xff]  }
 0x21d   : > { %v8458_v53 = vpop.eup %8457  ;;  %8467 = vpow2.f32 %v6833_v46  ;;  %v1548_v54 = vadd.f32 %v9645_v24, %v1547_v51  ;;  %v7595_v55 = vpop.f32.mrb[151].mxu0  ;;  %v4200_v56 = vpack.c.bf16 %v8456_v50, %v8454_v45  ;;  %v2001_v60 = vmax.f32 %v1545_v47, 0.0  ;;  %v9917_v45 = vld [vmem:[%s11089_s2] ss:$0 sm:$0xff] }
 0x21e   : > { %v3700_v57 = vadd.f32 1.0, %v8458_v53  ;;  %v2575_v58 = vpop.f32.mrb[40].mxu1  ;;  %v4891_v51 = vpop.permute.xlu0 %4890 }
 0x21f   : > { %v8460_v59 = vpop.eup %8459  ;;  %v2002_v61 = vmax.f32 %v1548_v54, 0.0  ;;  %v5065_v62 = vsel %vm5044_vm4, %v4200_v56, %v4887_v52  ;;  %v2576_v63 = vadd.f32 %v9713_v28, %v2575_v58  ;;  %7701 = vmatmul.mubr.msk.bf16.gmra.mrb[0].mxu0 %vm954_vm2, %v8312_v49  ;;  %v7830_v0 = vpop.f32.mrb[41].mxu1 }
 0x220   : > { %v3701_v2 = vadd.f32 1.0, %v8460_v59  ;;  %v7081_v3 = vcombine.low %v5065_v62, %v5065_v62  ;;  %v7082_v4 = vcombine.high %v5065_v62, %v5065_v62  ;;  %v2578_v5 = vpop.f32.mrb[42].mxu1  ;;  %7704 = vmatprep.mubr.msk.bf16.mxu0 %vm9176_vm0, %v9175_v1  ;;  %8469 = vrcp.f32 %v3700_v57 }
 0x221   : > { %v2134_v6 = vpack.c.bf16 %v2002_v61, %v2001_v60  ;;  %v6834_v7 = vmul.f32 -1.442695, %v2576_v63  ;;  %v2579_v8 = vadd.f32 %v9713_v28, %v2578_v5  ;;  %v7831_v9 = vpop.f32.mrb[43].mxu1 }
 0x222   : > { %8471 = vrcp.f32 %v3701_v2  ;;  %5908 = vst.msk [vmem:[%s9781_s20 + $0x30] sm:$0xf] %vm5895_vm5, %v7081_v3  ;;  %5909 = vst.msk [vmem:[%s9781_s20 + $0x34] sm:$0xf] %vm5895_vm5, %v7082_v4  ;;  %v1552_v10 = vpop.f32.mrb[152].mxu0  ;;  %v8462_v12 = vpop.eup %8461 }
 0x223   : > { %8473 = vpow2.f32 %v6834_v7  ;;  %v6835_v13 = vmul.f32 -1.442695, %v2579_v8  ;;  %v1553_v14 = vadd.f32 %v9645_v24, %v1552_v10  ;;  %v7598_v15 = vpop.f32.mrb[153].mxu0  ;;  %7937 = vmatmul.mubr.msk.bf16.gmra.mrb[148].mxu1 %vm2205_vm3, %v2134_v6  ;;  %v8349_v10 = vld [vmem:[%s9414_s15 + $0x138] sm:$0xff]  }
 0x224   : > { %v8464_v17 = vpop.eup %8463  ;;  %v1555_v18 = vpop.f32.mrb[154].mxu0  ;;  %7940 = vmatprep.mubr.msk.bf16.mxu1 %vm9176_vm0, %v9175_v1  ;;  %v8318_v15 = vld [vmem:[%s9278_s23 + $0x218] sm:$0xff]   ;;  %4952 = vrot.lane.b32.xlu1 %v8349_v10, %s9177_s13 }
 0x225   : > { %v8466_v20 = vpop.eup %8465  ;;  %8475 = vpow2.f32 %v6835_v13  ;;  %v1556_v21 = vadd.f32 %v9645_v24, %v1555_v18  ;;  %v7599_v22 = vpop.f32.mrb[155].mxu0  ;;  %v4201_v23 = vpack.c.bf16 %v8464_v17, %v8462_v12  ;;  %v2003_v27 = vmax.f32 %v1553_v14, 0.0 }
 0x226   : > { %v3702_v25 = vadd.f32 1.0, %v8466_v20  ;;  %v2583_v36 = vpop.f32.mrb[44].mxu1  ;;  %v4893_v18 = vpop.permute.xlu1 %4892 }
 0x227   : > { %v8468_v26 = vpop.eup %8467  ;;  %v2004_v29 = vmax.f32 %v1556_v21, 0.0  ;;  %v5068_v30 = vsel %vm5044_vm4, %v4201_v23, %v4889_v19  ;;  %v2584_v31 = vadd.f32 %v9713_v28, %v2583_v36  ;;  %7705 = vmatmul.mubr.msk.bf16.gmra.mrb[4].mxu0 %vm954_vm2, %v8314_v16  ;;  %v7834_v32 = vpop.f32.mrb[45].mxu1 }
 0x228   : > { %v3703_v33 = vadd.f32 1.0, %v8468_v26  ;;  %v7083_v34 = vcombine.low %v5068_v30, %v5068_v30  ;;  %v7084_v24 = vcombine.high %v5068_v30, %v5068_v30  ;;  %v2586_v35 = vpop.f32.mrb[46].mxu1  ;;  %7708 = vmatprep.mubr.msk.bf16.mxu0 %vm9176_vm0, %v9175_v1  ;;  %8477 = vrcp.f32 %v3702_v25 }
 0x229   : > { %v2135_v37 = vpack.c.bf16 %v2004_v29, %v2003_v27  ;;  %v6836_v38 = vmul.f32 -1.442695, %v2584_v31  ;;  %v2587_v39 = vadd.f32 %v9713_v28, %v2586_v35  ;;  %v7835_v40 = vpop.f32.mrb[47].mxu1 }
 0x22a   : > { %8479 = vrcp.f32 %v3703_v33  ;;  %5910 = vst.msk [vmem:[%s9781_s20 + $0x38] sm:$0xf] %vm5895_vm5, %v7083_v34  ;;  %5911 = vst.msk [vmem:[%s9781_s20 + $0x3c] sm:$0xf] %vm5895_vm5, %v7084_v24  ;;  %v1560_v41 = vpop.f32.mrb[156].mxu0  ;;  %v8470_v43 = vpop.eup %8469 }
 0x22b   : > { %8481 = vpow2.f32 %v6836_v38  ;;  %v6837_v44 = vmul.f32 -1.442695, %v2587_v39  ;;  %v1561_v46 = vadd.f32 %v9917_v45, %v1560_v41  ;;  %v7602_v47 = vpop.f32.mrb[157].mxu0  ;;  %7941 = vmatmul.mubr.msk.bf16.gmra.mrb[152].mxu1 %vm2205_vm3, %v2135_v37  ;;  %v8351_v41 = vld [vmem:[%s9414_s15 + $0x140] sm:$0xff]  }
 0x22c   : > { %v8472_v49 = vpop.eup %8471  ;;  %v1563_v50 = vpop.f32.mrb[158].mxu0  ;;  %7944 = vmatprep.mubr.msk.bf16.mxu1 %vm9176_vm0, %v9175_v1  ;;  %v8320_v47 = vld [vmem:[%s9278_s23 + $0x220] sm:$0xff]   ;;  %4954 = vrot.lane.b32.xlu0 %v8351_v41, %s9177_s13 }
 0x22d   : > { %v8474_v52 = vpop.eup %8473  ;;  %8483 = vpow2.f32 %v6837_v44  ;;  %v1564_v53 = vadd.f32 %v9917_v45, %v1563_v50  ;;  %v7603_v54 = vpop.f32.mrb[159].mxu0  ;;  %v4202_v55 = vpack.c.bf16 %v8472_v49, %v8470_v43  ;;  %v2005_v59 = vmax.f32 %v1561_v46, 0.0 }
 0x22e   : > { %v3704_v56 = vadd.f32 1.0, %v8474_v52  ;;  %v2591_v57 = vpop.f32.mrb[48].mxu1  ;;  %v4895_v50 = vpop.permute.xlu0 %4894 }
 0x22f   : > { %v8476_v58 = vpop.eup %8475  ;;  %v2006_v60 = vmax.f32 %v1564_v53, 0.0  ;;  %v5071_v61 = vsel %vm5044_vm4, %v4202_v55, %v4891_v51  ;;  %v2592_v62 = vadd.f32 %v9713_v28, %v2591_v57  ;;  %7709 = vmatmul.mubr.msk.bf16.gmra.mrb[8].mxu0 %vm954_vm2, %v8316_v48  ;;  %v7838_v63 = vpop.f32.mrb[49].mxu1 }
 0x230   : > { %v3705_v0 = vadd.f32 1.0, %v8476_v58  ;;  %v7085_v2 = vcombine.low %v5071_v61, %v5071_v61  ;;  %v7086_v3 = vcombine.high %v5071_v61, %v5071_v61  ;;  %v2594_v4 = vpop.f32.mrb[50].mxu1  ;;  %7712 = vmatprep.mubr.msk.bf16.mxu0 %vm9176_vm0, %v9175_v1  ;;  %8485 = vrcp.f32 %v3704_v56 }
 0x231   : > { %v2136_v5 = vpack.c.bf16 %v2006_v60, %v2005_v59  ;;  %v6838_v6 = vmul.f32 -1.442695, %v2592_v62  ;;  %v2595_v7 = vadd.f32 %v9713_v28, %v2594_v4  ;;  %v7839_v8 = vpop.f32.mrb[51].mxu1 }
 0x232   : > { %8487 = vrcp.f32 %v3705_v0  ;;  %5912 = vst.msk [vmem:[%s9781_s20 + $0x40] sm:$0xf] %vm5895_vm5, %v7085_v2  ;;  %5913 = vst.msk [vmem:[%s9781_s20 + $0x44] sm:$0xf] %vm5895_vm5, %v7086_v3  ;;  %v1568_v9 = vpop.f32.mrb[160].mxu0  ;;  %v8478_v11 = vpop.eup %8477 }
 0x233   : > { %8489 = vpow2.f32 %v6838_v6  ;;  %v6839_v12 = vmul.f32 -1.442695, %v2595_v7  ;;  %v1569_v13 = vadd.f32 %v9917_v45, %v1568_v9  ;;  %v7606_v14 = vpop.f32.mrb[161].mxu0  ;;  %7945 = vmatmul.mubr.msk.bf16.gmra.mrb[156].mxu1 %vm2205_vm3, %v2136_v5  ;;  %v8353_v9 = vld [vmem:[%s9414_s15 + $0x148] sm:$0xff]  }
 0x234   : > { %v8480_v16 = vpop.eup %8479  ;;  %v1571_v17 = vpop.f32.mrb[162].mxu0  ;;  %7948 = vmatprep.mubr.msk.bf16.mxu1 %vm9176_vm0, %v9175_v1  ;;  %v8322_v14 = vld [vmem:[%s9278_s23 + $0x228] sm:$0xff]   ;;  %4956 = vrot.lane.b32.xlu1 %v8353_v9, %s9177_s13 }
 0x235   : > { %v8482_v19 = vpop.eup %8481  ;;  %8491 = vpow2.f32 %v6839_v12  ;;  %v1572_v20 = vadd.f32 %v9917_v45, %v1571_v17  ;;  %v7607_v21 = vpop.f32.mrb[163].mxu0  ;;  %v4203_v22 = vpack.c.bf16 %v8480_v16, %v8478_v11  ;;  %v2007_v26 = vmax.f32 %v1569_v13, 0.0 }
 0x236   : > { %v3706_v23 = vadd.f32 1.0, %v8482_v19  ;;  %v2599_v25 = vpop.f32.mrb[52].mxu1  ;;  %v4897_v17 = vpop.permute.xlu1 %4896 }
 0x237   : > { %v8484_v36 = vpop.eup %8483  ;;  %v2008_v27 = vmax.f32 %v1572_v20, 0.0  ;;  %v5074_v29 = vsel %vm5044_vm4, %v4203_v22, %v4893_v18  ;;  %v2600_v30 = vadd.f32 %v9713_v28, %v2599_v25  ;;  %7713 = vmatmul.mubr.msk.bf16.gmra.mrb[12].mxu0 %vm954_vm2, %v8318_v15  ;;  %v7842_v31 = vpop.f32.mrb[53].mxu1  ;;  %v9952_v28 = vld [vmem:[%s11091_s4] ss:$0 sm:$0xff] }
 0x238   : > { %v3707_v32 = vadd.f32 1.0, %v8484_v36  ;;  %v7087_v33 = vcombine.low %v5074_v29, %v5074_v29  ;;  %v7088_v34 = vcombine.high %v5074_v29, %v5074_v29  ;;  %v2602_v24 = vpop.f32.mrb[54].mxu1  ;;  %7716 = vmatprep.mubr.msk.bf16.mxu0 %vm9176_vm0, %v9175_v1  ;;  %8493 = vrcp.f32 %v3706_v23 }
 0x239   : > { %v2137_v35 = vpack.c.bf16 %v2008_v27, %v2007_v26  ;;  %v6840_v37 = vmul.f32 -1.442695, %v2600_v30  ;;  %v2603_v38 = vadd.f32 %v9952_v28, %v2602_v24  ;;  %v7843_v39 = vpop.f32.mrb[55].mxu1 }
 0x23a   : > { %8495 = vrcp.f32 %v3707_v32  ;;  %5914 = vst.msk [vmem:[%s9781_s20 + $0x48] sm:$0xf] %vm5895_vm5, %v7087_v33  ;;  %5915 = vst.msk [vmem:[%s9781_s20 + $0x4c] sm:$0xf] %vm5895_vm5, %v7088_v34  ;;  %v1576_v40 = vpop.f32.mrb[164].mxu0  ;;  %v8486_v42 = vpop.eup %8485 }
 0x23b   : > { %8497 = vpow2.f32 %v6840_v37  ;;  %v6841_v43 = vmul.f32 -1.442695, %v2603_v38  ;;  %v1577_v44 = vadd.f32 %v9917_v45, %v1576_v40  ;;  %v7610_v46 = vpop.f32.mrb[165].mxu0  ;;  %7949 = vmatmul.mubr.msk.bf16.gmra.mrb[160].mxu1 %vm2205_vm3, %v2137_v35  ;;  %v8354_v40 = vld [vmem:[%s9414_s15 + $0x150] sm:$0xff]  }
 0x23c   : > { %v8488_v48 = vpop.eup %8487  ;;  %v1579_v49 = vpop.f32.mrb[166].mxu0  ;;  %7952 = vmatprep.mubr.msk.bf16.mxu1 %vm9176_vm0, %v9175_v1  ;;  %v8324_v46 = vld [vmem:[%s9278_s23 + $0x230] sm:$0xff]   ;;  %4958 = vrot.lane.b32.xlu0 %v8354_v40, %s9177_s13 }
 0x23d   : > { %v8490_v51 = vpop.eup %8489  ;;  %8499 = vpow2.f32 %v6841_v43  ;;  %v1580_v52 = vadd.f32 %v9917_v45, %v1579_v49  ;;  %v7611_v53 = vpop.f32.mrb[167].mxu0  ;;  %v4204_v54 = vpack.c.bf16 %v8488_v48, %v8486_v42  ;;  %v2009_v58 = vmax.f32 %v1577_v44, 0.0 }
 0x23e   : > { %v3708_v55 = vadd.f32 1.0, %v8490_v51  ;;  %v2607_v56 = vpop.f32.mrb[56].mxu1  ;;  %v4899_v49 = vpop.permute.xlu0 %4898 }
 0x23f   : > { %v8492_v57 = vpop.eup %8491  ;;  %v2010_v59 = vmax.f32 %v1580_v52, 0.0  ;;  %v5077_v60 = vsel %vm5044_vm4, %v4204_v54, %v4895_v50  ;;  %v2608_v61 = vadd.f32 %v9952_v28, %v2607_v56  ;;  %7717 = vmatmul.mubr.msk.bf16.gmra.mrb[16].mxu0 %vm954_vm2, %v8320_v47  ;;  %v7846_v62 = vpop.f32.mrb[57].mxu1 }
 0x240   : > { %v3709_v63 = vadd.f32 1.0, %v8492_v57  ;;  %v7089_v0 = vcombine.low %v5077_v60, %v5077_v60  ;;  %v7090_v2 = vcombine.high %v5077_v60, %v5077_v60  ;;  %v2610_v3 = vpop.f32.mrb[58].mxu1  ;;  %7720 = vmatprep.mubr.msk.bf16.mxu0 %vm9176_vm0, %v9175_v1  ;;  %8501 = vrcp.f32 %v3708_v55 }
 0x241   : > { %v2138_v4 = vpack.c.bf16 %v2010_v59, %v2009_v58  ;;  %v6842_v5 = vmul.f32 -1.442695, %v2608_v61  ;;  %v2611_v6 = vadd.f32 %v9952_v28, %v2610_v3  ;;  %v7847_v7 = vpop.f32.mrb[59].mxu1 }
 0x242   : > { %8503 = vrcp.f32 %v3709_v63  ;;  %5916 = vst.msk [vmem:[%s9781_s20 + $0x50] sm:$0xf] %vm5895_vm5, %v7089_v0  ;;  %5917 = vst.msk [vmem:[%s9781_s20 + $0x54] sm:$0xf] %vm5895_vm5, %v7090_v2  ;;  %v1584_v8 = vpop.f32.mrb[168].mxu0  ;;  %v8494_v10 = vpop.eup %8493 }
 0x243   : > { %8505 = vpow2.f32 %v6842_v5  ;;  %v6843_v11 = vmul.f32 -1.442695, %v2611_v6  ;;  %v1585_v12 = vadd.f32 %v9917_v45, %v1584_v8  ;;  %v7614_v13 = vpop.f32.mrb[169].mxu0  ;;  %7953 = vmatmul.mubr.msk.bf16.gmra.mrb[164].mxu1 %vm2205_vm3, %v2138_v4  ;;  %v8355_v8 = vld [vmem:[%s9414_s15 + $0x158] sm:$0xff]  }
 0x244   : > { %v8496_v15 = vpop.eup %8495  ;;  %v1587_v16 = vpop.f32.mrb[170].mxu0  ;;  %7956 = vmatprep.mubr.msk.bf16.mxu1 %vm9176_vm0, %v9175_v1  ;;  %v8326_v13 = vld [vmem:[%s9278_s23 + $0x238] sm:$0xff]   ;;  %4960 = vrot.lane.b32.xlu1 %v8355_v8, %s9177_s13 }
 0x245   : > { %v8498_v18 = vpop.eup %8497  ;;  %8507 = vpow2.f32 %v6843_v11  ;;  %v1588_v19 = vadd.f32 %v9917_v45, %v1587_v16  ;;  %v7615_v20 = vpop.f32.mrb[171].mxu0  ;;  %v4205_v21 = vpack.c.bf16 %v8496_v15, %v8494_v10  ;;  %v2011_v36 = vmax.f32 %v1585_v12, 0.0 }
 0x246   : > { %v3710_v22 = vadd.f32 1.0, %v8498_v18  ;;  %v2615_v23 = vpop.f32.mrb[60].mxu1  ;;  %v4901_v16 = vpop.permute.xlu1 %4900 }
 0x247   : > { %v8500_v25 = vpop.eup %8499  ;;  %v2012_v26 = vmax.f32 %v1588_v19, 0.0  ;;  %v5080_v27 = vsel %vm5044_vm4, %v4205_v21, %v4897_v17  ;;  %v2616_v29 = vadd.f32 %v9952_v28, %v2615_v23  ;;  %7721 = vmatmul.mubr.msk.bf16.gmra.mrb[20].mxu0 %vm954_vm2, %v8322_v14  ;;  %v7850_v30 = vpop.f32.mrb[61].mxu1 }
 0x248   : > { %v3711_v31 = vadd.f32 1.0, %v8500_v25  ;;  %v7091_v32 = vcombine.low %v5080_v27, %v5080_v27  ;;  %v7092_v33 = vcombine.high %v5080_v27, %v5080_v27  ;;  %v2618_v34 = vpop.f32.mrb[62].mxu1  ;;  %7724 = vmatprep.mubr.msk.bf16.mxu0 %vm9176_vm0, %v9175_v1  ;;  %8509 = vrcp.f32 %v3710_v22 }
 0x249   : > { %v2139_v24 = vpack.c.bf16 %v2012_v26, %v2011_v36  ;;  %v6844_v35 = vmul.f32 -1.442695, %v2616_v29  ;;  %v2619_v37 = vadd.f32 %v9952_v28, %v2618_v34  ;;  %v7851_v38 = vpop.f32.mrb[63].mxu1 }
 0x24a   : > { %8511 = vrcp.f32 %v3711_v31  ;;  %5918 = vst.msk [vmem:[%s9781_s20 + $0x58] sm:$0xf] %vm5895_vm5, %v7091_v32  ;;  %5919 = vst.msk [vmem:[%s9781_s20 + $0x5c] sm:$0xf] %vm5895_vm5, %v7092_v33  ;;  %v1592_v39 = vpop.f32.mrb[172].mxu0  ;;  %v8502_v41 = vpop.eup %8501 }
 0x24b   : > { %8513 = vpow2.f32 %v6844_v35  ;;  %v6845_v42 = vmul.f32 -1.442695, %v2619_v37  ;;  %v1593_v43 = vadd.f32 %v9917_v45, %v1592_v39  ;;  %v7618_v44 = vpop.f32.mrb[173].mxu0  ;;  %7957 = vmatmul.mubr.msk.bf16.gmra.mrb[168].mxu1 %vm2205_vm3, %v2139_v24  ;;  %v8356_v39 = vld [vmem:[%s9414_s15 + $0x160] sm:$0xff]  }
 0x24c   : > { %v8504_v47 = vpop.eup %8503  ;;  %v1595_v48 = vpop.f32.mrb[174].mxu0  ;;  %7960 = vmatprep.mubr.msk.bf16.mxu1 %vm9176_vm0, %v9175_v1  ;;  %v8328_v44 = vld [vmem:[%s9278_s23 + $0x240] sm:$0xff]   ;;  %4962 = vrot.lane.b32.xlu0 %v8356_v39, %s9177_s13 }
 0x24d   : > { %v8506_v50 = vpop.eup %8505  ;;  %8515 = vpow2.f32 %v6845_v42  ;;  %v1596_v51 = vadd.f32 %v9917_v45, %v1595_v48  ;;  %v7619_v52 = vpop.f32.mrb[175].mxu0  ;;  %v4206_v53 = vpack.c.bf16 %v8504_v47, %v8502_v41  ;;  %v2013_v57 = vmax.f32 %v1593_v43, 0.0 }
 0x24e   : > { %v3712_v54 = vadd.f32 1.0, %v8506_v50  ;;  %v2623_v55 = vpop.f32.mrb[64].mxu1  ;;  %v4903_v48 = vpop.permute.xlu0 %4902 }
 0x24f   : > { %v8508_v56 = vpop.eup %8507  ;;  %v2014_v58 = vmax.f32 %v1596_v51, 0.0  ;;  %v5083_v59 = vsel %vm5044_vm4, %v4206_v53, %v4899_v49  ;;  %v2624_v60 = vadd.f32 %v9952_v28, %v2623_v55  ;;  %7725 = vmatmul.mubr.msk.bf16.gmra.mrb[24].mxu0 %vm954_vm2, %v8324_v46  ;;  %v7854_v61 = vpop.f32.mrb[65].mxu1 }
 0x250   : > { %v3713_v62 = vadd.f32 1.0, %v8508_v56  ;;  %v7093_v63 = vcombine.low %v5083_v59, %v5083_v59  ;;  %v7094_v0 = vcombine.high %v5083_v59, %v5083_v59  ;;  %v2626_v2 = vpop.f32.mrb[66].mxu1  ;;  %7728 = vmatprep.mubr.msk.bf16.mxu0 %vm9176_vm0, %v9175_v1  ;;  %8517 = vrcp.f32 %v3712_v54 }
 0x251   : > { %v2140_v3 = vpack.c.bf16 %v2014_v58, %v2013_v57  ;;  %v6846_v4 = vmul.f32 -1.442695, %v2624_v60  ;;  %v2627_v5 = vadd.f32 %v9952_v28, %v2626_v2  ;;  %v7855_v6 = vpop.f32.mrb[67].mxu1 }
 0x252   : > { %8519 = vrcp.f32 %v3713_v62  ;;  %5920 = vst.msk [vmem:[%s9781_s20 + $0x60] sm:$0xf] %vm5895_vm5, %v7093_v63  ;;  %5921 = vst.msk [vmem:[%s9781_s20 + $0x64] sm:$0xf] %vm5895_vm5, %v7094_v0  ;;  %v1600_v7 = vpop.f32.mrb[176].mxu0  ;;  %v8510_v9 = vpop.eup %8509 }
 0x253   : > { %8521 = vpow2.f32 %v6846_v4  ;;  %v6847_v10 = vmul.f32 -1.442695, %v2627_v5  ;;  %v1601_v11 = vadd.f32 %v9917_v45, %v1600_v7  ;;  %v7622_v12 = vpop.f32.mrb[177].mxu0  ;;  %7961 = vmatmul.mubr.msk.bf16.gmra.mrb[172].mxu1 %vm2205_vm3, %v2140_v3  ;;  %v8357_v7 = vld [vmem:[%s9414_s15 + $0x168] sm:$0xff]  }
 0x254   : > { %v8512_v14 = vpop.eup %8511  ;;  %v1603_v15 = vpop.f32.mrb[178].mxu0  ;;  %7964 = vmatprep.mubr.msk.bf16.mxu1 %vm9176_vm0, %v9175_v1  ;;  %v8330_v12 = vld [vmem:[%s9278_s23 + $0x248] sm:$0xff]   ;;  %4964 = vrot.lane.b32.xlu1 %v8357_v7, %s9177_s13 }
 0x255   : > { %v8514_v17 = vpop.eup %8513  ;;  %8523 = vpow2.f32 %v6847_v10  ;;  %v1604_v18 = vadd.f32 %v9917_v45, %v1603_v15  ;;  %v7623_v19 = vpop.f32.mrb[179].mxu0  ;;  %v4207_v20 = vpack.c.bf16 %v8512_v14, %v8510_v9  ;;  %v2015_v25 = vmax.f32 %v1601_v11, 0.0 }
 0x256   : > { %v3714_v21 = vadd.f32 1.0, %v8514_v17  ;;  %v2631_v22 = vpop.f32.mrb[68].mxu1  ;;  %v4905_v15 = vpop.permute.xlu1 %4904 }
 0x257   : > { %v8516_v23 = vpop.eup %8515  ;;  %v2016_v36 = vmax.f32 %v1604_v18, 0.0  ;;  %v5086_v26 = vsel %vm5044_vm4, %v4207_v20, %v4901_v16  ;;  %v2632_v27 = vadd.f32 %v9952_v28, %v2631_v22  ;;  %7729 = vmatmul.mubr.msk.bf16.gmra.mrb[28].mxu0 %vm954_vm2, %v8326_v13  ;;  %v7858_v29 = vpop.f32.mrb[69].mxu1 }
 0x258   : > { %v3715_v30 = vadd.f32 1.0, %v8516_v23  ;;  %v7095_v31 = vcombine.low %v5086_v26, %v5086_v26  ;;  %v7096_v32 = vcombine.high %v5086_v26, %v5086_v26  ;;  %v2634_v33 = vpop.f32.mrb[70].mxu1  ;;  %7732 = vmatprep.mubr.msk.bf16.mxu0 %vm9176_vm0, %v9175_v1  ;;  %8525 = vrcp.f32 %v3714_v21 }
 0x259   : > { %v2141_v34 = vpack.c.bf16 %v2016_v36, %v2015_v25  ;;  %v6848_v24 = vmul.f32 -1.442695, %v2632_v27  ;;  %v2635_v35 = vadd.f32 %v9952_v28, %v2634_v33  ;;  %v7859_v37 = vpop.f32.mrb[71].mxu1 }
 0x25a   : > { %8527 = vrcp.f32 %v3715_v30  ;;  %5922 = vst.msk [vmem:[%s9781_s20 + $0x68] sm:$0xf] %vm5895_vm5, %v7095_v31  ;;  %5923 = vst.msk [vmem:[%s9781_s20 + $0x6c] sm:$0xf] %vm5895_vm5, %v7096_v32  ;;  %v1608_v38 = vpop.f32.mrb[180].mxu0  ;;  %v8518_v40 = vpop.eup %8517 }
 0x25b   : > { %8529 = vpow2.f32 %v6848_v24  ;;  %v6849_v41 = vmul.f32 -1.442695, %v2635_v35  ;;  %v1609_v42 = vadd.f32 %v9917_v45, %v1608_v38  ;;  %v7626_v43 = vpop.f32.mrb[181].mxu0  ;;  %7965 = vmatmul.mubr.msk.bf16.gmra.mrb[176].mxu1 %vm2205_vm3, %v2141_v34  ;;  %v8358_v38 = vld [vmem:[%s9414_s15 + $0x170] sm:$0xff]  }
 0x25c   : > { %v8520_v46 = vpop.eup %8519  ;;  %v1611_v47 = vpop.f32.mrb[182].mxu0  ;;  %7968 = vmatprep.mubr.msk.bf16.mxu1 %vm9176_vm0, %v9175_v1  ;;  %v8332_v43 = vld [vmem:[%s9278_s23 + $0x250] sm:$0xff]   ;;  %4966 = vrot.lane.b32.xlu0 %v8358_v38, %s9177_s13 }
 0x25d   : > { %v8522_v49 = vpop.eup %8521  ;;  %8531 = vpow2.f32 %v6849_v41  ;;  %v1612_v50 = vadd.f32 %v9917_v45, %v1611_v47  ;;  %v7627_v51 = vpop.f32.mrb[183].mxu0  ;;  %v4208_v52 = vpack.c.bf16 %v8520_v46, %v8518_v40  ;;  %v2017_v56 = vmax.f32 %v1609_v42, 0.0 }
 0x25e   : > { %v3716_v53 = vadd.f32 1.0, %v8522_v49  ;;  %v2639_v54 = vpop.f32.mrb[72].mxu1  ;;  %v4907_v47 = vpop.permute.xlu0 %4906 }
 0x25f   : > { %v8524_v55 = vpop.eup %8523  ;;  %v2018_v57 = vmax.f32 %v1612_v50, 0.0  ;;  %v5089_v58 = vsel %vm5044_vm4, %v4208_v52, %v4903_v48  ;;  %v2640_v59 = vadd.f32 %v9952_v28, %v2639_v54  ;;  %7733 = vmatmul.mubr.msk.bf16.gmra.mrb[32].mxu0 %vm954_vm2, %v8328_v44  ;;  %v7862_v60 = vpop.f32.mrb[73].mxu1 }
 0x260   : > { %v3717_v61 = vadd.f32 1.0, %v8524_v55  ;;  %v7097_v62 = vcombine.low %v5089_v58, %v5089_v58  ;;  %v7098_v63 = vcombine.high %v5089_v58, %v5089_v58  ;;  %v2642_v0 = vpop.f32.mrb[74].mxu1  ;;  %7736 = vmatprep.mubr.msk.bf16.mxu0 %vm9176_vm0, %v9175_v1  ;;  %8533 = vrcp.f32 %v3716_v53 }
 0x261   : > { %v2142_v2 = vpack.c.bf16 %v2018_v57, %v2017_v56  ;;  %v6850_v3 = vmul.f32 -1.442695, %v2640_v59  ;;  %v2643_v4 = vadd.f32 %v9952_v28, %v2642_v0  ;;  %v7863_v5 = vpop.f32.mrb[75].mxu1 }
 0x262   : > { %8535 = vrcp.f32 %v3717_v61  ;;  %5924 = vst.msk [vmem:[%s9781_s20 + $0x70] sm:$0xf] %vm5895_vm5, %v7097_v62  ;;  %5925 = vst.msk [vmem:[%s9781_s20 + $0x74] sm:$0xf] %vm5895_vm5, %v7098_v63  ;;  %v1616_v6 = vpop.f32.mrb[184].mxu0  ;;  %v8526_v8 = vpop.eup %8525 }
 0x263   : > { %8537 = vpow2.f32 %v6850_v3  ;;  %v6851_v9 = vmul.f32 -1.442695, %v2643_v4  ;;  %v1617_v10 = vadd.f32 %v9917_v45, %v1616_v6  ;;  %v7630_v11 = vpop.f32.mrb[185].mxu0  ;;  %7969 = vmatmul.mubr.msk.bf16.gmra.mrb[180].mxu1 %vm2205_vm3, %v2142_v2  ;;  %v8359_v6 = vld [vmem:[%s9414_s15 + $0x178] sm:$0xff]  }
 0x264   : > { %v8528_v13 = vpop.eup %8527  ;;  %v1619_v14 = vpop.f32.mrb[186].mxu0  ;;  %7972 = vmatprep.mubr.msk.bf16.mxu1 %vm9176_vm0, %v9175_v1  ;;  %v8334_v11 = vld [vmem:[%s9278_s23 + $0x258] sm:$0xff]   ;;  %4968 = vrot.lane.b32.xlu1 %v8359_v6, %s9177_s13 }
 0x265   : > { %v8530_v16 = vpop.eup %8529  ;;  %8539 = vpow2.f32 %v6851_v9  ;;  %v1620_v17 = vadd.f32 %v9917_v45, %v1619_v14  ;;  %v7631_v18 = vpop.f32.mrb[187].mxu0  ;;  %v4209_v19 = vpack.c.bf16 %v8528_v13, %v8526_v8  ;;  %v2019_v23 = vmax.f32 %v1617_v10, 0.0 }
 0x266   : > { %v3718_v20 = vadd.f32 1.0, %v8530_v16  ;;  %v2647_v21 = vpop.f32.mrb[76].mxu1  ;;  %v4909_v14 = vpop.permute.xlu1 %4908 }
 0x267   : > { %v8532_v22 = vpop.eup %8531  ;;  %v2020_v25 = vmax.f32 %v1620_v17, 0.0  ;;  %v5092_v36 = vsel %vm5044_vm4, %v4209_v19, %v4905_v15  ;;  %v2648_v26 = vadd.f32 %v9952_v28, %v2647_v21  ;;  %7737 = vmatmul.mubr.msk.bf16.gmra.mrb[36].mxu0 %vm954_vm2, %v8330_v12  ;;  %v7866_v27 = vpop.f32.mrb[77].mxu1 }
 0x268   : > { %v3719_v29 = vadd.f32 1.0, %v8532_v22  ;;  %v7099_v30 = vcombine.low %v5092_v36, %v5092_v36  ;;  %v7100_v31 = vcombine.high %v5092_v36, %v5092_v36  ;;  %v2650_v32 = vpop.f32.mrb[78].mxu1  ;;  %7740 = vmatprep.mubr.msk.bf16.mxu0 %vm9176_vm0, %v9175_v1  ;;  %8541 = vrcp.f32 %v3718_v20 }
 0x269   : > { %v2143_v33 = vpack.c.bf16 %v2020_v25, %v2019_v23  ;;  %v6852_v34 = vmul.f32 -1.442695, %v2648_v26  ;;  %v2651_v24 = vadd.f32 %v9952_v28, %v2650_v32  ;;  %v7867_v35 = vpop.f32.mrb[79].mxu1 }
 0x26a   : > { %8543 = vrcp.f32 %v3719_v29  ;;  %5926 = vst.msk [vmem:[%s9781_s20 + $0x78] sm:$0xf] %vm5895_vm5, %v7099_v30  ;;  %5927 = vst.msk [vmem:[%s9781_s20 + $0x7c] sm:$0xf] %vm5895_vm5, %v7100_v31  ;;  %v1624_v37 = vpop.f32.mrb[188].mxu0  ;;  %v8534_v39 = vpop.eup %8533 }
 0x26b   : > { %8545 = vpow2.f32 %v6852_v34  ;;  %v6853_v40 = vmul.f32 -1.442695, %v2651_v24  ;;  %v1625_v41 = vadd.f32 %v9917_v45, %v1624_v37  ;;  %v7634_v42 = vpop.f32.mrb[189].mxu0  ;;  %7973 = vmatmul.mubr.msk.bf16.gmra.mrb[184].mxu1 %vm2205_vm3, %v2143_v33  ;;  %v8360_v37 = vld [vmem:[%s9414_s15 + $0x180] sm:$0xff]  }
 0x26c   : > { %v8536_v44 = vpop.eup %8535  ;;  %v1627_v46 = vpop.f32.mrb[190].mxu0  ;;  %7976 = vmatprep.mubr.msk.bf16.mxu1 %vm9176_vm0, %v9175_v1  ;;  %v8336_v42 = vld [vmem:[%s9278_s23 + $0x260] sm:$0xff]   ;;  %4970 = vrot.lane.b32.xlu0 %v8360_v37, %s9177_s13 }
 0x26d   : > { %v8538_v48 = vpop.eup %8537  ;;  %8547 = vpow2.f32 %v6853_v40  ;;  %v1628_v49 = vadd.f32 %v9917_v45, %v1627_v46  ;;  %v7635_v50 = vpop.f32.mrb[191].mxu0  ;;  %v4210_v51 = vpack.c.bf16 %v8536_v44, %v8534_v39  ;;  %v2021_v55 = vmax.f32 %v1625_v41, 0.0 }
 0x26e   : > { %v3720_v52 = vadd.f32 1.0, %v8538_v48  ;;  %v2655_v53 = vpop.f32.mrb[80].mxu1  ;;  %v4911_v46 = vpop.permute.xlu0 %4910 }
 0x26f   : > { %v8540_v54 = vpop.eup %8539  ;;  %v2022_v56 = vmax.f32 %v1628_v49, 0.0  ;;  %v5095_v57 = vsel %vm5044_vm4, %v4210_v51, %v4907_v47  ;;  %v2656_v58 = vadd.f32 %v9952_v28, %v2655_v53  ;;  %7741 = vmatmul.mubr.msk.bf16.gmra.mrb[40].mxu0 %vm954_vm2, %v8332_v43  ;;  %v7870_v59 = vpop.f32.mrb[81].mxu1 }
 0x270   : > { %v3721_v60 = vadd.f32 1.0, %v8540_v54  ;;  %v7101_v61 = vcombine.low %v5095_v57, %v5095_v57  ;;  %v7102_v62 = vcombine.high %v5095_v57, %v5095_v57  ;;  %v2658_v63 = vpop.f32.mrb[82].mxu1  ;;  %7744 = vmatprep.mubr.msk.bf16.mxu0 %vm9176_vm0, %v9175_v1  ;;  %8549 = vrcp.f32 %v3720_v52 }
 0x271   : > { %v2144_v0 = vpack.c.bf16 %v2022_v56, %v2021_v55  ;;  %v6854_v2 = vmul.f32 -1.442695, %v2656_v58  ;;  %v2659_v3 = vadd.f32 %v9952_v28, %v2658_v63  ;;  %v7871_v4 = vpop.f32.mrb[83].mxu1 }
 0x272   : > { %8551 = vrcp.f32 %v3721_v60  ;;  %5928 = vst.msk [vmem:[%s9781_s20 + $0x80] sm:$0xf] %vm5895_vm5, %v7101_v61  ;;  %5929 = vst.msk [vmem:[%s9781_s20 + $0x84] sm:$0xf] %vm5895_vm5, %v7102_v62  ;;  %v1632_v5 = vpop.f32.mrb[192].mxu0  ;;  %v8542_v7 = vpop.eup %8541 }
 0x273   : > { %8553 = vpow2.f32 %v6854_v2  ;;  %v6855_v8 = vmul.f32 -1.442695, %v2659_v3  ;;  %v1633_v9 = vadd.f32 %v9917_v45, %v1632_v5  ;;  %v7638_v10 = vpop.f32.mrb[193].mxu0  ;;  %7977 = vmatmul.mubr.msk.bf16.gmra.mrb[188].mxu1 %vm2205_vm3, %v2144_v0  ;;  %v8361_v5 = vld [vmem:[%s9414_s15 + $0x188] sm:$0xff]  }
 0x274   : > { %v8544_v12 = vpop.eup %8543  ;;  %v1635_v13 = vpop.f32.mrb[194].mxu0  ;;  %7980 = vmatprep.mubr.msk.bf16.mxu1 %vm9176_vm0, %v9175_v1  ;;  %v8338_v10 = vld [vmem:[%s9278_s23 + $0x268] sm:$0xff]   ;;  %4972 = vrot.lane.b32.xlu1 %v8361_v5, %s9177_s13 }
 0x275   : > { %v8546_v15 = vpop.eup %8545  ;;  %8555 = vpow2.f32 %v6855_v8  ;;  %v1636_v16 = vadd.f32 %v9917_v45, %v1635_v13  ;;  %v7639_v17 = vpop.f32.mrb[195].mxu0  ;;  %v4211_v18 = vpack.c.bf16 %v8544_v12, %v8542_v7  ;;  %v2023_v22 = vmax.f32 %v1633_v9, 0.0 }
 0x276   : > { %v3722_v19 = vadd.f32 1.0, %v8546_v15  ;;  %v2663_v20 = vpop.f32.mrb[84].mxu1  ;;  %v4913_v13 = vpop.permute.xlu1 %4912 }
 0x277   : > { %v8548_v21 = vpop.eup %8547  ;;  %v2024_v23 = vmax.f32 %v1636_v16, 0.0  ;;  %v5098_v25 = vsel %vm5044_vm4, %v4211_v18, %v4909_v14  ;;  %v2664_v36 = vadd.f32 %v9952_v28, %v2663_v20  ;;  %7745 = vmatmul.mubr.msk.bf16.gmra.mrb[44].mxu0 %vm954_vm2, %v8334_v11  ;;  %v7874_v26 = vpop.f32.mrb[85].mxu1 }
 0x278   : > { %v3723_v27 = vadd.f32 1.0, %v8548_v21  ;;  %v7103_v29 = vcombine.low %v5098_v25, %v5098_v25  ;;  %v7104_v30 = vcombine.high %v5098_v25, %v5098_v25  ;;  %v2666_v31 = vpop.f32.mrb[86].mxu1  ;;  %7748 = vmatprep.mubr.msk.bf16.mxu0 %vm9176_vm0, %v9175_v1  ;;  %8557 = vrcp.f32 %v3722_v19 }
 0x279   : > { %v2145_v32 = vpack.c.bf16 %v2024_v23, %v2023_v22  ;;  %v6856_v33 = vmul.f32 -1.442695, %v2664_v36  ;;  %v2667_v34 = vadd.f32 %v9952_v28, %v2666_v31  ;;  %v7875_v24 = vpop.f32.mrb[87].mxu1 }
 0x27a   : > { %8559 = vrcp.f32 %v3723_v27  ;;  %5930 = vst.msk [vmem:[%s9781_s20 + $0x88] sm:$0xf] %vm5895_vm5, %v7103_v29  ;;  %5931 = vst.msk [vmem:[%s9781_s20 + $0x8c] sm:$0xf] %vm5895_vm5, %v7104_v30  ;;  %v1640_v35 = vpop.f32.mrb[196].mxu0  ;;  %v8550_v38 = vpop.eup %8549 }
 0x27b   : > { %8561 = vpow2.f32 %v6856_v33  ;;  %v6857_v39 = vmul.f32 -1.442695, %v2667_v34  ;;  %v1641_v40 = vadd.f32 %v9917_v45, %v1640_v35  ;;  %v7642_v41 = vpop.f32.mrb[197].mxu0  ;;  %7981 = vmatmul.mubr.msk.bf16.gmra.mrb[192].mxu1 %vm2205_vm3, %v2145_v32  ;;  %v8362_v35 = vld [vmem:[%s9414_s15 + $0x190] sm:$0xff]  }
 0x27c   : > { %v8552_v43 = vpop.eup %8551  ;;  %v1643_v44 = vpop.f32.mrb[198].mxu0  ;;  %7984 = vmatprep.mubr.msk.bf16.mxu1 %vm9176_vm0, %v9175_v1  ;;  %v8340_v41 = vld [vmem:[%s9278_s23 + $0x270] sm:$0xff]   ;;  %4974 = vrot.lane.b32.xlu0 %v8362_v35, %s9177_s13 }
 0x27d   : > { %v8554_v47 = vpop.eup %8553  ;;  %8563 = vpow2.f32 %v6857_v39  ;;  %v1644_v48 = vadd.f32 %v9917_v45, %v1643_v44  ;;  %v7643_v49 = vpop.f32.mrb[199].mxu0  ;;  %v4212_v50 = vpack.c.bf16 %v8552_v43, %v8550_v38  ;;  %v2025_v54 = vmax.f32 %v1641_v40, 0.0 }
 0x27e   : > { %v3724_v51 = vadd.f32 1.0, %v8554_v47  ;;  %v2671_v52 = vpop.f32.mrb[88].mxu1  ;;  %v4915_v44 = vpop.permute.xlu0 %4914 }
 0x27f   : > { %v8556_v53 = vpop.eup %8555  ;;  %v2026_v55 = vmax.f32 %v1644_v48, 0.0  ;;  %v5101_v56 = vsel %vm5044_vm4, %v4212_v50, %v4911_v46  ;;  %v2672_v57 = vadd.f32 %v9952_v28, %v2671_v52  ;;  %7749 = vmatmul.mubr.msk.bf16.gmra.mrb[48].mxu0 %vm954_vm2, %v8336_v42  ;;  %v7878_v58 = vpop.f32.mrb[89].mxu1 }
 0x280   : > { %v3725_v59 = vadd.f32 1.0, %v8556_v53  ;;  %v7105_v60 = vcombine.low %v5101_v56, %v5101_v56  ;;  %v7106_v61 = vcombine.high %v5101_v56, %v5101_v56  ;;  %v2674_v62 = vpop.f32.mrb[90].mxu1  ;;  %7752 = vmatprep.mubr.msk.bf16.mxu0 %vm9176_vm0, %v9175_v1  ;;  %8565 = vrcp.f32 %v3724_v51 }
 0x281   : > { %v2146_v63 = vpack.c.bf16 %v2026_v55, %v2025_v54  ;;  %v6858_v0 = vmul.f32 -1.442695, %v2672_v57  ;;  %v2675_v2 = vadd.f32 %v9952_v28, %v2674_v62  ;;  %v7879_v3 = vpop.f32.mrb[91].mxu1 }
 0x282   : > { %8567 = vrcp.f32 %v3725_v59  ;;  %5932 = vst.msk [vmem:[%s9781_s20 + $0x90] sm:$0xf] %vm5895_vm5, %v7105_v60  ;;  %5933 = vst.msk [vmem:[%s9781_s20 + $0x94] sm:$0xf] %vm5895_vm5, %v7106_v61  ;;  %v1648_v4 = vpop.f32.mrb[200].mxu0  ;;  %v8558_v6 = vpop.eup %8557  ;;  %v8363_v3 = vld [vmem:[%s9414_s15 + $0x198] sm:$0xff]  }
 0x283   : > { %8569 = vpow2.f32 %v6858_v0  ;;  %v6859_v7 = vmul.f32 -1.442695, %v2675_v2  ;;  %v1649_v8 = vadd.f32 %v9917_v45, %v1648_v4  ;;  %v7646_v9 = vpop.f32.mrb[201].mxu0  ;;  %7985 = vmatmul.mubr.msk.bf16.gmra.mrb[196].mxu1 %vm2205_vm3, %v2146_v63  ;;  %4976 = vrot.lane.b32.xlu1 %v8363_v3, %s9177_s13 }
 0x284   : > { %v8560_v11 = vpop.eup %8559  ;;  %v1651_v12 = vpop.f32.mrb[202].mxu0  ;;  %7988 = vmatprep.mubr.msk.bf16.mxu1 %vm9176_vm0, %v9175_v1  ;;  %v8342_v9 = vld [vmem:[%s9278_s23 + $0x278] sm:$0xff]  }
 0x285   : > { %v8562_v14 = vpop.eup %8561  ;;  %8571 = vpow2.f32 %v6859_v7  ;;  %v1652_v15 = vadd.f32 %v9917_v45, %v1651_v12  ;;  %v7647_v16 = vpop.f32.mrb[203].mxu0  ;;  %v4213_v17 = vpack.c.bf16 %v8560_v11, %v8558_v6  ;;  %v2027_v21 = vmax.f32 %v1649_v8, 0.0  ;;  %v10161_v6 = vld [vmem:[%s11089_s2] ss:$0 sm:$0xff] }
 0x286   : > { %v3726_v18 = vadd.f32 1.0, %v8562_v14  ;;  %v2679_v19 = vpop.f32.mrb[92].mxu1  ;;  %v4917_v12 = vpop.permute.xlu1 %4916 }
 0x287   : > { %v8564_v20 = vpop.eup %8563  ;;  %v2028_v22 = vmax.f32 %v1652_v15, 0.0  ;;  %v5104_v23 = vsel %vm5044_vm4, %v4213_v17, %v4913_v13  ;;  %v2680_v25 = vadd.f32 %v9952_v28, %v2679_v19  ;;  %7753 = vmatmul.mubr.msk.bf16.gmra.mrb[52].mxu0 %vm954_vm2, %v8338_v10  ;;  %v7882_v36 = vpop.f32.mrb[93].mxu1 }
 0x288   : > { %v3727_v26 = vadd.f32 1.0, %v8564_v20  ;;  %v7107_v27 = vcombine.low %v5104_v23, %v5104_v23  ;;  %v7108_v29 = vcombine.high %v5104_v23, %v5104_v23  ;;  %v2682_v30 = vpop.f32.mrb[94].mxu1  ;;  %7756 = vmatprep.mubr.msk.bf16.mxu0 %vm9176_vm0, %v9175_v1  ;;  %8573 = vrcp.f32 %v3726_v18 }
 0x289   : > { %v2147_v31 = vpack.c.bf16 %v2028_v22, %v2027_v21  ;;  %v6860_v32 = vmul.f32 -1.442695, %v2680_v25  ;;  %v2683_v33 = vadd.f32 %v9952_v28, %v2682_v30  ;;  %v7883_v34 = vpop.f32.mrb[95].mxu1 }
 0x28a   : > { %8575 = vrcp.f32 %v3727_v26  ;;  %5934 = vst.msk [vmem:[%s9781_s20 + $0x98] sm:$0xf] %vm5895_vm5, %v7107_v27  ;;  %5935 = vst.msk [vmem:[%s9781_s20 + $0x9c] sm:$0xf] %vm5895_vm5, %v7108_v29  ;;  %v1656_v24 = vpop.f32.mrb[204].mxu0  ;;  %v8566_v37 = vpop.eup %8565 }
 0x28b   : > { %8577 = vpow2.f32 %v6860_v32  ;;  %v6861_v38 = vmul.f32 -1.442695, %v2683_v33  ;;  %v1657_v39 = vadd.f32 %v9917_v45, %v1656_v24  ;;  %v7650_v40 = vpop.f32.mrb[205].mxu0  ;;  %7989 = vmatmul.mubr.msk.bf16.gmra.mrb[200].mxu1 %vm2205_vm3, %v2147_v31  ;;  %v8364_v24 = vld [vmem:[%s9414_s15 + $0x1a0] sm:$0xff]  }
 0x28c   : > { %v8568_v42 = vpop.eup %8567  ;;  %v1659_v43 = vpop.f32.mrb[206].mxu0  ;;  %7992 = vmatprep.mubr.msk.bf16.mxu1 %vm9176_vm0, %v9175_v1  ;;  %v8344_v40 = vld [vmem:[%s9278_s23 + $0x280] sm:$0xff]   ;;  %4978 = vrot.lane.b32.xlu0 %v8364_v24, %s9177_s13 }
 0x28d   : > { %v8570_v46 = vpop.eup %8569  ;;  %8579 = vpow2.f32 %v6861_v38  ;;  %v1660_v47 = vadd.f32 %v9917_v45, %v1659_v43  ;;  %v7651_v48 = vpop.f32.mrb[207].mxu0  ;;  %v4214_v49 = vpack.c.bf16 %v8568_v42, %v8566_v37  ;;  %v2029_v53 = vmax.f32 %v1657_v39, 0.0 }
 0x28e   : > { %v3728_v50 = vadd.f32 1.0, %v8570_v46  ;;  %v2687_v51 = vpop.f32.mrb[96].mxu1 }
 0x28f   : > { %v8572_v52 = vpop.eup %8571  ;;  %v2030_v54 = vmax.f32 %v1660_v47, 0.0  ;;  %v5107_v55 = vsel %vm5044_vm4, %v4214_v49, %v4915_v44  ;;  %v2688_v56 = vadd.f32 %v9952_v28, %v2687_v51  ;;  %7757 = vmatmul.mubr.msk.bf16.gmra.mrb[56].mxu0 %vm954_vm2, %v8340_v41  ;;  %v7886_v57 = vpop.f32.mrb[97].mxu1 }
 0x290   : > { %v3729_v58 = vadd.f32 1.0, %v8572_v52  ;;  %v7109_v59 = vcombine.low %v5107_v55, %v5107_v55  ;;  %v7110_v45 = vcombine.high %v5107_v55, %v5107_v55  ;;  %v2690_v60 = vpop.f32.mrb[98].mxu1  ;;  %7760 = vmatprep.mubr.msk.bf16.mxu0 %vm9176_vm0, %v9175_v1  ;;  %8581 = vrcp.f32 %v3728_v50 }
 0x291   : > { %v2148_v61 = vpack.c.bf16 %v2030_v54, %v2029_v53  ;;  %v6862_v62 = vmul.f32 -1.442695, %v2688_v56  ;;  %v2691_v63 = vadd.f32 %v9952_v28, %v2690_v60  ;;  %v7887_v0 = vpop.f32.mrb[99].mxu1  ;;  %v10192_v54 = vld [vmem:[%s11091_s4] ss:$0 sm:$0xff] }
 0x292   : > { %8583 = vrcp.f32 %v3729_v58  ;;  %5936 = vst.msk [vmem:[%s9781_s20 + $0xa0] sm:$0xf] %vm5895_vm5, %v7109_v59  ;;  %5937 = vst.msk [vmem:[%s9781_s20 + $0xa4] sm:$0xf] %vm5895_vm5, %v7110_v45  ;;  %v1664_v2 = vpop.f32.mrb[208].mxu0  ;;  %v8574_v4 = vpop.eup %8573 }
 0x293   : > { %8585 = vpow2.f32 %v6862_v62  ;;  %v6863_v5 = vmul.f32 -1.442695, %v2691_v63  ;;  %v1665_v7 = vadd.f32 %v10161_v6, %v1664_v2  ;;  %v7654_v8 = vpop.f32.mrb[209].mxu0  ;;  %7993 = vmatmul.mubr.msk.bf16.gmra.mrb[204].mxu1 %vm2205_vm3, %v2148_v61  ;;  %v8365_v2 = vld [vmem:[%s9414_s15 + $0x1a8] sm:$0xff]  }
 0x294   : > { %v8576_v10 = vpop.eup %8575  ;;  %v1667_v11 = vpop.f32.mrb[210].mxu0  ;;  %7996 = vmatprep.mubr.msk.bf16.mxu1 %vm9176_vm0, %v9175_v1  ;;  %v8346_v8 = vld [vmem:[%s9278_s23 + $0x288] sm:$0xff]   ;;  %4980 = vrot.lane.b32.xlu1 %v8365_v2, %s9177_s13 }
 0x295   : > { %v8578_v13 = vpop.eup %8577  ;;  %8587 = vpow2.f32 %v6863_v5  ;;  %v1668_v14 = vadd.f32 %v10161_v6, %v1667_v11  ;;  %v7655_v15 = vpop.f32.mrb[211].mxu0  ;;  %v4215_v16 = vpack.c.bf16 %v8576_v10, %v8574_v4  ;;  %v2031_v20 = vmax.f32 %v1665_v7, 0.0 }
 0x296   : > { %v3730_v17 = vadd.f32 1.0, %v8578_v13  ;;  %v2695_v18 = vpop.f32.mrb[100].mxu1  ;;  %v4921_v11 = vpop.permute.xlu1 %4920 }
 0x297   : > { %v8580_v19 = vpop.eup %8579  ;;  %v2032_v21 = vmax.f32 %v1668_v14, 0.0  ;;  %v5110_v22 = vsel %vm5044_vm4, %v4215_v16, %v4917_v12  ;;  %v2696_v23 = vadd.f32 %v9952_v28, %v2695_v18  ;;  %7761 = vmatmul.mubr.msk.bf16.gmra.mrb[60].mxu0 %vm954_vm2, %v8342_v9  ;;  %v7890_v25 = vpop.f32.mrb[101].mxu1 }
 0x298   : > { %v3731_v36 = vadd.f32 1.0, %v8580_v19  ;;  %v7111_v26 = vcombine.low %v5110_v22, %v5110_v22  ;;  %v7112_v27 = vcombine.high %v5110_v22, %v5110_v22  ;;  %v2698_v29 = vpop.f32.mrb[102].mxu1  ;;  %7764 = vmatprep.mubr.msk.bf16.mxu0 %vm9176_vm0, %v9175_v1  ;;  %8589 = vrcp.f32 %v3730_v17 }
 0x299   : > { %v2149_v30 = vpack.c.bf16 %v2032_v21, %v2031_v20  ;;  %v6864_v31 = vmul.f32 -1.442695, %v2696_v23  ;;  %v2699_v32 = vadd.f32 %v9952_v28, %v2698_v29  ;;  %v7891_v33 = vpop.f32.mrb[103].mxu1  ;;  %v4919_v28 = vpop.permute.xlu0 %4918 }
 0x29a   : > { %8591 = vrcp.f32 %v3731_v36  ;;  %5938 = vst.msk [vmem:[%s9781_s20 + $0xa8] sm:$0xf] %vm5895_vm5, %v7111_v26  ;;  %5939 = vst.msk [vmem:[%s9781_s20 + $0xac] sm:$0xf] %vm5895_vm5, %v7112_v27  ;;  %v1672_v34 = vpop.f32.mrb[212].mxu0  ;;  %v8582_v35 = vpop.eup %8581 }
 0x29b   : > { %8593 = vpow2.f32 %v6864_v31  ;;  %v6865_v37 = vmul.f32 -1.442695, %v2699_v32  ;;  %v1673_v38 = vadd.f32 %v10161_v6, %v1672_v34  ;;  %v7658_v39 = vpop.f32.mrb[213].mxu0  ;;  %7997 = vmatmul.mubr.msk.bf16.gmra.mrb[208].mxu1 %vm2205_vm3, %v2149_v30  ;;  %v8366_v34 = vld [vmem:[%s9414_s15 + $0x1b0] sm:$0xff]  }
 0x29c   : > { %v8584_v41 = vpop.eup %8583  ;;  %v1675_v42 = vpop.f32.mrb[214].mxu0  ;;  %8000 = vmatprep.mubr.msk.bf16.mxu1 %vm9176_vm0, %v9175_v1  ;;  %v8348_v39 = vld [vmem:[%s9278_s23 + $0x290] sm:$0xff]   ;;  %4982 = vrot.lane.b32.xlu0 %v8366_v34, %s9177_s13 }
 0x29d   : > { %v8586_v43 = vpop.eup %8585  ;;  %8595 = vpow2.f32 %v6865_v37  ;;  %v1676_v44 = vadd.f32 %v10161_v6, %v1675_v42  ;;  %v7659_v46 = vpop.f32.mrb[215].mxu0  ;;  %v4216_v47 = vpack.c.bf16 %v8584_v41, %v8582_v35  ;;  %v2033_v51 = vmax.f32 %v1673_v38, 0.0 }
 0x29e   : > { %v3732_v48 = vadd.f32 1.0, %v8586_v43  ;;  %v2703_v49 = vpop.f32.mrb[104].mxu1  ;;  %v4923_v42 = vpop.permute.xlu0 %4922 }
 0x29f   : > { %v8588_v50 = vpop.eup %8587  ;;  %v2034_v52 = vmax.f32 %v1676_v44, 0.0  ;;  %v5113_v53 = vsel %vm5044_vm4, %v4216_v47, %v4919_v28  ;;  %v2704_v55 = vadd.f32 %v10192_v54, %v2703_v49  ;;  %7765 = vmatmul.mubr.msk.bf16.gmra.mrb[64].mxu0 %vm954_vm2, %v8344_v40  ;;  %v7894_v56 = vpop.f32.mrb[105].mxu1 }
 0x2a0   : > { %v3733_v57 = vadd.f32 1.0, %v8588_v50  ;;  %v7113_v58 = vcombine.low %v5113_v53, %v5113_v53  ;;  %v7114_v59 = vcombine.high %v5113_v53, %v5113_v53  ;;  %v2706_v45 = vpop.f32.mrb[106].mxu1  ;;  %7768 = vmatprep.mubr.msk.bf16.mxu0 %vm9176_vm0, %v9175_v1  ;;  %8597 = vrcp.f32 %v3732_v48 }
 0x2a1   : > { %v2150_v60 = vpack.c.bf16 %v2034_v52, %v2033_v51  ;;  %v6866_v61 = vmul.f32 -1.442695, %v2704_v55  ;;  %v2707_v62 = vadd.f32 %v10192_v54, %v2706_v45  ;;  %v7895_v63 = vpop.f32.mrb[107].mxu1 }
 0x2a2   : > { %8599 = vrcp.f32 %v3733_v57  ;;  %5940 = vst.msk [vmem:[%s9781_s20 + $0xb0] sm:$0xf] %vm5895_vm5, %v7113_v58  ;;  %5941 = vst.msk [vmem:[%s9781_s20 + $0xb4] sm:$0xf] %vm5895_vm5, %v7114_v59  ;;  %v1680_v0 = vpop.f32.mrb[216].mxu0  ;;  %v8590_v3 = vpop.eup %8589 }
 0x2a3   : > { %8601 = vpow2.f32 %v6866_v61  ;;  %v6867_v4 = vmul.f32 -1.442695, %v2707_v62  ;;  %v1681_v5 = vadd.f32 %v10161_v6, %v1680_v0  ;;  %v7662_v7 = vpop.f32.mrb[217].mxu0  ;;  %8001 = vmatmul.mubr.msk.bf16.gmra.mrb[212].mxu1 %vm2205_vm3, %v2150_v60  ;;  %v8367_v0 = vld [vmem:[%s9414_s15 + $0x1b8] sm:$0xff]  }
 0x2a4   : > { %v8592_v9 = vpop.eup %8591  ;;  %v1683_v10 = vpop.f32.mrb[218].mxu0  ;;  %8004 = vmatprep.mubr.msk.bf16.mxu1 %vm9176_vm0, %v9175_v1  ;;  %v8350_v7 = vld [vmem:[%s9278_s23 + $0x298] sm:$0xff]   ;;  %4984 = vrot.lane.b32.xlu1 %v8367_v0, %s9177_s13 }
 0x2a5   : > { %v8594_v12 = vpop.eup %8593  ;;  %8603 = vpow2.f32 %v6867_v4  ;;  %v1684_v13 = vadd.f32 %v10161_v6, %v1683_v10  ;;  %v7663_v14 = vpop.f32.mrb[219].mxu0  ;;  %v4217_v15 = vpack.c.bf16 %v8592_v9, %v8590_v3  ;;  %v2035_v19 = vmax.f32 %v1681_v5, 0.0 }
 0x2a6   : > { %v3734_v16 = vadd.f32 1.0, %v8594_v12  ;;  %v2711_v17 = vpop.f32.mrb[108].mxu1  ;;  %v4925_v10 = vpop.permute.xlu1 %4924 }
 0x2a7   : > { %v8596_v18 = vpop.eup %8595  ;;  %v2036_v20 = vmax.f32 %v1684_v13, 0.0  ;;  %v5116_v21 = vsel %vm5044_vm4, %v4217_v15, %v4921_v11  ;;  %v2712_v22 = vadd.f32 %v10192_v54, %v2711_v17  ;;  %7769 = vmatmul.mubr.msk.bf16.gmra.mrb[68].mxu0 %vm954_vm2, %v8346_v8  ;;  %v7898_v23 = vpop.f32.mrb[109].mxu1 }
 0x2a8   : > { %v3735_v25 = vadd.f32 1.0, %v8596_v18  ;;  %v7115_v36 = vcombine.low %v5116_v21, %v5116_v21  ;;  %v7116_v26 = vcombine.high %v5116_v21, %v5116_v21  ;;  %v2714_v27 = vpop.f32.mrb[110].mxu1  ;;  %7772 = vmatprep.mubr.msk.bf16.mxu0 %vm9176_vm0, %v9175_v1  ;;  %8605 = vrcp.f32 %v3734_v16 }
 0x2a9   : > { %v2151_v29 = vpack.c.bf16 %v2036_v20, %v2035_v19  ;;  %v6868_v30 = vmul.f32 -1.442695, %v2712_v22  ;;  %v2715_v31 = vadd.f32 %v10192_v54, %v2714_v27  ;;  %v7899_v32 = vpop.f32.mrb[111].mxu1 }
 0x2aa   : > { %8607 = vrcp.f32 %v3735_v25  ;;  %5942 = vst.msk [vmem:[%s9781_s20 + $0xb8] sm:$0xf] %vm5895_vm5, %v7115_v36  ;;  %5943 = vst.msk [vmem:[%s9781_s20 + $0xbc] sm:$0xf] %vm5895_vm5, %v7116_v26  ;;  %v1688_v33 = vpop.f32.mrb[220].mxu0  ;;  %v8598_v24 = vpop.eup %8597 }
 0x2ab   : > { %8609 = vpow2.f32 %v6868_v30  ;;  %v6869_v35 = vmul.f32 -1.442695, %v2715_v31  ;;  %v1689_v37 = vadd.f32 %v10161_v6, %v1688_v33  ;;  %v7666_v38 = vpop.f32.mrb[221].mxu0  ;;  %8005 = vmatmul.mubr.msk.bf16.gmra.mrb[216].mxu1 %vm2205_vm3, %v2151_v29  ;;  %v8368_v33 = vld [vmem:[%s9414_s15 + $0x1c0] sm:$0xff]  }
 0x2ac   : > { %v8600_v40 = vpop.eup %8599  ;;  %v1691_v41 = vpop.f32.mrb[222].mxu0  ;;  %8008 = vmatprep.mubr.msk.bf16.mxu1 %vm9176_vm0, %v9175_v1  ;;  %v8352_v38 = vld [vmem:[%s9278_s23 + $0x2a0] sm:$0xff]   ;;  %4986 = vrot.lane.b32.xlu0 %v8368_v33, %s9177_s13 }
 0x2ad   : > { %v8602_v28 = vpop.eup %8601  ;;  %8611 = vpow2.f32 %v6869_v35  ;;  %v1692_v43 = vadd.f32 %v10161_v6, %v1691_v41  ;;  %v7667_v44 = vpop.f32.mrb[223].mxu0  ;;  %v4218_v46 = vpack.c.bf16 %v8600_v40, %v8598_v24  ;;  %v2037_v50 = vmax.f32 %v1689_v37, 0.0 }
 0x2ae   : > { %v3736_v47 = vadd.f32 1.0, %v8602_v28  ;;  %v2719_v48 = vpop.f32.mrb[112].mxu1  ;;  %v4927_v41 = vpop.permute.xlu0 %4926 }
 0x2af   : > { %v8604_v49 = vpop.eup %8603  ;;  %v2038_v51 = vmax.f32 %v1692_v43, 0.0  ;;  %v5119_v52 = vsel %vm5044_vm4, %v4218_v46, %v4923_v42  ;;  %v2720_v53 = vadd.f32 %v10192_v54, %v2719_v48  ;;  %7773 = vmatmul.mubr.msk.bf16.gmra.mrb[72].mxu0 %vm954_vm2, %v8348_v39  ;;  %v7902_v55 = vpop.f32.mrb[113].mxu1 }
 0x2b0   : > { %v3737_v56 = vadd.f32 1.0, %v8604_v49  ;;  %v7117_v57 = vcombine.low %v5119_v52, %v5119_v52  ;;  %v7118_v58 = vcombine.high %v5119_v52, %v5119_v52  ;;  %v2722_v59 = vpop.f32.mrb[114].mxu1  ;;  %7776 = vmatprep.mubr.msk.bf16.mxu0 %vm9176_vm0, %v9175_v1  ;;  %8613 = vrcp.f32 %v3736_v47 }
 0x2b1   : > { %v2152_v45 = vpack.c.bf16 %v2038_v51, %v2037_v50  ;;  %v6870_v60 = vmul.f32 -1.442695, %v2720_v53  ;;  %v2723_v61 = vadd.f32 %v10192_v54, %v2722_v59  ;;  %v7903_v62 = vpop.f32.mrb[115].mxu1 }
 0x2b2   : > { %8615 = vrcp.f32 %v3737_v56  ;;  %5944 = vst.msk [vmem:[%s9781_s20 + $0xc0] sm:$0xf] %vm5895_vm5, %v7117_v57  ;;  %5945 = vst.msk [vmem:[%s9781_s20 + $0xc4] sm:$0xf] %vm5895_vm5, %v7118_v58  ;;  %v1696_v63 = vpop.f32.mrb[224].mxu0  ;;  %v8606_v2 = vpop.eup %8605 }
 0x2b3   : > { %8617 = vpow2.f32 %v6870_v60  ;;  %v6871_v3 = vmul.f32 -1.442695, %v2723_v61  ;;  %v1697_v4 = vadd.f32 %v10161_v6, %v1696_v63  ;;  %v7670_v5 = vpop.f32.mrb[225].mxu0  ;;  %8009 = vmatmul.mubr.msk.bf16.gmra.mrb[220].mxu1 %vm2205_vm3, %v2152_v45  ;;  %v8369_v63 = vld [vmem:[%s9414_s15 + $0x1c8] sm:$0xff]  }
 0x2b4   : > { %v8608_v8 = vpop.eup %8607  ;;  %v1699_v9 = vpop.f32.mrb[226].mxu0  ;;  %8012 = vmatprep.mubr.msk.bf16.mxu1 %vm9176_vm0, %v9175_v1  ;;  %4988 = vrot.lane.b32.xlu1 %v8369_v63, %s9177_s13 }
 0x2b5   : > { %v8610_v11 = vpop.eup %8609  ;;  %8619 = vpow2.f32 %v6871_v3  ;;  %v1700_v12 = vadd.f32 %v10161_v6, %v1699_v9  ;;  %v7671_v13 = vpop.f32.mrb[227].mxu0  ;;  %v4219_v14 = vpack.c.bf16 %v8608_v8, %v8606_v2  ;;  %v2039_v18 = vmax.f32 %v1697_v4, 0.0 }
 0x2b6   : > { %v3738_v15 = vadd.f32 1.0, %v8610_v11  ;;  %v2727_v16 = vpop.f32.mrb[116].mxu1  ;;  %v4929_v8 = vpop.permute.xlu1 %4928 }
 0x2b7   : > { %v8612_v17 = vpop.eup %8611  ;;  %v2040_v19 = vmax.f32 %v1700_v12, 0.0  ;;  %v5122_v20 = vsel %vm5044_vm4, %v4219_v14, %v4925_v10  ;;  %v2728_v21 = vadd.f32 %v10192_v54, %v2727_v16  ;;  %7777 = vmatmul.mubr.msk.bf16.gmra.mrb[76].mxu0 %vm954_vm2, %v8350_v7  ;;  %v7906_v22 = vpop.f32.mrb[117].mxu1 }
 0x2b8   : > { %v3739_v23 = vadd.f32 1.0, %v8612_v17  ;;  %v7119_v25 = vcombine.low %v5122_v20, %v5122_v20  ;;  %v7120_v36 = vcombine.high %v5122_v20, %v5122_v20  ;;  %v2730_v26 = vpop.f32.mrb[118].mxu1  ;;  %7780 = vmatprep.mubr.msk.bf16.mxu0 %vm9176_vm0, %v9175_v1  ;;  %8621 = vrcp.f32 %v3738_v15 }
 0x2b9   : > { %v2153_v27 = vpack.c.bf16 %v2040_v19, %v2039_v18  ;;  %v6872_v29 = vmul.f32 -1.442695, %v2728_v21  ;;  %v2731_v30 = vadd.f32 %v10192_v54, %v2730_v26  ;;  %v7907_v31 = vpop.f32.mrb[119].mxu1 }
 0x2ba   : > { %8623 = vrcp.f32 %v3739_v23  ;;  %5946 = vst.msk [vmem:[%s9781_s20 + $0xc8] sm:$0xf] %vm5895_vm5, %v7119_v25  ;;  %5947 = vst.msk [vmem:[%s9781_s20 + $0xcc] sm:$0xf] %vm5895_vm5, %v7120_v36  ;;  %v1704_v32 = vpop.f32.mrb[228].mxu0  ;;  %v8614_v34 = vpop.eup %8613  ;;  %v8370_v31 = vld [vmem:[%s9414_s15 + $0x1d0] sm:$0xff]  }
 0x2bb   : > { %8625 = vpow2.f32 %v6872_v29  ;;  %v6873_v24 = vmul.f32 -1.442695, %v2731_v30  ;;  %v1705_v35 = vadd.f32 %v10161_v6, %v1704_v32  ;;  %v7674_v37 = vpop.f32.mrb[229].mxu0  ;;  %8013 = vmatmul.mubr.msk.bf16.gmra.mrb[224].mxu1 %vm2205_vm3, %v2153_v27  ;;  %4990 = vrot.lane.b32.xlu0 %v8370_v31, %s9177_s13 }
 0x2bc   : > { %v8616_v39 = vpop.eup %8615  ;;  %v1707_v40 = vpop.f32.mrb[230].mxu0  ;;  %8016 = vmatprep.mubr.msk.bf16.mxu1 %vm9176_vm0, %v9175_v1 }
 0x2bd   : > { %v8618_v42 = vpop.eup %8617  ;;  %8627 = vpow2.f32 %v6873_v24  ;;  %v1708_v28 = vadd.f32 %v10161_v6, %v1707_v40  ;;  %v7675_v43 = vpop.f32.mrb[231].mxu0  ;;  %v4220_v44 = vpack.c.bf16 %v8616_v39, %v8614_v34  ;;  %v2041_v49 = vmax.f32 %v1705_v35, 0.0 }
 0x2be   : > { %v3740_v46 = vadd.f32 1.0, %v8618_v42  ;;  %v2735_v47 = vpop.f32.mrb[120].mxu1 }
 0x2bf   : > { %v8620_v48 = vpop.eup %8619  ;;  %v2042_v50 = vmax.f32 %v1708_v28, 0.0  ;;  %v5125_v51 = vsel %vm5044_vm4, %v4220_v44, %v4927_v41  ;;  %v2736_v52 = vadd.f32 %v10192_v54, %v2735_v47  ;;  %7781 = vmatmul.mubr.msk.bf16.gmra.mrb[80].mxu0 %vm954_vm2, %v8352_v38  ;;  %v7910_v53 = vpop.f32.mrb[121].mxu1 }
 0x2c0   : > { %v3741_v55 = vadd.f32 1.0, %v8620_v48  ;;  %v7121_v56 = vcombine.low %v5125_v51, %v5125_v51  ;;  %v7122_v57 = vcombine.high %v5125_v51, %v5125_v51  ;;  %v2738_v58 = vpop.f32.mrb[122].mxu1  ;;  %8629 = vrcp.f32 %v3740_v46  ;;  %v4931_v38 = vpop.permute.xlu0 %4930 }
 0x2c1   : > { %v2154_v59 = vpack.c.bf16 %v2042_v50, %v2041_v49  ;;  %v6874_v45 = vmul.f32 -1.442695, %v2736_v52  ;;  %v2739_v60 = vadd.f32 %v10192_v54, %v2738_v58  ;;  %v7911_v61 = vpop.f32.mrb[123].mxu1 }
 0x2c2   : > { %8631 = vrcp.f32 %v3741_v55  ;;  %5948 = vst.msk [vmem:[%s9781_s20 + $0xd0] sm:$0xf] %vm5895_vm5, %v7121_v56  ;;  %5949 = vst.msk [vmem:[%s9781_s20 + $0xd4] sm:$0xf] %vm5895_vm5, %v7122_v57  ;;  %v1712_v62 = vpop.f32.mrb[232].mxu0  ;;  %v8622_v0 = vpop.eup %8621 }
 0x2c3   : > { %8633 = vpow2.f32 %v6874_v45  ;;  %v6875_v2 = vmul.f32 -1.442695, %v2739_v60  ;;  %v1713_v3 = vadd.f32 %v10161_v6, %v1712_v62  ;;  %v7678_v4 = vpop.f32.mrb[233].mxu0  ;;  %8017 = vmatmul.mubr.msk.bf16.gmra.mrb[228].mxu1 %vm2205_vm3, %v2154_v59  ;;  %v8371_v60 = vld [vmem:[%s9414_s15 + $0x1d8] sm:$0xff]  }
 0x2c4   : > { %v8624_v5 = vpop.eup %8623  ;;  %v1715_v7 = vpop.f32.mrb[234].mxu0  ;;  %8020 = vmatprep.mubr.msk.bf16.mxu1 %vm9176_vm0, %v9175_v1  ;;  %4992 = vrot.lane.b32.xlu1 %v8371_v60, %s9177_s13 }
 0x2c5   : > { %v8626_v9 = vpop.eup %8625  ;;  %8635 = vpow2.f32 %v6875_v2  ;;  %v1716_v10 = vadd.f32 %v10161_v6, %v1715_v7  ;;  %v7679_v11 = vpop.f32.mrb[235].mxu0  ;;  %v4221_v12 = vpack.c.bf16 %v8624_v5, %v8622_v0  ;;  %v2043_v16 = vmax.f32 %v1713_v3, 0.0 }
 0x2c6   : > { %v3742_v13 = vadd.f32 1.0, %v8626_v9  ;;  %v2743_v14 = vpop.f32.mrb[124].mxu1  ;;  %v4933_v4 = vpop.permute.xlu1 %4932 }
 0x2c7   : > { %v8628_v15 = vpop.eup %8627  ;;  %v2044_v17 = vmax.f32 %v1716_v10, 0.0  ;;  %v5128_v18 = vsel %vm5044_vm4, %v4221_v12, %v4929_v8  ;;  %v2744_v19 = vadd.f32 %v10192_v54, %v2743_v14  ;;  %v7914_v20 = vpop.f32.mrb[125].mxu1 }
 0x2c8   : > { %v3743_v21 = vadd.f32 1.0, %v8628_v15  ;;  %v7123_v22 = vcombine.low %v5128_v18, %v5128_v18  ;;  %v7124_v23 = vcombine.high %v5128_v18, %v5128_v18  ;;  %v2746_v25 = vpop.f32.mrb[126].mxu1  ;;  %8637 = vrcp.f32 %v3742_v13 }
 0x2c9   : > { %v2155_v36 = vpack.c.bf16 %v2044_v17, %v2043_v16  ;;  %v6876_v26 = vmul.f32 -1.442695, %v2744_v19  ;;  %v2747_v27 = vadd.f32 %v10192_v54, %v2746_v25  ;;  %v7915_v29 = vpop.f32.mrb[127].mxu1 }
 0x2ca   : > { %8639 = vrcp.f32 %v3743_v21  ;;  %5950 = vst.msk [vmem:[%s9781_s20 + $0xd8] sm:$0xf] %vm5895_vm5, %v7123_v22  ;;  %5951 = vst.msk [vmem:[%s9781_s20 + $0xdc] sm:$0xf] %vm5895_vm5, %v7124_v23  ;;  %v1720_v30 = vpop.f32.mrb[236].mxu0  ;;  %v8630_v32 = vpop.eup %8629 }
 0x2cb   : > { %8641 = vpow2.f32 %v6876_v26  ;;  %v6877_v33 = vmul.f32 -1.442695, %v2747_v27  ;;  %v1721_v34 = vadd.f32 %v10161_v6, %v1720_v30  ;;  %v7682_v24 = vpop.f32.mrb[237].mxu0  ;;  %8021 = vmatmul.mubr.msk.bf16.gmra.mrb[232].mxu1 %vm2205_vm3, %v2155_v36  ;;  %v8372_v27 = vld [vmem:[%s9414_s15 + $0x1e0] sm:$0xff]  }
 0x2cc   : > { %v8632_v35 = vpop.eup %8631  ;;  %v1723_v37 = vpop.f32.mrb[238].mxu0  ;;  %8024 = vmatprep.mubr.msk.bf16.mxu1 %vm9176_vm0, %v9175_v1  ;;  %4994 = vrot.lane.b32.xlu0 %v8372_v27, %s9177_s13 }
 0x2cd   : > { %v8634_v39 = vpop.eup %8633  ;;  %8643 = vpow2.f32 %v6877_v33  ;;  %v1724_v40 = vadd.f32 %v10161_v6, %v1723_v37  ;;  %v7683_v41 = vpop.f32.mrb[239].mxu0  ;;  %v4222_v42 = vpack.c.bf16 %v8632_v35, %v8630_v32  ;;  %v2045_v46 = vmax.f32 %v1721_v34, 0.0 }
 0x2ce   : > { %v3744_v28 = vadd.f32 1.0, %v8634_v39  ;;  %v2751_v43 = vpop.f32.mrb[128].mxu1  ;;  %v4935_v24 = vpop.permute.xlu0 %4934 }
 0x2cf   : > { %v8636_v44 = vpop.eup %8635  ;;  %v2046_v47 = vmax.f32 %v1724_v40, 0.0  ;;  %v5131_v48 = vsel %vm5044_vm4, %v4222_v42, %v4931_v38  ;;  %v2752_v49 = vadd.f32 %v10192_v54, %v2751_v43  ;;  %v7918_v50 = vpop.f32.mrb[129].mxu1 }
 0x2d0   : > { %v3745_v51 = vadd.f32 1.0, %v8636_v44  ;;  %v7125_v52 = vcombine.low %v5131_v48, %v5131_v48  ;;  %v7126_v53 = vcombine.high %v5131_v48, %v5131_v48  ;;  %v2754_v55 = vpop.f32.mrb[130].mxu1  ;;  %8645 = vrcp.f32 %v3744_v28 }
 0x2d1   : > { %v2156_v56 = vpack.c.bf16 %v2046_v47, %v2045_v46  ;;  %v6878_v57 = vmul.f32 -1.442695, %v2752_v49  ;;  %v2755_v58 = vadd.f32 %v10192_v54, %v2754_v55  ;;  %v7919_v59 = vpop.f32.mrb[131].mxu1 }
 0x2d2   : > { %8647 = vrcp.f32 %v3745_v51  ;;  %5952 = vst.msk [vmem:[%s9781_s20 + $0xe0] sm:$0xf] %vm5895_vm5, %v7125_v52  ;;  %5953 = vst.msk [vmem:[%s9781_s20 + $0xe4] sm:$0xf] %vm5895_vm5, %v7126_v53  ;;  %v1728_v45 = vpop.f32.mrb[240].mxu0  ;;  %v8638_v61 = vpop.eup %8637 }
 0x2d3   : > { %8649 = vpow2.f32 %v6878_v57  ;;  %v6879_v62 = vmul.f32 -1.442695, %v2755_v58  ;;  %v1729_v63 = vadd.f32 %v10161_v6, %v1728_v45  ;;  %v7686_v0 = vpop.f32.mrb[241].mxu0  ;;  %8025 = vmatmul.mubr.msk.bf16.gmra.mrb[236].mxu1 %vm2205_vm3, %v2156_v56  ;;  %v8373_v58 = vld [vmem:[%s9414_s15 + $0x1e8] sm:$0xff]  }
 0x2d4   : > { %v8640_v2 = vpop.eup %8639  ;;  %v1731_v3 = vpop.f32.mrb[242].mxu0  ;;  %8028 = vmatprep.mubr.msk.bf16.mxu1 %vm9176_vm0, %v9175_v1  ;;  %4996 = vrot.lane.b32.xlu1 %v8373_v58, %s9177_s13 }
 0x2d5   : > { %v8642_v5 = vpop.eup %8641  ;;  %8651 = vpow2.f32 %v6879_v62  ;;  %v1732_v7 = vadd.f32 %v10161_v6, %v1731_v3  ;;  %v7687_v8 = vpop.f32.mrb[243].mxu0  ;;  %v4223_v9 = vpack.c.bf16 %v8640_v2, %v8638_v61  ;;  %v2047_v13 = vmax.f32 %v1729_v63, 0.0 }
 0x2d6   : > { %v3746_v10 = vadd.f32 1.0, %v8642_v5  ;;  %v2759_v11 = vpop.f32.mrb[132].mxu1  ;;  %v4937_v0 = vpop.permute.xlu1 %4936 }
 0x2d7   : > { %v8644_v12 = vpop.eup %8643  ;;  %v2048_v14 = vmax.f32 %v1732_v7, 0.0  ;;  %v5134_v15 = vsel %vm5044_vm4, %v4223_v9, %v4933_v4  ;;  %v2760_v16 = vadd.f32 %v10192_v54, %v2759_v11  ;;  %v7922_v17 = vpop.f32.mrb[133].mxu1 }
 0x2d8   : > { %v3747_v18 = vadd.f32 1.0, %v8644_v12  ;;  %v7127_v19 = vcombine.low %v5134_v15, %v5134_v15  ;;  %v7128_v20 = vcombine.high %v5134_v15, %v5134_v15  ;;  %v2762_v21 = vpop.f32.mrb[134].mxu1  ;;  %8653 = vrcp.f32 %v3746_v10 }
 0x2d9   : > { %v2157_v22 = vpack.c.bf16 %v2048_v14, %v2047_v13  ;;  %v6880_v23 = vmul.f32 -1.442695, %v2760_v16  ;;  %v2763_v25 = vadd.f32 %v10192_v54, %v2762_v21  ;;  %v7923_v36 = vpop.f32.mrb[135].mxu1 }
 0x2da   : > { %8655 = vrcp.f32 %v3747_v18  ;;  %5954 = vst.msk [vmem:[%s9781_s20 + $0xe8] sm:$0xf] %vm5895_vm5, %v7127_v19  ;;  %5955 = vst.msk [vmem:[%s9781_s20 + $0xec] sm:$0xf] %vm5895_vm5, %v7128_v20  ;;  %v1736_v26 = vpop.f32.mrb[244].mxu0  ;;  %v8646_v29 = vpop.eup %8645 }
 0x2db   : > { %8657 = vpow2.f32 %v6880_v23  ;;  %v6881_v30 = vmul.f32 -1.442695, %v2763_v25  ;;  %v1737_v31 = vadd.f32 %v10161_v6, %v1736_v26  ;;  %v7690_v32 = vpop.f32.mrb[245].mxu0  ;;  %8029 = vmatmul.mubr.msk.bf16.gmra.mrb[240].mxu1 %vm2205_vm3, %v2157_v22  ;;  %v8374_v25 = vld [vmem:[%s9414_s15 + $0x1f0] sm:$0xff]  }
 0x2dc   : > { %v8648_v33 = vpop.eup %8647  ;;  %v1739_v34 = vpop.f32.mrb[246].mxu0  ;;  %8032 = vmatprep.mubr.msk.bf16.mxu1 %vm9176_vm0, %v9175_v1  ;;  %4998 = vrot.lane.b32.xlu0 %v8374_v25, %s9177_s13 }
 0x2dd   : > { %v8650_v35 = vpop.eup %8649  ;;  %8659 = vpow2.f32 %v6881_v30  ;;  %v1740_v37 = vadd.f32 %v10161_v6, %v1739_v34  ;;  %v7691_v38 = vpop.f32.mrb[247].mxu0  ;;  %v4224_v39 = vpack.c.bf16 %v8648_v33, %v8646_v29  ;;  %v2049_v28 = vmax.f32 %v1737_v31, 0.0 }
 0x2de   : > { %v3748_v40 = vadd.f32 1.0, %v8650_v35  ;;  %v2767_v41 = vpop.f32.mrb[136].mxu1  ;;  %v4939_v32 = vpop.permute.xlu0 %4938 }
 0x2df   : > { %v8652_v42 = vpop.eup %8651  ;;  %v2050_v43 = vmax.f32 %v1740_v37, 0.0  ;;  %v5137_v44 = vsel %vm5044_vm4, %v4224_v39, %v4935_v24  ;;  %v2768_v46 = vadd.f32 %v10192_v54, %v2767_v41  ;;  %v7926_v47 = vpop.f32.mrb[137].mxu1 }
 0x2e0   : > { %v3749_v48 = vadd.f32 1.0, %v8652_v42  ;;  %v7129_v49 = vcombine.low %v5137_v44, %v5137_v44  ;;  %v7130_v50 = vcombine.high %v5137_v44, %v5137_v44  ;;  %v2770_v51 = vpop.f32.mrb[138].mxu1  ;;  %8661 = vrcp.f32 %v3748_v40 }
 0x2e1   : > { %v2158_v52 = vpack.c.bf16 %v2050_v43, %v2049_v28  ;;  %v6882_v53 = vmul.f32 -1.442695, %v2768_v46  ;;  %v2771_v55 = vadd.f32 %v10192_v54, %v2770_v51  ;;  %v7927_v56 = vpop.f32.mrb[139].mxu1 }
 0x2e2   : > { %8663 = vrcp.f32 %v3749_v48  ;;  %5956 = vst.msk [vmem:[%s9781_s20 + $0xf0] sm:$0xf] %vm5895_vm5, %v7129_v49  ;;  %5957 = vst.msk [vmem:[%s9781_s20 + $0xf4] sm:$0xf] %vm5895_vm5, %v7130_v50  ;;  %v1744_v57 = vpop.f32.mrb[248].mxu0  ;;  %v8654_v59 = vpop.eup %8653 }
 0x2e3   : > { %8665 = vpow2.f32 %v6882_v53  ;;  %v6883_v45 = vmul.f32 -1.442695, %v2771_v55  ;;  %v1745_v60 = vadd.f32 %v10161_v6, %v1744_v57  ;;  %v7694_v61 = vpop.f32.mrb[249].mxu0  ;;  %8033 = vmatmul.mubr.msk.bf16.gmra.mrb[244].mxu1 %vm2205_vm3, %v2158_v52  ;;  %v8375_v55 = vld [vmem:[%s9414_s15 + $0x1f8] sm:$0xff]  }
 0x2e4   : > { %v8656_v62 = vpop.eup %8655  ;;  %v1747_v63 = vpop.f32.mrb[250].mxu0  ;;  %8036 = vmatprep.mubr.msk.bf16.mxu1 %vm9176_vm0, %v9175_v1  ;;  %5000 = vrot.lane.b32.xlu1 %v8375_v55, %s9177_s13 }
 0x2e5   : > { %v8658_v2 = vpop.eup %8657  ;;  %8667 = vpow2.f32 %v6883_v45  ;;  %v1748_v3 = vadd.f32 %v10161_v6, %v1747_v63  ;;  %v7695_v4 = vpop.f32.mrb[251].mxu0  ;;  %v4225_v5 = vpack.c.bf16 %v8656_v62, %v8654_v59  ;;  %v2051_v10 = vmax.f32 %v1745_v60, 0.0 }
 0x2e6   : > { %v3750_v7 = vadd.f32 1.0, %v8658_v2  ;;  %v2775_v8 = vpop.f32.mrb[140].mxu1  ;;  %v4941_v61 = vpop.permute.xlu1 %4940 }
 0x2e7   : > { %v8660_v9 = vpop.eup %8659  ;;  %v2052_v11 = vmax.f32 %v1748_v3, 0.0  ;;  %v5140_v12 = vsel %vm5044_vm4, %v4225_v5, %v4937_v0  ;;  %v2776_v13 = vadd.f32 %v10192_v54, %v2775_v8  ;;  %v7930_v14 = vpop.f32.mrb[141].mxu1 }
 0x2e8   : > { %v3751_v15 = vadd.f32 1.0, %v8660_v9  ;;  %v7131_v16 = vcombine.low %v5140_v12, %v5140_v12  ;;  %v7132_v17 = vcombine.high %v5140_v12, %v5140_v12  ;;  %v2778_v18 = vpop.f32.mrb[142].mxu1  ;;  %8669 = vrcp.f32 %v3750_v7 }
 0x2e9   : > { %v2159_v19 = vpack.c.bf16 %v2052_v11, %v2051_v10  ;;  %v6884_v20 = vmul.f32 -1.442695, %v2776_v13  ;;  %v2779_v21 = vadd.f32 %v10192_v54, %v2778_v18  ;;  %v7931_v22 = vpop.f32.mrb[143].mxu1 }
 0x2ea   : > { %8671 = vrcp.f32 %v3751_v15  ;;  %5958 = vst.msk [vmem:[%s9781_s20 + $0xf8] sm:$0xf] %vm5895_vm5, %v7131_v16  ;;  %5959 = vst.msk [vmem:[%s9781_s20 + $0xfc] sm:$0xf] %vm5895_vm5, %v7132_v17  ;;  %v1752_v23 = vpop.f32.mrb[252].mxu0  ;;  %v8662_v36 = vpop.eup %8661 }
 0x2eb   : > { %8673 = vpow2.f32 %v6884_v20  ;;  %v6885_v26 = vmul.f32 -1.442695, %v2779_v21  ;;  %v1753_v27 = vadd.f32 %v10161_v6, %v1752_v23  ;;  %v7698_v29 = vpop.f32.mrb[253].mxu0  ;;  %8037 = vmatmul.mubr.msk.bf16.gmra.mrb[248].mxu1 %vm2205_vm3, %v2159_v19  ;;  %v8376_v21 = vld [vmem:[%s9414_s15 + $0x200] sm:$0xff]  }
 0x2ec   : > { %v8664_v30 = vpop.eup %8663  ;;  %v1755_v31 = vpop.f32.mrb[254].mxu0  ;;  %8040 = vmatprep.mubr.msk.bf16.mxu1 %vm9176_vm0, %v9175_v1  ;;  %5002 = vrot.lane.b32.xlu0 %v8376_v21, %s9177_s13 }
 0x2ed   : > { %v8666_v33 = vpop.eup %8665  ;;  %8675 = vpow2.f32 %v6885_v26  ;;  %v1756_v34 = vadd.f32 %v10161_v6, %v1755_v31  ;;  %v7699_v24 = vpop.f32.mrb[255].mxu0  ;;  %v4226_v35 = vpack.c.bf16 %v8664_v30, %v8662_v36  ;;  %v2053_v40 = vmax.f32 %v1753_v27, 0.0  ;;  %v10380_v31 = vld [vmem:[%s11089_s2] ss:$0 sm:$0xff] }
 0x2ee   : > { %v3752_v37 = vadd.f32 1.0, %v8666_v33  ;;  %v2783_v38 = vpop.f32.mrb[144].mxu1  ;;  %v4943_v29 = vpop.permute.xlu0 %4942 }
 0x2ef   : > { %v8668_v39 = vpop.eup %8667  ;;  %v2054_v41 = vmax.f32 %v1756_v34, 0.0  ;;  %v5143_v42 = vsel %vm5044_vm4, %v4226_v35, %v4939_v32  ;;  %v2784_v28 = vadd.f32 %v10192_v54, %v2783_v38  ;;  %v7934_v43 = vpop.f32.mrb[145].mxu1 }
 0x2f0   : > { %v3753_v44 = vadd.f32 1.0, %v8668_v39  ;;  %v7133_v46 = vcombine.low %v5143_v42, %v5143_v42  ;;  %v7134_v47 = vcombine.high %v5143_v42, %v5143_v42  ;;  %v2786_v48 = vpop.f32.mrb[146].mxu1  ;;  %8677 = vrcp.f32 %v3752_v37 }
 0x2f1   : > { %v2160_v49 = vpack.c.bf16 %v2054_v41, %v2053_v40  ;;  %v6886_v50 = vmul.f32 -1.442695, %v2784_v28  ;;  %v2787_v51 = vadd.f32 %v10192_v54, %v2786_v48  ;;  %v7935_v52 = vpop.f32.mrb[147].mxu1 }
 0x2f2   : > { %8679 = vrcp.f32 %v3753_v44  ;;  %5960 = vst.msk [vmem:[%s9781_s20 + $0x100] sm:$0xf] %vm5895_vm5, %v7133_v46  ;;  %5961 = vst.msk [vmem:[%s9781_s20 + $0x104] sm:$0xf] %vm5895_vm5, %v7134_v47  ;;  %v1760_v53 = vpop.f32.mrb[0].mxu0  ;;  %v8670_v56 = vpop.eup %8669 }
 0x2f3   : > { %8681 = vpow2.f32 %v6886_v50  ;;  %v6887_v57 = vmul.f32 -1.442695, %v2787_v51  ;;  %v1761_v58 = vadd.f32 %v10161_v6, %v1760_v53  ;;  %v7702_v59 = vpop.f32.mrb[1].mxu0  ;;  %8041 = vmatmul.mubr.msk.bf16.gmra.mrb[252].mxu1 %vm2205_vm3, %v2160_v49  ;;  %v8377_v51 = vld [vmem:[%s9414_s15 + $0x208] sm:$0xff]  }
 0x2f4   : > { %v8672_v45 = vpop.eup %8671  ;;  %v1763_v60 = vpop.f32.mrb[2].mxu0  ;;  %8044 = vmatprep.mubr.msk.bf16.mxu1 %vm9176_vm0, %v9175_v1  ;;  %5004 = vrot.lane.b32.xlu1 %v8377_v51, %s9177_s13 }
 0x2f5   : > { %v8674_v62 = vpop.eup %8673  ;;  %8683 = vpow2.f32 %v6887_v57  ;;  %v1764_v63 = vadd.f32 %v10161_v6, %v1763_v60  ;;  %v7703_v0 = vpop.f32.mrb[3].mxu0  ;;  %v4227_v2 = vpack.c.bf16 %v8672_v45, %v8670_v56  ;;  %v2055_v7 = vmax.f32 %v1761_v58, 0.0 }
 0x2f6   : > { %v3754_v3 = vadd.f32 1.0, %v8674_v62  ;;  %v2791_v4 = vpop.f32.mrb[148].mxu1  ;;  %v4945_v59 = vpop.permute.xlu1 %4944 }
 0x2f7   : > { %v8676_v5 = vpop.eup %8675  ;;  %v2056_v8 = vmax.f32 %v1764_v63, 0.0  ;;  %v5146_v9 = vsel %vm5044_vm4, %v4227_v2, %v4941_v61  ;;  %v2792_v10 = vadd.f32 %v10192_v54, %v2791_v4  ;;  %v7938_v11 = vpop.f32.mrb[149].mxu1 }
 0x2f8   : > { %v3755_v12 = vadd.f32 1.0, %v8676_v5  ;;  %v7135_v13 = vcombine.low %v5146_v9, %v5146_v9  ;;  %v7136_v14 = vcombine.high %v5146_v9, %v5146_v9  ;;  %v2794_v15 = vpop.f32.mrb[150].mxu1  ;;  %8685 = vrcp.f32 %v3754_v3 }
 0x2f9   : > { %v2161_v16 = vpack.c.bf16 %v2056_v8, %v2055_v7  ;;  %v6888_v17 = vmul.f32 -1.442695, %v2792_v10  ;;  %v2795_v18 = vadd.f32 %v10192_v54, %v2794_v15  ;;  %v7939_v19 = vpop.f32.mrb[151].mxu1  ;;  %v10402_v15 = vld [vmem:[%s11091_s4] ss:$0 sm:$0xff] }
 0x2fa   : > { %8687 = vrcp.f32 %v3755_v12  ;;  %5962 = vst.msk [vmem:[%s9781_s20 + $0x108] sm:$0xf] %vm5895_vm5, %v7135_v13  ;;  %5963 = vst.msk [vmem:[%s9781_s20 + $0x10c] sm:$0xf] %vm5895_vm5, %v7136_v14  ;;  %v1768_v20 = vpop.f32.mrb[4].mxu0  ;;  %v8678_v22 = vpop.eup %8677 }
 0x2fb   : > { %8689 = vpow2.f32 %v6888_v17  ;;  %v6889_v23 = vmul.f32 -1.442695, %v2795_v18  ;;  %v1769_v25 = vadd.f32 %v10161_v6, %v1768_v20  ;;  %v7706_v36 = vpop.f32.mrb[5].mxu0  ;;  %8045 = vmatmul.mubr.msk.bf16.gmra.mrb[0].mxu1 %vm2205_vm3, %v2161_v16  ;;  %v8378_v18 = vld [vmem:[%s9414_s15 + $0x210] sm:$0xff]  }
 0x2fc   : > { %v8680_v26 = vpop.eup %8679  ;;  %v1771_v27 = vpop.f32.mrb[6].mxu0  ;;  %8048 = vmatprep.mubr.msk.bf16.mxu1 %vm9176_vm0, %v9175_v1  ;;  %5006 = vrot.lane.b32.xlu0 %v8378_v18, %s9177_s13 }
 0x2fd   : > { %v8682_v30 = vpop.eup %8681  ;;  %8691 = vpow2.f32 %v6889_v23  ;;  %v1772_v6 = vadd.f32 %v10380_v31, %v1771_v27  ;;  %v7707_v32 = vpop.f32.mrb[7].mxu0  ;;  %v4228_v33 = vpack.c.bf16 %v8680_v26, %v8678_v22  ;;  %v2057_v37 = vmax.f32 %v1769_v25, 0.0 }
 0x2fe   : > { %v3756_v34 = vadd.f32 1.0, %v8682_v30  ;;  %v2799_v24 = vpop.f32.mrb[152].mxu1  ;;  %v4947_v36 = vpop.permute.xlu0 %4946 }
 0x2ff   : > { %v8684_v35 = vpop.eup %8683  ;;  %v2058_v38 = vmax.f32 %v1772_v6, 0.0  ;;  %v5149_v39 = vsel %vm5044_vm4, %v4228_v33, %v4943_v29  ;;  %v2800_v40 = vadd.f32 %v10192_v54, %v2799_v24  ;;  %v7942_v41 = vpop.f32.mrb[153].mxu1 }
 0x300   : > { %v3757_v42 = vadd.f32 1.0, %v8684_v35  ;;  %v7137_v28 = vcombine.low %v5149_v39, %v5149_v39  ;;  %v7138_v43 = vcombine.high %v5149_v39, %v5149_v39  ;;  %v2802_v44 = vpop.f32.mrb[154].mxu1  ;;  %8693 = vrcp.f32 %v3756_v34 }
 0x301   : > { %v2162_v46 = vpack.c.bf16 %v2058_v38, %v2057_v37  ;;  %v6890_v47 = vmul.f32 -1.442695, %v2800_v40  ;;  %v2803_v48 = vadd.f32 %v10192_v54, %v2802_v44  ;;  %v7943_v49 = vpop.f32.mrb[155].mxu1 }
 0x302   : > { %8695 = vrcp.f32 %v3757_v42  ;;  %5964 = vst.msk [vmem:[%s9781_s20 + $0x110] sm:$0xf] %vm5895_vm5, %v7137_v28  ;;  %5965 = vst.msk [vmem:[%s9781_s20 + $0x114] sm:$0xf] %vm5895_vm5, %v7138_v43  ;;  %v1776_v50 = vpop.f32.mrb[8].mxu0  ;;  %v8686_v52 = vpop.eup %8685 }
 0x303   : > { %8697 = vpow2.f32 %v6890_v47  ;;  %v6891_v53 = vmul.f32 -1.442695, %v2803_v48  ;;  %v1777_v55 = vadd.f32 %v10380_v31, %v1776_v50  ;;  %v7710_v56 = vpop.f32.mrb[9].mxu0  ;;  %8049 = vmatmul.mubr.msk.bf16.gmra.mrb[4].mxu1 %vm2205_vm3, %v2162_v46  ;;  %v8379_v48 = vld [vmem:[%s9414_s15 + $0x218] sm:$0xff]  }
 0x304   : > { %v8688_v57 = vpop.eup %8687  ;;  %v1779_v58 = vpop.f32.mrb[10].mxu0  ;;  %8052 = vmatprep.mubr.msk.bf16.mxu1 %vm9176_vm0, %v9175_v1  ;;  %5008 = vrot.lane.b32.xlu1 %v8379_v48, %s9177_s13 }
 0x305   : > { %v8690_v45 = vpop.eup %8689  ;;  %8699 = vpow2.f32 %v6891_v53  ;;  %v1780_v60 = vadd.f32 %v10380_v31, %v1779_v58  ;;  %v7711_v61 = vpop.f32.mrb[11].mxu0  ;;  %v4229_v62 = vpack.c.bf16 %v8688_v57, %v8686_v52  ;;  %v2059_v3 = vmax.f32 %v1777_v55, 0.0 }
 0x306   : > { %v3758_v63 = vadd.f32 1.0, %v8690_v45  ;;  %v2807_v0 = vpop.f32.mrb[156].mxu1  ;;  %v4949_v56 = vpop.permute.xlu1 %4948 }
 0x307   : > { %v8692_v2 = vpop.eup %8691  ;;  %v2060_v4 = vmax.f32 %v1780_v60, 0.0  ;;  %v5152_v5 = vsel %vm5044_vm4, %v4229_v62, %v4945_v59  ;;  %v2808_v7 = vadd.f32 %v10192_v54, %v2807_v0  ;;  %v7946_v8 = vpop.f32.mrb[157].mxu1 }
 0x308   : > { %v3759_v9 = vadd.f32 1.0, %v8692_v2  ;;  %v7139_v10 = vcombine.low %v5152_v5, %v5152_v5  ;;  %v7140_v11 = vcombine.high %v5152_v5, %v5152_v5  ;;  %v2810_v12 = vpop.f32.mrb[158].mxu1  ;;  %8701 = vrcp.f32 %v3758_v63 }
 0x309   : > { %v2163_v13 = vpack.c.bf16 %v2060_v4, %v2059_v3  ;;  %v6892_v14 = vmul.f32 -1.442695, %v2808_v7  ;;  %v2811_v16 = vadd.f32 %v10402_v15, %v2810_v12  ;;  %v7947_v17 = vpop.f32.mrb[159].mxu1 }
 0x30a   : > { %8703 = vrcp.f32 %v3759_v9  ;;  %5966 = vst.msk [vmem:[%s9781_s20 + $0x118] sm:$0xf] %vm5895_vm5, %v7139_v10  ;;  %5967 = vst.msk [vmem:[%s9781_s20 + $0x11c] sm:$0xf] %vm5895_vm5, %v7140_v11  ;;  %v1784_v54 = vpop.f32.mrb[12].mxu0  ;;  %v8694_v19 = vpop.eup %8693 }
 0x30b   : > { %8705 = vpow2.f32 %v6892_v14  ;;  %v6893_v20 = vmul.f32 -1.442695, %v2811_v16  ;;  %v1785_v21 = vadd.f32 %v10380_v31, %v1784_v54  ;;  %v7714_v22 = vpop.f32.mrb[13].mxu0  ;;  %8053 = vmatmul.mubr.msk.bf16.gmra.mrb[8].mxu1 %vm2205_vm3, %v2163_v13  ;;  %v8380_v16 = vld [vmem:[%s9414_s15 + $0x220] sm:$0xff]  }
 0x30c   : > { %v8696_v23 = vpop.eup %8695  ;;  %v1787_v25 = vpop.f32.mrb[14].mxu0  ;;  %8056 = vmatprep.mubr.msk.bf16.mxu1 %vm9176_vm0, %v9175_v1  ;;  %5010 = vrot.lane.b32.xlu0 %v8380_v16, %s9177_s13 }
 0x30d   : > { %v8698_v26 = vpop.eup %8697  ;;  %8707 = vpow2.f32 %v6893_v20  ;;  %v1788_v27 = vadd.f32 %v10380_v31, %v1787_v25  ;;  %v7715_v29 = vpop.f32.mrb[15].mxu0  ;;  %v4230_v30 = vpack.c.bf16 %v8696_v23, %v8694_v19  ;;  %v2061_v34 = vmax.f32 %v1785_v21, 0.0 }
 0x30e   : > { %v3760_v6 = vadd.f32 1.0, %v8698_v26  ;;  %v2815_v32 = vpop.f32.mrb[160].mxu1  ;;  %v4951_v22 = vpop.permute.xlu0 %4950 }
 0x30f   : > { %v8700_v33 = vpop.eup %8699  ;;  %v2062_v24 = vmax.f32 %v1788_v27, 0.0  ;;  %v5155_v35 = vsel %vm5044_vm4, %v4230_v30, %v4947_v36  ;;  %v2816_v37 = vadd.f32 %v10402_v15, %v2815_v32  ;;  %v7950_v38 = vpop.f32.mrb[161].mxu1 }
 0x310   : > { %v3761_v39 = vadd.f32 1.0, %v8700_v33  ;;  %v7141_v40 = vcombine.low %v5155_v35, %v5155_v35  ;;  %v7142_v41 = vcombine.high %v5155_v35, %v5155_v35  ;;  %v2818_v42 = vpop.f32.mrb[162].mxu1  ;;  %8709 = vrcp.f32 %v3760_v6 }
 0x311   : > { %v2164_v28 = vpack.c.bf16 %v2062_v24, %v2061_v34  ;;  %v6894_v43 = vmul.f32 -1.442695, %v2816_v37  ;;  %v2819_v44 = vadd.f32 %v10402_v15, %v2818_v42  ;;  %v7951_v46 = vpop.f32.mrb[163].mxu1 }
 0x312   : > { %8711 = vrcp.f32 %v3761_v39  ;;  %5968 = vst.msk [vmem:[%s9781_s20 + $0x120] sm:$0xf] %vm5895_vm5, %v7141_v40  ;;  %5969 = vst.msk [vmem:[%s9781_s20 + $0x124] sm:$0xf] %vm5895_vm5, %v7142_v41  ;;  %v1792_v47 = vpop.f32.mrb[16].mxu0  ;;  %v8702_v49 = vpop.eup %8701 }
 0x313   : > { %8713 = vpow2.f32 %v6894_v43  ;;  %v6895_v50 = vmul.f32 -1.442695, %v2819_v44  ;;  %v1793_v51 = vadd.f32 %v10380_v31, %v1792_v47  ;;  %v7718_v52 = vpop.f32.mrb[17].mxu0  ;;  %8057 = vmatmul.mubr.msk.bf16.gmra.mrb[12].mxu1 %vm2205_vm3, %v2164_v28  ;;  %v8381_v44 = vld [vmem:[%s9414_s15 + $0x228] sm:$0xff]  }
 0x314   : > { %v8704_v53 = vpop.eup %8703  ;;  %v1795_v55 = vpop.f32.mrb[18].mxu0  ;;  %8060 = vmatprep.mubr.msk.bf16.mxu1 %vm9176_vm0, %v9175_v1  ;;  %5012 = vrot.lane.b32.xlu1 %v8381_v44, %s9177_s13 }
 0x315   : > { %v8706_v57 = vpop.eup %8705  ;;  %8715 = vpow2.f32 %v6895_v50  ;;  %v1796_v58 = vadd.f32 %v10380_v31, %v1795_v55  ;;  %v7719_v59 = vpop.f32.mrb[19].mxu0  ;;  %v4231_v45 = vpack.c.bf16 %v8704_v53, %v8702_v49  ;;  %v2063_v63 = vmax.f32 %v1793_v51, 0.0 }
 0x316   : > { %v3762_v60 = vadd.f32 1.0, %v8706_v57  ;;  %v2823_v61 = vpop.f32.mrb[164].mxu1  ;;  %v4953_v52 = vpop.permute.xlu1 %4952 }
 0x317   : > { %v8708_v62 = vpop.eup %8707  ;;  %v2064_v0 = vmax.f32 %v1796_v58, 0.0  ;;  %v5158_v2 = vsel %vm5044_vm4, %v4231_v45, %v4949_v56  ;;  %v2824_v3 = vadd.f32 %v10402_v15, %v2823_v61  ;;  %v7954_v4 = vpop.f32.mrb[165].mxu1 }
 0x318   : > { %v3763_v5 = vadd.f32 1.0, %v8708_v62  ;;  %v7143_v7 = vcombine.low %v5158_v2, %v5158_v2  ;;  %v7144_v8 = vcombine.high %v5158_v2, %v5158_v2  ;;  %v2826_v9 = vpop.f32.mrb[166].mxu1  ;;  %8717 = vrcp.f32 %v3762_v60 }
 0x319   : > { %v2165_v10 = vpack.c.bf16 %v2064_v0, %v2063_v63  ;;  %v6896_v11 = vmul.f32 -1.442695, %v2824_v3  ;;  %v2827_v12 = vadd.f32 %v10402_v15, %v2826_v9  ;;  %v7955_v13 = vpop.f32.mrb[167].mxu1 }
 0x31a   : > { %8719 = vrcp.f32 %v3763_v5  ;;  %5970 = vst.msk [vmem:[%s9781_s20 + $0x128] sm:$0xf] %vm5895_vm5, %v7143_v7  ;;  %5971 = vst.msk [vmem:[%s9781_s20 + $0x12c] sm:$0xf] %vm5895_vm5, %v7144_v8  ;;  %v1800_v14 = vpop.f32.mrb[20].mxu0  ;;  %v8710_v17 = vpop.eup %8709 }
 0x31b   : > { %8721 = vpow2.f32 %v6896_v11  ;;  %v6897_v54 = vmul.f32 -1.442695, %v2827_v12  ;;  %v1801_v18 = vadd.f32 %v10380_v31, %v1800_v14  ;;  %v7722_v19 = vpop.f32.mrb[21].mxu0  ;;  %8061 = vmatmul.mubr.msk.bf16.gmra.mrb[16].mxu1 %vm2205_vm3, %v2165_v10  ;;  %v8382_v12 = vld [vmem:[%s9414_s15 + $0x230] sm:$0xff]  }
 0x31c   : > { %v8712_v20 = vpop.eup %8711  ;;  %v1803_v21 = vpop.f32.mrb[22].mxu0  ;;  %8064 = vmatprep.mubr.msk.bf16.mxu1 %vm9176_vm0, %v9175_v1  ;;  %5014 = vrot.lane.b32.xlu0 %v8382_v12, %s9177_s13 }
 0x31d   : > { %v8714_v23 = vpop.eup %8713  ;;  %8723 = vpow2.f32 %v6897_v54  ;;  %v1804_v25 = vadd.f32 %v10380_v31, %v1803_v21  ;;  %v7723_v36 = vpop.f32.mrb[23].mxu0  ;;  %v4232_v26 = vpack.c.bf16 %v8712_v20, %v8710_v17  ;;  %v2065_v6 = vmax.f32 %v1801_v18, 0.0 }
 0x31e   : > { %v3764_v27 = vadd.f32 1.0, %v8714_v23  ;;  %v2831_v29 = vpop.f32.mrb[168].mxu1  ;;  %v4955_v19 = vpop.permute.xlu0 %4954 }
 0x31f   : > { %v8716_v30 = vpop.eup %8715  ;;  %v2066_v32 = vmax.f32 %v1804_v25, 0.0  ;;  %v5161_v33 = vsel %vm5044_vm4, %v4232_v26, %v4951_v22  ;;  %v2832_v34 = vadd.f32 %v10402_v15, %v2831_v29  ;;  %v7958_v24 = vpop.f32.mrb[169].mxu1 }
 0x320   : > { %v3765_v35 = vadd.f32 1.0, %v8716_v30  ;;  %v7145_v37 = vcombine.low %v5161_v33, %v5161_v33  ;;  %v7146_v38 = vcombine.high %v5161_v33, %v5161_v33  ;;  %v2834_v39 = vpop.f32.mrb[170].mxu1  ;;  %8725 = vrcp.f32 %v3764_v27 }
 0x321   : > { %v2166_v40 = vpack.c.bf16 %v2066_v32, %v2065_v6  ;;  %v6898_v41 = vmul.f32 -1.442695, %v2832_v34  ;;  %v2835_v42 = vadd.f32 %v10402_v15, %v2834_v39  ;;  %v7959_v28 = vpop.f32.mrb[171].mxu1 }
 0x322   : > { %8727 = vrcp.f32 %v3765_v35  ;;  %5972 = vst.msk [vmem:[%s9781_s20 + $0x130] sm:$0xf] %vm5895_vm5, %v7145_v37  ;;  %5973 = vst.msk [vmem:[%s9781_s20 + $0x134] sm:$0xf] %vm5895_vm5, %v7146_v38  ;;  %v1808_v43 = vpop.f32.mrb[24].mxu0  ;;  %v8718_v46 = vpop.eup %8717 }
 0x323   : > { %8729 = vpow2.f32 %v6898_v41  ;;  %v6899_v47 = vmul.f32 -1.442695, %v2835_v42  ;;  %v1809_v48 = vadd.f32 %v10380_v31, %v1808_v43  ;;  %v7726_v49 = vpop.f32.mrb[25].mxu0  ;;  %8065 = vmatmul.mubr.msk.bf16.gmra.mrb[20].mxu1 %vm2205_vm3, %v2166_v40  ;;  %v8383_v42 = vld [vmem:[%s9414_s15 + $0x238] sm:$0xff]  }
 0x324   : > { %v8720_v50 = vpop.eup %8719  ;;  %v1811_v51 = vpop.f32.mrb[26].mxu0  ;;  %8068 = vmatprep.mubr.msk.bf16.mxu1 %vm9176_vm0, %v9175_v1  ;;  %5016 = vrot.lane.b32.xlu1 %v8383_v42, %s9177_s13 }
 0x325   : > { %v8722_v53 = vpop.eup %8721  ;;  %8731 = vpow2.f32 %v6899_v47  ;;  %v1812_v55 = vadd.f32 %v10380_v31, %v1811_v51  ;;  %v7727_v56 = vpop.f32.mrb[27].mxu0  ;;  %v4233_v57 = vpack.c.bf16 %v8720_v50, %v8718_v46  ;;  %v2067_v60 = vmax.f32 %v1809_v48, 0.0 }
 0x326   : > { %v3766_v58 = vadd.f32 1.0, %v8722_v53  ;;  %v2839_v59 = vpop.f32.mrb[172].mxu1  ;;  %v4957_v49 = vpop.permute.xlu1 %4956 }
 0x327   : > { %v8724_v45 = vpop.eup %8723  ;;  %v2068_v61 = vmax.f32 %v1812_v55, 0.0  ;;  %v5164_v62 = vsel %vm5044_vm4, %v4233_v57, %v4953_v52  ;;  %v2840_v63 = vadd.f32 %v10402_v15, %v2839_v59  ;;  %v7962_v0 = vpop.f32.mrb[173].mxu1 }
 0x328   : > { %v3767_v2 = vadd.f32 1.0, %v8724_v45  ;;  %v7147_v3 = vcombine.low %v5164_v62, %v5164_v62  ;;  %v7148_v4 = vcombine.high %v5164_v62, %v5164_v62  ;;  %v2842_v5 = vpop.f32.mrb[174].mxu1  ;;  %8733 = vrcp.f32 %v3766_v58 }
 0x329   : > { %v2167_v7 = vpack.c.bf16 %v2068_v61, %v2067_v60  ;;  %v6900_v8 = vmul.f32 -1.442695, %v2840_v63  ;;  %v2843_v9 = vadd.f32 %v10402_v15, %v2842_v5  ;;  %v7963_v10 = vpop.f32.mrb[175].mxu1 }
 0x32a   : > { %8735 = vrcp.f32 %v3767_v2  ;;  %5974 = vst.msk [vmem:[%s9781_s20 + $0x138] sm:$0xf] %vm5895_vm5, %v7147_v3  ;;  %5975 = vst.msk [vmem:[%s9781_s20 + $0x13c] sm:$0xf] %vm5895_vm5, %v7148_v4  ;;  %v1816_v11 = vpop.f32.mrb[28].mxu0  ;;  %v8726_v13 = vpop.eup %8725 }
 0x32b   : > { %8737 = vpow2.f32 %v6900_v8  ;;  %v6901_v14 = vmul.f32 -1.442695, %v2843_v9  ;;  %v1817_v16 = vadd.f32 %v10380_v31, %v1816_v11  ;;  %v7730_v17 = vpop.f32.mrb[29].mxu0  ;;  %8069 = vmatmul.mubr.msk.bf16.gmra.mrb[24].mxu1 %vm2205_vm3, %v2167_v7  ;;  %v8384_v9 = vld [vmem:[%s9414_s15 + $0x240] sm:$0xff]  }
 0x32c   : > { %v8728_v54 = vpop.eup %8727  ;;  %v1819_v18 = vpop.f32.mrb[30].mxu0  ;;  %8072 = vmatprep.mubr.msk.bf16.mxu1 %vm9176_vm0, %v9175_v1  ;;  %5018 = vrot.lane.b32.xlu0 %v8384_v9, %s9177_s13 }
 0x32d   : > { %v8730_v20 = vpop.eup %8729  ;;  %8739 = vpow2.f32 %v6901_v14  ;;  %v1820_v21 = vadd.f32 %v10380_v31, %v1819_v18  ;;  %v7731_v22 = vpop.f32.mrb[31].mxu0  ;;  %v4234_v23 = vpack.c.bf16 %v8728_v54, %v8726_v13  ;;  %v2069_v27 = vmax.f32 %v1817_v16, 0.0 }
 0x32e   : > { %v3768_v25 = vadd.f32 1.0, %v8730_v20  ;;  %v2847_v36 = vpop.f32.mrb[176].mxu1  ;;  %v4959_v17 = vpop.permute.xlu0 %4958 }
 0x32f   : > { %v8732_v26 = vpop.eup %8731  ;;  %v2070_v29 = vmax.f32 %v1820_v21, 0.0  ;;  %v5167_v30 = vsel %vm5044_vm4, %v4234_v23, %v4955_v19  ;;  %v2848_v6 = vadd.f32 %v10402_v15, %v2847_v36  ;;  %v7966_v32 = vpop.f32.mrb[177].mxu1 }
 0x330   : > { %v3769_v33 = vadd.f32 1.0, %v8732_v26  ;;  %v7149_v34 = vcombine.low %v5167_v30, %v5167_v30  ;;  %v7150_v24 = vcombine.high %v5167_v30, %v5167_v30  ;;  %v2850_v35 = vpop.f32.mrb[178].mxu1  ;;  %8741 = vrcp.f32 %v3768_v25 }
 0x331   : > { %v2168_v37 = vpack.c.bf16 %v2070_v29, %v2069_v27  ;;  %v6902_v38 = vmul.f32 -1.442695, %v2848_v6  ;;  %v2851_v39 = vadd.f32 %v10402_v15, %v2850_v35  ;;  %v7967_v40 = vpop.f32.mrb[179].mxu1 }
 0x332   : > { %8743 = vrcp.f32 %v3769_v33  ;;  %5976 = vst.msk [vmem:[%s9781_s20 + $0x140] sm:$0xf] %vm5895_vm5, %v7149_v34  ;;  %5977 = vst.msk [vmem:[%s9781_s20 + $0x144] sm:$0xf] %vm5895_vm5, %v7150_v24  ;;  %v1824_v41 = vpop.f32.mrb[32].mxu0  ;;  %v8734_v28 = vpop.eup %8733 }
 0x333   : > { %8745 = vpow2.f32 %v6902_v38  ;;  %v6903_v43 = vmul.f32 -1.442695, %v2851_v39  ;;  %v1825_v44 = vadd.f32 %v10380_v31, %v1824_v41  ;;  %v7734_v46 = vpop.f32.mrb[33].mxu0  ;;  %8073 = vmatmul.mubr.msk.bf16.gmra.mrb[28].mxu1 %vm2205_vm3, %v2168_v37  ;;  %v8385_v39 = vld [vmem:[%s9414_s15 + $0x248] sm:$0xff]  }
 0x334   : > { %v8736_v47 = vpop.eup %8735  ;;  %v1827_v48 = vpop.f32.mrb[34].mxu0  ;;  %8076 = vmatprep.mubr.msk.bf16.mxu1 %vm9176_vm0, %v9175_v1  ;;  %5020 = vrot.lane.b32.xlu1 %v8385_v39, %s9177_s13 }
 0x335   : > { %v8738_v50 = vpop.eup %8737  ;;  %8747 = vpow2.f32 %v6903_v43  ;;  %v1828_v51 = vadd.f32 %v10380_v31, %v1827_v48  ;;  %v7735_v52 = vpop.f32.mrb[35].mxu0  ;;  %v4235_v53 = vpack.c.bf16 %v8736_v47, %v8734_v28  ;;  %v2071_v58 = vmax.f32 %v1825_v44, 0.0 }
 0x336   : > { %v3770_v55 = vadd.f32 1.0, %v8738_v50  ;;  %v2855_v56 = vpop.f32.mrb[180].mxu1  ;;  %v4961_v46 = vpop.permute.xlu1 %4960 }
 0x337   : > { %v8740_v57 = vpop.eup %8739  ;;  %v2072_v59 = vmax.f32 %v1828_v51, 0.0  ;;  %v5170_v45 = vsel %vm5044_vm4, %v4235_v53, %v4957_v49  ;;  %v2856_v60 = vadd.f32 %v10402_v15, %v2855_v56  ;;  %v7970_v61 = vpop.f32.mrb[181].mxu1 }
 0x338   : > { %v3771_v62 = vadd.f32 1.0, %v8740_v57  ;;  %v7151_v63 = vcombine.low %v5170_v45, %v5170_v45  ;;  %v7152_v0 = vcombine.high %v5170_v45, %v5170_v45  ;;  %v2858_v2 = vpop.f32.mrb[182].mxu1  ;;  %8749 = vrcp.f32 %v3770_v55 }
 0x339   : > { %v2169_v3 = vpack.c.bf16 %v2072_v59, %v2071_v58  ;;  %v6904_v4 = vmul.f32 -1.442695, %v2856_v60  ;;  %v2859_v5 = vadd.f32 %v10402_v15, %v2858_v2  ;;  %v7971_v7 = vpop.f32.mrb[183].mxu1 }
 0x33a   : > { %8751 = vrcp.f32 %v3771_v62  ;;  %5978 = vst.msk [vmem:[%s9781_s20 + $0x148] sm:$0xf] %vm5895_vm5, %v7151_v63  ;;  %5979 = vst.msk [vmem:[%s9781_s20 + $0x14c] sm:$0xf] %vm5895_vm5, %v7152_v0  ;;  %v1832_v8 = vpop.f32.mrb[36].mxu0  ;;  %v8742_v10 = vpop.eup %8741 }
 0x33b   : > { %8753 = vpow2.f32 %v6904_v4  ;;  %v6905_v11 = vmul.f32 -1.442695, %v2859_v5  ;;  %v1833_v12 = vadd.f32 %v10380_v31, %v1832_v8  ;;  %v7738_v13 = vpop.f32.mrb[37].mxu0  ;;  %8077 = vmatmul.mubr.msk.bf16.gmra.mrb[32].mxu1 %vm2205_vm3, %v2169_v3  ;;  %v8386_v5 = vld [vmem:[%s9414_s15 + $0x250] sm:$0xff]  }
 0x33c   : > { %v8744_v14 = vpop.eup %8743  ;;  %v1835_v16 = vpop.f32.mrb[38].mxu0  ;;  %8080 = vmatprep.mubr.msk.bf16.mxu1 %vm9176_vm0, %v9175_v1  ;;  %5022 = vrot.lane.b32.xlu0 %v8386_v5, %s9177_s13 }
 0x33d   : > { %v8746_v54 = vpop.eup %8745  ;;  %8755 = vpow2.f32 %v6905_v11  ;;  %v1836_v18 = vadd.f32 %v10380_v31, %v1835_v16  ;;  %v7739_v19 = vpop.f32.mrb[39].mxu0  ;;  %v4236_v20 = vpack.c.bf16 %v8744_v14, %v8742_v10  ;;  %v2073_v25 = vmax.f32 %v1833_v12, 0.0 }
 0x33e   : > { %v3772_v21 = vadd.f32 1.0, %v8746_v54  ;;  %v2863_v22 = vpop.f32.mrb[184].mxu1  ;;  %v4963_v13 = vpop.permute.xlu0 %4962 }
 0x33f   : > { %v8748_v23 = vpop.eup %8747  ;;  %v2074_v36 = vmax.f32 %v1836_v18, 0.0  ;;  %v5173_v26 = vsel %vm5044_vm4, %v4236_v20, %v4959_v17  ;;  %v2864_v27 = vadd.f32 %v10402_v15, %v2863_v22  ;;  %v7974_v29 = vpop.f32.mrb[185].mxu1 }
 0x340   : > { %v3773_v30 = vadd.f32 1.0, %v8748_v23  ;;  %v7153_v6 = vcombine.low %v5173_v26, %v5173_v26  ;;  %v7154_v32 = vcombine.high %v5173_v26, %v5173_v26  ;;  %v2866_v33 = vpop.f32.mrb[186].mxu1  ;;  %8757 = vrcp.f32 %v3772_v21 }
 0x341   : > { %v2170_v34 = vpack.c.bf16 %v2074_v36, %v2073_v25  ;;  %v6906_v24 = vmul.f32 -1.442695, %v2864_v27  ;;  %v2867_v35 = vadd.f32 %v10402_v15, %v2866_v33  ;;  %v7975_v37 = vpop.f32.mrb[187].mxu1 }
 0x342   : > { %8759 = vrcp.f32 %v3773_v30  ;;  %5980 = vst.msk [vmem:[%s9781_s20 + $0x150] sm:$0xf] %vm5895_vm5, %v7153_v6  ;;  %5981 = vst.msk [vmem:[%s9781_s20 + $0x154] sm:$0xf] %vm5895_vm5, %v7154_v32  ;;  %v1840_v38 = vpop.f32.mrb[40].mxu0  ;;  %v8750_v40 = vpop.eup %8749 }
 0x343   : > { %8761 = vpow2.f32 %v6906_v24  ;;  %v6907_v41 = vmul.f32 -1.442695, %v2867_v35  ;;  %v1841_v42 = vadd.f32 %v10380_v31, %v1840_v38  ;;  %v7742_v28 = vpop.f32.mrb[41].mxu0  ;;  %8081 = vmatmul.mubr.msk.bf16.gmra.mrb[36].mxu1 %vm2205_vm3, %v2170_v34  ;;  %v8387_v35 = vld [vmem:[%s9414_s15 + $0x258] sm:$0xff]  }
 0x344   : > { %v8752_v43 = vpop.eup %8751  ;;  %v1843_v44 = vpop.f32.mrb[42].mxu0  ;;  %8084 = vmatprep.mubr.msk.bf16.mxu1 %vm9176_vm0, %v9175_v1  ;;  %5024 = vrot.lane.b32.xlu1 %v8387_v35, %s9177_s13 }
 0x345   : > { %v8754_v47 = vpop.eup %8753  ;;  %8763 = vpow2.f32 %v6907_v41  ;;  %v1844_v48 = vadd.f32 %v10380_v31, %v1843_v44  ;;  %v7743_v49 = vpop.f32.mrb[43].mxu0  ;;  %v4237_v50 = vpack.c.bf16 %v8752_v43, %v8750_v40  ;;  %v2075_v55 = vmax.f32 %v1841_v42, 0.0 }
 0x346   : > { %v3774_v51 = vadd.f32 1.0, %v8754_v47  ;;  %v2871_v52 = vpop.f32.mrb[188].mxu1  ;;  %v4965_v28 = vpop.permute.xlu1 %4964 }
 0x347   : > { %v8756_v53 = vpop.eup %8755  ;;  %v2076_v56 = vmax.f32 %v1844_v48, 0.0  ;;  %v5176_v57 = vsel %vm5044_vm4, %v4237_v50, %v4961_v46  ;;  %v2872_v58 = vadd.f32 %v10402_v15, %v2871_v52  ;;  %v7978_v59 = vpop.f32.mrb[189].mxu1 }
 0x348   : > { %v3775_v45 = vadd.f32 1.0, %v8756_v53  ;;  %v7155_v60 = vcombine.low %v5176_v57, %v5176_v57  ;;  %v7156_v61 = vcombine.high %v5176_v57, %v5176_v57  ;;  %v2874_v62 = vpop.f32.mrb[190].mxu1  ;;  %8765 = vrcp.f32 %v3774_v51 }
 0x349   : > { %v2171_v63 = vpack.c.bf16 %v2076_v56, %v2075_v55  ;;  %v6908_v0 = vmul.f32 -1.442695, %v2872_v58  ;;  %v2875_v2 = vadd.f32 %v10402_v15, %v2874_v62  ;;  %v7979_v3 = vpop.f32.mrb[191].mxu1 }
 0x34a   : > { %8767 = vrcp.f32 %v3775_v45  ;;  %5982 = vst.msk [vmem:[%s9781_s20 + $0x158] sm:$0xf] %vm5895_vm5, %v7155_v60  ;;  %5983 = vst.msk [vmem:[%s9781_s20 + $0x15c] sm:$0xf] %vm5895_vm5, %v7156_v61  ;;  %v1848_v4 = vpop.f32.mrb[44].mxu0  ;;  %v8758_v7 = vpop.eup %8757 }
 0x34b   : > { %8769 = vpow2.f32 %v6908_v0  ;;  %v6909_v8 = vmul.f32 -1.442695, %v2875_v2  ;;  %v1849_v9 = vadd.f32 %v10380_v31, %v1848_v4  ;;  %v7746_v10 = vpop.f32.mrb[45].mxu0  ;;  %8085 = vmatmul.mubr.msk.bf16.gmra.mrb[40].mxu1 %vm2205_vm3, %v2171_v63  ;;  %v8388_v2 = vld [vmem:[%s9414_s15 + $0x260] sm:$0xff]  }
 0x34c   : > { %v8760_v11 = vpop.eup %8759  ;;  %v1851_v12 = vpop.f32.mrb[46].mxu0  ;;  %8088 = vmatprep.mubr.msk.bf16.mxu1 %vm9176_vm0, %v9175_v1  ;;  %5026 = vrot.lane.b32.xlu0 %v8388_v2, %s9177_s13 }
 0x34d   : > { %v8762_v14 = vpop.eup %8761  ;;  %8771 = vpow2.f32 %v6909_v8  ;;  %v1852_v16 = vadd.f32 %v10380_v31, %v1851_v12  ;;  %v7747_v17 = vpop.f32.mrb[47].mxu0  ;;  %v4238_v54 = vpack.c.bf16 %v8760_v11, %v8758_v7  ;;  %v2077_v21 = vmax.f32 %v1849_v9, 0.0 }
 0x34e   : > { %v3776_v18 = vadd.f32 1.0, %v8762_v14  ;;  %v2879_v19 = vpop.f32.mrb[192].mxu1  ;;  %v4967_v10 = vpop.permute.xlu0 %4966 }
 0x34f   : > { %v8764_v20 = vpop.eup %8763  ;;  %v2078_v22 = vmax.f32 %v1852_v16, 0.0  ;;  %v5179_v23 = vsel %vm5044_vm4, %v4238_v54, %v4963_v13  ;;  %v2880_v25 = vadd.f32 %v10402_v15, %v2879_v19  ;;  %v7982_v36 = vpop.f32.mrb[193].mxu1 }
 0x350   : > { %v3777_v26 = vadd.f32 1.0, %v8764_v20  ;;  %v7157_v27 = vcombine.low %v5179_v23, %v5179_v23  ;;  %v7158_v29 = vcombine.high %v5179_v23, %v5179_v23  ;;  %v2882_v30 = vpop.f32.mrb[194].mxu1  ;;  %8773 = vrcp.f32 %v3776_v18 }
 0x351   : > { %v2172_v6 = vpack.c.bf16 %v2078_v22, %v2077_v21  ;;  %v6910_v32 = vmul.f32 -1.442695, %v2880_v25  ;;  %v2883_v33 = vadd.f32 %v10402_v15, %v2882_v30  ;;  %v7983_v34 = vpop.f32.mrb[195].mxu1 }
 0x352   : > { %8775 = vrcp.f32 %v3777_v26  ;;  %5984 = vst.msk [vmem:[%s9781_s20 + $0x160] sm:$0xf] %vm5895_vm5, %v7157_v27  ;;  %5985 = vst.msk [vmem:[%s9781_s20 + $0x164] sm:$0xf] %vm5895_vm5, %v7158_v29  ;;  %v1856_v24 = vpop.f32.mrb[48].mxu0  ;;  %v8766_v37 = vpop.eup %8765 }
 0x353   : > { %8777 = vpow2.f32 %v6910_v32  ;;  %v6911_v38 = vmul.f32 -1.442695, %v2883_v33  ;;  %v1857_v39 = vadd.f32 %v10380_v31, %v1856_v24  ;;  %v7750_v40 = vpop.f32.mrb[49].mxu0  ;;  %8089 = vmatmul.mubr.msk.bf16.gmra.mrb[44].mxu1 %vm2205_vm3, %v2172_v6  ;;  %v8389_v33 = vld [vmem:[%s9414_s15 + $0x268] sm:$0xff]  }
 0x354   : > { %v8768_v41 = vpop.eup %8767  ;;  %v1859_v42 = vpop.f32.mrb[50].mxu0  ;;  %8092 = vmatprep.mubr.msk.bf16.mxu1 %vm9176_vm0, %v9175_v1  ;;  %5028 = vrot.lane.b32.xlu1 %v8389_v33, %s9177_s13 }
 0x355   : > { %v8770_v43 = vpop.eup %8769  ;;  %8779 = vpow2.f32 %v6911_v38  ;;  %v1860_v44 = vadd.f32 %v10380_v31, %v1859_v42  ;;  %v7751_v46 = vpop.f32.mrb[51].mxu0  ;;  %v4239_v47 = vpack.c.bf16 %v8768_v41, %v8766_v37  ;;  %v2079_v51 = vmax.f32 %v1857_v39, 0.0 }
 0x356   : > { %v3778_v48 = vadd.f32 1.0, %v8770_v43  ;;  %v2887_v49 = vpop.f32.mrb[196].mxu1  ;;  %v4969_v40 = vpop.permute.xlu1 %4968 }
 0x357   : > { %v8772_v50 = vpop.eup %8771  ;;  %v2080_v52 = vmax.f32 %v1860_v44, 0.0  ;;  %v5182_v53 = vsel %vm5044_vm4, %v4239_v47, %v4965_v28  ;;  %v2888_v55 = vadd.f32 %v10402_v15, %v2887_v49  ;;  %v7986_v56 = vpop.f32.mrb[197].mxu1 }
 0x358   : > { %v3779_v57 = vadd.f32 1.0, %v8772_v50  ;;  %v7159_v58 = vcombine.low %v5182_v53, %v5182_v53  ;;  %v7160_v59 = vcombine.high %v5182_v53, %v5182_v53  ;;  %v2890_v45 = vpop.f32.mrb[198].mxu1  ;;  %8781 = vrcp.f32 %v3778_v48 }
 0x359   : > { %v2173_v60 = vpack.c.bf16 %v2080_v52, %v2079_v51  ;;  %v6912_v61 = vmul.f32 -1.442695, %v2888_v55  ;;  %v2891_v62 = vadd.f32 %v10402_v15, %v2890_v45  ;;  %v7987_v63 = vpop.f32.mrb[199].mxu1 }
 0x35a   : > { %8783 = vrcp.f32 %v3779_v57  ;;  %5986 = vst.msk [vmem:[%s9781_s20 + $0x168] sm:$0xf] %vm5895_vm5, %v7159_v58  ;;  %5987 = vst.msk [vmem:[%s9781_s20 + $0x16c] sm:$0xf] %vm5895_vm5, %v7160_v59  ;;  %v1864_v0 = vpop.f32.mrb[52].mxu0  ;;  %v8774_v3 = vpop.eup %8773 }
 0x35b   : > { %8785 = vpow2.f32 %v6912_v61  ;;  %v6913_v4 = vmul.f32 -1.442695, %v2891_v62  ;;  %v1865_v5 = vadd.f32 %v10380_v31, %v1864_v0  ;;  %v7754_v7 = vpop.f32.mrb[53].mxu0  ;;  %8093 = vmatmul.mubr.msk.bf16.gmra.mrb[48].mxu1 %vm2205_vm3, %v2173_v60  ;;  %v8390_v61 = vld [vmem:[%s9414_s15 + $0x270] sm:$0xff]   ;;  %v10581_v0 = vld [vmem:[%s11089_s2] ss:$0 sm:$0xff] }
 0x35c   : > { %v8776_v8 = vpop.eup %8775  ;;  %v1867_v9 = vpop.f32.mrb[54].mxu0  ;;  %8096 = vmatprep.mubr.msk.bf16.mxu1 %vm9176_vm0, %v9175_v1  ;;  %5030 = vrot.lane.b32.xlu0 %v8390_v61, %s9177_s13 }
 0x35d   : > { %v8778_v11 = vpop.eup %8777  ;;  %8787 = vpow2.f32 %v6913_v4  ;;  %v1868_v12 = vadd.f32 %v10380_v31, %v1867_v9  ;;  %v7755_v13 = vpop.f32.mrb[55].mxu0  ;;  %v4240_v14 = vpack.c.bf16 %v8776_v8, %v8774_v3  ;;  %v2081_v18 = vmax.f32 %v1865_v5, 0.0 }
 0x35e   : > { %v3780_v16 = vadd.f32 1.0, %v8778_v11  ;;  %v2895_v17 = vpop.f32.mrb[200].mxu1  ;;  %v4971_v7 = vpop.permute.xlu0 %4970 }
 0x35f   : > { %v8780_v54 = vpop.eup %8779  ;;  %v2082_v19 = vmax.f32 %v1868_v12, 0.0  ;;  %v5185_v20 = vsel %vm5044_vm4, %v4240_v14, %v4967_v10  ;;  %v2896_v21 = vadd.f32 %v10402_v15, %v2895_v17  ;;  %v7990_v22 = vpop.f32.mrb[201].mxu1 }
 0x360   : > { %v3781_v23 = vadd.f32 1.0, %v8780_v54  ;;  %v7161_v25 = vcombine.low %v5185_v20, %v5185_v20  ;;  %v7162_v36 = vcombine.high %v5185_v20, %v5185_v20  ;;  %v2898_v26 = vpop.f32.mrb[202].mxu1  ;;  %8789 = vrcp.f32 %v3780_v16 }
 0x361   : > { %v2174_v27 = vpack.c.bf16 %v2082_v19, %v2081_v18  ;;  %v6914_v29 = vmul.f32 -1.442695, %v2896_v21  ;;  %v2899_v30 = vadd.f32 %v10402_v15, %v2898_v26  ;;  %v7991_v6 = vpop.f32.mrb[203].mxu1 }
 0x362   : > { %8791 = vrcp.f32 %v3781_v23  ;;  %5988 = vst.msk [vmem:[%s9781_s20 + $0x170] sm:$0xf] %vm5895_vm5, %v7161_v25  ;;  %5989 = vst.msk [vmem:[%s9781_s20 + $0x174] sm:$0xf] %vm5895_vm5, %v7162_v36  ;;  %v1872_v32 = vpop.f32.mrb[56].mxu0  ;;  %v8782_v34 = vpop.eup %8781 }
 0x363   : > { %8793 = vpow2.f32 %v6914_v29  ;;  %v6915_v24 = vmul.f32 -1.442695, %v2899_v30  ;;  %v1873_v35 = vadd.f32 %v10380_v31, %v1872_v32  ;;  %v7758_v37 = vpop.f32.mrb[57].mxu0  ;;  %8097 = vmatmul.mubr.msk.bf16.gmra.mrb[52].mxu1 %vm2205_vm3, %v2174_v27  ;;  %v8391_v30 = vld [vmem:[%s9414_s15 + $0x278] sm:$0xff]  }
 0x364   : > { %v8784_v38 = vpop.eup %8783  ;;  %v1875_v39 = vpop.f32.mrb[58].mxu0  ;;  %8100 = vmatprep.mubr.msk.bf16.mxu1 %vm9176_vm0, %v9175_v1  ;;  %5032 = vrot.lane.b32.xlu1 %v8391_v30, %s9177_s13 }
 0x365   : > { %v8786_v41 = vpop.eup %8785  ;;  %8795 = vpow2.f32 %v6915_v24  ;;  %v1876_v42 = vadd.f32 %v10380_v31, %v1875_v39  ;;  %v7759_v28 = vpop.f32.mrb[59].mxu0  ;;  %v4241_v43 = vpack.c.bf16 %v8784_v38, %v8782_v34  ;;  %v2083_v48 = vmax.f32 %v1873_v35, 0.0 }
 0x366   : > { %v3782_v44 = vadd.f32 1.0, %v8786_v41  ;;  %v2903_v46 = vpop.f32.mrb[204].mxu1  ;;  %v4973_v37 = vpop.permute.xlu1 %4972 }
 0x367   : > { %v8788_v47 = vpop.eup %8787  ;;  %v2084_v49 = vmax.f32 %v1876_v42, 0.0  ;;  %v5188_v50 = vsel %vm5044_vm4, %v4241_v43, %v4969_v40  ;;  %v2904_v51 = vadd.f32 %v10402_v15, %v2903_v46  ;;  %v7994_v52 = vpop.f32.mrb[205].mxu1 }
 0x368   : > { %v3783_v53 = vadd.f32 1.0, %v8788_v47  ;;  %v7163_v55 = vcombine.low %v5188_v50, %v5188_v50  ;;  %v7164_v56 = vcombine.high %v5188_v50, %v5188_v50  ;;  %v2906_v57 = vpop.f32.mrb[206].mxu1  ;;  %8797 = vrcp.f32 %v3782_v44  ;;  %v10607_v47 = vld [vmem:[%s11091_s4] ss:$0 sm:$0xff] }
 0x369   : > { %v2175_v31 = vpack.c.bf16 %v2084_v49, %v2083_v48  ;;  %v6916_v58 = vmul.f32 -1.442695, %v2904_v51  ;;  %v2907_v59 = vadd.f32 %v10402_v15, %v2906_v57  ;;  %v7995_v45 = vpop.f32.mrb[207].mxu1 }
 0x36a   : > { %8799 = vrcp.f32 %v3783_v53  ;;  %5990 = vst.msk [vmem:[%s9781_s20 + $0x178] sm:$0xf] %vm5895_vm5, %v7163_v55  ;;  %5991 = vst.msk [vmem:[%s9781_s20 + $0x17c] sm:$0xf] %vm5895_vm5, %v7164_v56  ;;  %v1880_v60 = vpop.f32.mrb[60].mxu0  ;;  %v8790_v62 = vpop.eup %8789 }
 0x36b   : > { %8801 = vpow2.f32 %v6916_v58  ;;  %v6917_v63 = vmul.f32 -1.442695, %v2907_v59  ;;  %v1881_v2 = vadd.f32 %v10581_v0, %v1880_v60  ;;  %v7762_v3 = vpop.f32.mrb[61].mxu0  ;;  %8101 = vmatmul.mubr.msk.bf16.gmra.mrb[56].mxu1 %vm2205_vm3, %v2175_v31  ;;  %v8392_v59 = vld [vmem:[%s9414_s15 + $0x280] sm:$0xff]  }
 0x36c   : > { %v8792_v4 = vpop.eup %8791  ;;  %v1883_v5 = vpop.f32.mrb[62].mxu0  ;;  %8104 = vmatprep.mubr.msk.bf16.mxu1 %vm9176_vm0, %v9175_v1  ;;  %5034 = vrot.lane.b32.xlu0 %v8392_v59, %s9177_s13 }
 0x36d   : > { %v8794_v8 = vpop.eup %8793  ;;  %8803 = vpow2.f32 %v6917_v63  ;;  %v1884_v9 = vadd.f32 %v10581_v0, %v1883_v5  ;;  %v7763_v10 = vpop.f32.mrb[63].mxu0  ;;  %v4242_v11 = vpack.c.bf16 %v8792_v4, %v8790_v62  ;;  %v2085_v16 = vmax.f32 %v1881_v2, 0.0 }
 0x36e   : > { %v3784_v12 = vadd.f32 1.0, %v8794_v8  ;;  %v2911_v13 = vpop.f32.mrb[208].mxu1  ;;  %v4975_v3 = vpop.permute.xlu0 %4974 }
 0x36f   : > { %v8796_v14 = vpop.eup %8795  ;;  %v2086_v17 = vmax.f32 %v1884_v9, 0.0  ;;  %v5191_v54 = vsel %vm5044_vm4, %v4242_v11, %v4971_v7  ;;  %v2912_v18 = vadd.f32 %v10402_v15, %v2911_v13  ;;  %v7998_v19 = vpop.f32.mrb[209].mxu1 }
 0x370   : > { %v3785_v20 = vadd.f32 1.0, %v8796_v14  ;;  %v7165_v21 = vcombine.low %v5191_v54, %v5191_v54  ;;  %v7166_v22 = vcombine.high %v5191_v54, %v5191_v54  ;;  %v2914_v23 = vpop.f32.mrb[210].mxu1  ;;  %8805 = vrcp.f32 %v3784_v12 }
 0x371   : > { %v2176_v25 = vpack.c.bf16 %v2086_v17, %v2085_v16  ;;  %v6918_v36 = vmul.f32 -1.442695, %v2912_v18  ;;  %v2915_v26 = vadd.f32 %v10402_v15, %v2914_v23  ;;  %v7999_v27 = vpop.f32.mrb[211].mxu1 }
 0x372   : > { %8807 = vrcp.f32 %v3785_v20  ;;  %5992 = vst.msk [vmem:[%s9781_s20 + $0x180] sm:$0xf] %vm5895_vm5, %v7165_v21  ;;  %5993 = vst.msk [vmem:[%s9781_s20 + $0x184] sm:$0xf] %vm5895_vm5, %v7166_v22  ;;  %v1888_v29 = vpop.f32.mrb[64].mxu0  ;;  %v8798_v6 = vpop.eup %8797 }
 0x373   : > { %8809 = vpow2.f32 %v6918_v36  ;;  %v6919_v32 = vmul.f32 -1.442695, %v2915_v26  ;;  %v1889_v33 = vadd.f32 %v10581_v0, %v1888_v29  ;;  %v7766_v34 = vpop.f32.mrb[65].mxu0  ;;  %8105 = vmatmul.mubr.msk.bf16.gmra.mrb[60].mxu1 %vm2205_vm3, %v2176_v25  ;;  %v8393_v26 = vld [vmem:[%s9414_s15 + $0x288] sm:$0xff]  }
 0x374   : > { %v8800_v24 = vpop.eup %8799  ;;  %v1891_v35 = vpop.f32.mrb[66].mxu0  ;;  %8108 = vmatprep.mubr.msk.bf16.mxu1 %vm9176_vm0, %v9175_v1  ;;  %5036 = vrot.lane.b32.xlu1 %v8393_v26, %s9177_s13 }
 0x375   : > { %v8802_v15 = vpop.eup %8801  ;;  %8811 = vpow2.f32 %v6919_v32  ;;  %v1892_v38 = vadd.f32 %v10581_v0, %v1891_v35  ;;  %v7767_v39 = vpop.f32.mrb[67].mxu0  ;;  %v4243_v40 = vpack.c.bf16 %v8800_v24, %v8798_v6  ;;  %v2087_v43 = vmax.f32 %v1889_v33, 0.0 }
 0x376   : > { %v3786_v41 = vadd.f32 1.0, %v8802_v15  ;;  %v2919_v42 = vpop.f32.mrb[212].mxu1  ;;  %v4977_v34 = vpop.permute.xlu1 %4976 }
 0x377   : > { %v8804_v28 = vpop.eup %8803  ;;  %v2088_v44 = vmax.f32 %v1892_v38, 0.0  ;;  %v5194_v46 = vsel %vm5044_vm4, %v4243_v40, %v4973_v37  ;;  %v2920_v48 = vadd.f32 %v10607_v47, %v2919_v42  ;;  %v8002_v49 = vpop.f32.mrb[213].mxu1 }
 0x378   : > { %v3787_v50 = vadd.f32 1.0, %v8804_v28  ;;  %v7167_v51 = vcombine.low %v5194_v46, %v5194_v46  ;;  %v7168_v52 = vcombine.high %v5194_v46, %v5194_v46  ;;  %v2922_v53 = vpop.f32.mrb[214].mxu1  ;;  %8813 = vrcp.f32 %v3786_v41 }
 0x379   : > { %v2177_v55 = vpack.c.bf16 %v2088_v44, %v2087_v43  ;;  %v6920_v56 = vmul.f32 -1.442695, %v2920_v48  ;;  %v2923_v57 = vadd.f32 %v10607_v47, %v2922_v53  ;;  %v8003_v31 = vpop.f32.mrb[215].mxu1 }
 0x37a   : > { %8815 = vrcp.f32 %v3787_v50  ;;  %5994 = vst.msk [vmem:[%s9781_s20 + $0x188] sm:$0xf] %vm5895_vm5, %v7167_v51  ;;  %5995 = vst.msk [vmem:[%s9781_s20 + $0x18c] sm:$0xf] %vm5895_vm5, %v7168_v52  ;;  %v1896_v58 = vpop.f32.mrb[68].mxu0  ;;  %v8806_v45 = vpop.eup %8805 }
 0x37b   : > { %8817 = vpow2.f32 %v6920_v56  ;;  %v6921_v60 = vmul.f32 -1.442695, %v2923_v57  ;;  %v1897_v61 = vadd.f32 %v10581_v0, %v1896_v58  ;;  %v7770_v62 = vpop.f32.mrb[69].mxu0  ;;  %8109 = vmatmul.mubr.msk.bf16.gmra.mrb[64].mxu1 %vm2205_vm3, %v2177_v55  ;;  %v8394_v57 = vld [vmem:[%s9414_s15 + $0x290] sm:$0xff]  }
 0x37c   : > { %v8808_v63 = vpop.eup %8807  ;;  %v1899_v2 = vpop.f32.mrb[70].mxu0  ;;  %8112 = vmatprep.mubr.msk.bf16.mxu1 %vm9176_vm0, %v9175_v1  ;;  %5038 = vrot.lane.b32.xlu0 %v8394_v57, %s9177_s13 }
 0x37d   : > { %v8810_v4 = vpop.eup %8809  ;;  %8819 = vpow2.f32 %v6921_v60  ;;  %v1900_v5 = vadd.f32 %v10581_v0, %v1899_v2  ;;  %v7771_v7 = vpop.f32.mrb[71].mxu0  ;;  %v4244_v8 = vpack.c.bf16 %v8808_v63, %v8806_v45  ;;  %v2089_v12 = vmax.f32 %v1897_v61, 0.0 }
 0x37e   : > { %v3788_v9 = vadd.f32 1.0, %v8810_v4  ;;  %v2927_v10 = vpop.f32.mrb[216].mxu1  ;;  %v4979_v62 = vpop.permute.xlu0 %4978 }
 0x37f   : > { %v8812_v11 = vpop.eup %8811  ;;  %v2090_v13 = vmax.f32 %v1900_v5, 0.0  ;;  %v5197_v14 = vsel %vm5044_vm4, %v4244_v8, %v4975_v3  ;;  %v2928_v16 = vadd.f32 %v10607_v47, %v2927_v10  ;;  %v8006_v17 = vpop.f32.mrb[217].mxu1 }
 0x380   : > { %v3789_v54 = vadd.f32 1.0, %v8812_v11  ;;  %v7169_v18 = vcombine.low %v5197_v14, %v5197_v14  ;;  %v7170_v19 = vcombine.high %v5197_v14, %v5197_v14  ;;  %v2930_v20 = vpop.f32.mrb[218].mxu1  ;;  %8821 = vrcp.f32 %v3788_v9 }
 0x381   : > { %v2178_v21 = vpack.c.bf16 %v2090_v13, %v2089_v12  ;;  %v6922_v22 = vmul.f32 -1.442695, %v2928_v16  ;;  %v2931_v23 = vadd.f32 %v10607_v47, %v2930_v20  ;;  %v8007_v25 = vpop.f32.mrb[219].mxu1 }
 0x382   : > { %8823 = vrcp.f32 %v3789_v54  ;;  %5996 = vst.msk [vmem:[%s9781_s20 + $0x190] sm:$0xf] %vm5895_vm5, %v7169_v18  ;;  %5997 = vst.msk [vmem:[%s9781_s20 + $0x194] sm:$0xf] %vm5895_vm5, %v7170_v19  ;;  %v1904_v36 = vpop.f32.mrb[72].mxu0  ;;  %v8814_v27 = vpop.eup %8813 }
 0x383   : > { %8825 = vpow2.f32 %v6922_v22  ;;  %v6923_v29 = vmul.f32 -1.442695, %v2931_v23  ;;  %v1905_v30 = vadd.f32 %v10581_v0, %v1904_v36  ;;  %v7774_v6 = vpop.f32.mrb[73].mxu0  ;;  %8113 = vmatmul.mubr.msk.bf16.gmra.mrb[68].mxu1 %vm2205_vm3, %v2178_v21  ;;  %v8395_v23 = vld [vmem:[%s9414_s15 + $0x298] sm:$0xff]  }
 0x384   : > { %v8816_v32 = vpop.eup %8815  ;;  %v1907_v33 = vpop.f32.mrb[74].mxu0  ;;  %8116 = vmatprep.mubr.msk.bf16.mxu1 %vm9176_vm0, %v9175_v1  ;;  %5040 = vrot.lane.b32.xlu1 %v8395_v23, %s9177_s13 }
 0x385   : > { %v8818_v24 = vpop.eup %8817  ;;  %8827 = vpow2.f32 %v6923_v29  ;;  %v1908_v35 = vadd.f32 %v10581_v0, %v1907_v33  ;;  %v7775_v37 = vpop.f32.mrb[75].mxu0  ;;  %v4245_v15 = vpack.c.bf16 %v8816_v32, %v8814_v27  ;;  %v2091_v41 = vmax.f32 %v1905_v30, 0.0 }
 0x386   : > { %v3790_v38 = vadd.f32 1.0, %v8818_v24  ;;  %v2935_v39 = vpop.f32.mrb[220].mxu1  ;;  %v4981_v6 = vpop.permute.xlu1 %4980 }
 0x387   : > { %v8820_v40 = vpop.eup %8819  ;;  %v2092_v42 = vmax.f32 %v1908_v35, 0.0  ;;  %v5200_v28 = vsel %vm5044_vm4, %v4245_v15, %v4977_v34  ;;  %v2936_v43 = vadd.f32 %v10607_v47, %v2935_v39  ;;  %v8010_v44 = vpop.f32.mrb[221].mxu1 }
 0x388   : > { %v3791_v46 = vadd.f32 1.0, %v8820_v40  ;;  %v7171_v48 = vcombine.low %v5200_v28, %v5200_v28  ;;  %v7172_v49 = vcombine.high %v5200_v28, %v5200_v28  ;;  %v2938_v50 = vpop.f32.mrb[222].mxu1  ;;  %8829 = vrcp.f32 %v3790_v38 }
 0x389   : > { %v2179_v51 = vpack.c.bf16 %v2092_v42, %v2091_v41  ;;  %v6924_v52 = vmul.f32 -1.442695, %v2936_v43  ;;  %v2939_v53 = vadd.f32 %v10607_v47, %v2938_v50  ;;  %v8011_v55 = vpop.f32.mrb[223].mxu1  ;;  %v8396_v50 = vld [vmem:[%s9414_s15 + $0x2a0] sm:$0xff]  }
 0x38a   : > { %8831 = vrcp.f32 %v3791_v46  ;;  %5998 = vst.msk [vmem:[%s9781_s20 + $0x198] sm:$0xf] %vm5895_vm5, %v7171_v48  ;;  %5999 = vst.msk [vmem:[%s9781_s20 + $0x19c] sm:$0xf] %vm5895_vm5, %v7172_v49  ;;  %v1912_v56 = vpop.f32.mrb[76].mxu0  ;;  %v8822_v31 = vpop.eup %8821  ;;  %5042 = vrot.lane.b32.xlu0 %v8396_v50, %s9177_s13 }
 0x38b   : > { %8833 = vpow2.f32 %v6924_v52  ;;  %v6925_v58 = vmul.f32 -1.442695, %v2939_v53  ;;  %v1913_v59 = vadd.f32 %v10581_v0, %v1912_v56  ;;  %v7778_v45 = vpop.f32.mrb[77].mxu0  ;;  %8117 = vmatmul.mubr.msk.bf16.gmra.mrb[72].mxu1 %vm2205_vm3, %v2179_v51  ;;  %v4983_v55 = vpop.permute.xlu0 %4982 }
 0x38c   : > { %v8824_v60 = vpop.eup %8823  ;;  %v1915_v61 = vpop.f32.mrb[78].mxu0  ;;  %8120 = vmatprep.mubr.msk.bf16.mxu1 %vm9176_vm0, %v9175_v1 }
 0x38d   : > { %v8826_v63 = vpop.eup %8825  ;;  %8835 = vpow2.f32 %v6925_v58  ;;  %v1916_v2 = vadd.f32 %v10581_v0, %v1915_v61  ;;  %v7779_v3 = vpop.f32.mrb[79].mxu0  ;;  %v4246_v4 = vpack.c.bf16 %v8824_v60, %v8822_v31  ;;  %v2093_v9 = vmax.f32 %v1913_v59, 0.0 }
 0x38e   : > { %v3792_v5 = vadd.f32 1.0, %v8826_v63  ;;  %v2943_v7 = vpop.f32.mrb[224].mxu1 }
 0x38f   : > { %v8828_v8 = vpop.eup %8827  ;;  %v2094_v10 = vmax.f32 %v1916_v2, 0.0  ;;  %v5203_v11 = vsel %vm5044_vm4, %v4246_v4, %v4979_v62  ;;  %v2944_v12 = vadd.f32 %v10607_v47, %v2943_v7  ;;  %v8014_v13 = vpop.f32.mrb[225].mxu1 }
 0x390   : > { %v3793_v14 = vadd.f32 1.0, %v8828_v8  ;;  %v7173_v16 = vcombine.low %v5203_v11, %v5203_v11  ;;  %v7174_v17 = vcombine.high %v5203_v11, %v5203_v11  ;;  %v2946_v54 = vpop.f32.mrb[226].mxu1  ;;  %8837 = vrcp.f32 %v3792_v5  ;;  %v4985_v11 = vpop.permute.xlu1 %4984 }
 0x391   : > { %v2180_v18 = vpack.c.bf16 %v2094_v10, %v2093_v9  ;;  %v6926_v19 = vmul.f32 -1.442695, %v2944_v12  ;;  %v2947_v20 = vadd.f32 %v10607_v47, %v2946_v54  ;;  %v8015_v21 = vpop.f32.mrb[227].mxu1 }
 0x392   : > { %8839 = vrcp.f32 %v3793_v14  ;;  %6000 = vst.msk [vmem:[%s9781_s20 + $0x1a0] sm:$0xf] %vm5895_vm5, %v7173_v16  ;;  %6001 = vst.msk [vmem:[%s9781_s20 + $0x1a4] sm:$0xf] %vm5895_vm5, %v7174_v17  ;;  %v1920_v22 = vpop.f32.mrb[80].mxu0  ;;  %v8830_v25 = vpop.eup %8829 }
 0x393   : > { %8841 = vpow2.f32 %v6926_v19  ;;  %v6927_v36 = vmul.f32 -1.442695, %v2947_v20  ;;  %v1921_v26 = vadd.f32 %v10581_v0, %v1920_v22  ;;  %v7782_v27 = vpop.f32.mrb[81].mxu0  ;;  %8121 = vmatmul.mubr.msk.bf16.gmra.mrb[76].mxu1 %vm2205_vm3, %v2180_v18 }
 0x394   : > { %v8832_v29 = vpop.eup %8831  ;;  %v1923_v30 = vpop.f32.mrb[82].mxu0  ;;  %8124 = vmatprep.mubr.msk.bf16.mxu1 %vm9176_vm0, %v9175_v1 }
 0x395   : > { %v8834_v32 = vpop.eup %8833  ;;  %8843 = vpow2.f32 %v6927_v36  ;;  %v1924_v33 = vadd.f32 %v10581_v0, %v1923_v30  ;;  %v7783_v34 = vpop.f32.mrb[83].mxu0  ;;  %v4247_v24 = vpack.c.bf16 %v8832_v29, %v8830_v25  ;;  %v2095_v38 = vmax.f32 %v1921_v26, 0.0 }
 0x396   : > { %v3794_v35 = vadd.f32 1.0, %v8834_v32  ;;  %v2951_v37 = vpop.f32.mrb[228].mxu1 }
 0x397   : > { %v8836_v15 = vpop.eup %8835  ;;  %v2096_v39 = vmax.f32 %v1924_v33, 0.0  ;;  %v5206_v40 = vsel %vm5044_vm4, %v4247_v24, %v4981_v6  ;;  %v2952_v1 = vadd.f32 %v10607_v47, %v2951_v37  ;;  %v8018_v41 = vpop.f32.mrb[229].mxu1 }
 0x398   : > { %v3795_v42 = vadd.f32 1.0, %v8836_v15  ;;  %v7175_v28 = vcombine.low %v5206_v40, %v5206_v40  ;;  %v7176_v43 = vcombine.high %v5206_v40, %v5206_v40  ;;  %v2954_v44 = vpop.f32.mrb[230].mxu1  ;;  %8845 = vrcp.f32 %v3794_v35  ;;  %v4987_v6 = vpop.permute.xlu0 %4986 }
 0x399   : > { %v2181_v0 = vpack.c.bf16 %v2096_v39, %v2095_v38  ;;  %v6928_v46 = vmul.f32 -1.442695, %v2952_v1  ;;  %v2955_v48 = vadd.f32 %v10607_v47, %v2954_v44  ;;  %v8019_v49 = vpop.f32.mrb[231].mxu1 }
 0x39a   : > { %8847 = vrcp.f32 %v3795_v42  ;;  %6002 = vst.msk [vmem:[%s9781_s20 + $0x1a8] sm:$0xf] %vm5895_vm5, %v7175_v28  ;;  %6003 = vst.msk [vmem:[%s9781_s20 + $0x1ac] sm:$0xf] %vm5895_vm5, %v7176_v43  ;;  %v8838_v51 = vpop.eup %8837 }
 0x39b   : > { %8849 = vpow2.f32 %v6928_v46  ;;  %v6929_v52 = vmul.f32 -1.442695, %v2955_v48  ;;  %8125 = vmatmul.mubr.msk.bf16.gmra.mrb[80].mxu1 %vm2205_vm3, %v2181_v0  ;;  %v4989_v48 = vpop.permute.xlu1 %4988 }
 0x39c   : > { %v8840_v53 = vpop.eup %8839 }
 0x39d   : > { %v8842_v56 = vpop.eup %8841  ;;  %8851 = vpow2.f32 %v6929_v52  ;;  %v4248_v57 = vpack.c.bf16 %v8840_v53, %v8838_v51 }
 0x39e   : > { %v3796_v31 = vadd.f32 1.0, %v8842_v56  ;;  %v2959_v58 = vpop.f32.mrb[232].mxu1 }
 0x39f   : > { %v8844_v59 = vpop.eup %8843  ;;  %v5209_v45 = vsel %vm5044_vm4, %v4248_v57, %v4983_v55  ;;  %v2960_v60 = vadd.f32 %v10607_v47, %v2959_v58  ;;  %v8022_v61 = vpop.f32.mrb[233].mxu1 }
 0x3a0   : > { %v3797_v62 = vadd.f32 1.0, %v8844_v59  ;;  %v7177_v63 = vcombine.low %v5209_v45, %v5209_v45  ;;  %v7178_v2 = vcombine.high %v5209_v45, %v5209_v45  ;;  %v2962_v3 = vpop.f32.mrb[234].mxu1  ;;  %8853 = vrcp.f32 %v3796_v31 }
 0x3a1   : > { %v6930_v4 = vmul.f32 -1.442695, %v2960_v60  ;;  %v2963_v5 = vadd.f32 %v10607_v47, %v2962_v3  ;;  %v8023_v7 = vpop.f32.mrb[235].mxu1 }
 0x3a2   : > { %8855 = vrcp.f32 %v3797_v62  ;;  %6004 = vst.msk [vmem:[%s9781_s20 + $0x1b0] sm:$0xf] %vm5895_vm5, %v7177_v63  ;;  %6005 = vst.msk [vmem:[%s9781_s20 + $0x1b4] sm:$0xf] %vm5895_vm5, %v7178_v2  ;;  %v8846_v8 = vpop.eup %8845 }
 0x3a3   : > { %8857 = vpow2.f32 %v6930_v4  ;;  %v6931_v9 = vmul.f32 -1.442695, %v2963_v5  ;;  %v4991_v4 = vpop.permute.xlu0 %4990 }
 0x3a4   : > { %v8848_v10 = vpop.eup %8847 }
 0x3a5   : > { %v8850_v12 = vpop.eup %8849  ;;  %8859 = vpow2.f32 %v6931_v9  ;;  %v4249_v13 = vpack.c.bf16 %v8848_v10, %v8846_v8 }
 0x3a6   : > { %v3798_v14 = vadd.f32 1.0, %v8850_v12  ;;  %v2967_v16 = vpop.f32.mrb[236].mxu1 }
 0x3a7   : > { %v8852_v17 = vpop.eup %8851  ;;  %v5212_v54 = vsel %vm5044_vm4, %v4249_v13, %v4985_v11  ;;  %v2968_v18 = vadd.f32 %v10607_v47, %v2967_v16  ;;  %v8026_v19 = vpop.f32.mrb[237].mxu1 }
 0x3a8   : > { %v3799_v20 = vadd.f32 1.0, %v8852_v17  ;;  %v7179_v21 = vcombine.low %v5212_v54, %v5212_v54  ;;  %v7180_v22 = vcombine.high %v5212_v54, %v5212_v54  ;;  %v2970_v23 = vpop.f32.mrb[238].mxu1  ;;  %8861 = vrcp.f32 %v3798_v14 }
 0x3a9   : > { %v6932_v25 = vmul.f32 -1.442695, %v2968_v18  ;;  %v2971_v36 = vadd.f32 %v10607_v47, %v2970_v23  ;;  %v8027_v26 = vpop.f32.mrb[239].mxu1 }
 0x3aa   : > { %8863 = vrcp.f32 %v3799_v20  ;;  %6006 = vst.msk [vmem:[%s9781_s20 + $0x1b8] sm:$0xf] %vm5895_vm5, %v7179_v21  ;;  %6007 = vst.msk [vmem:[%s9781_s20 + $0x1bc] sm:$0xf] %vm5895_vm5, %v7180_v22  ;;  %v8854_v27 = vpop.eup %8853 }
 0x3ab   : > { %8865 = vpow2.f32 %v6932_v25  ;;  %v6933_v29 = vmul.f32 -1.442695, %v2971_v36  ;;  %v4993_v25 = vpop.permute.xlu1 %4992 }
 0x3ac   : > { %v8856_v30 = vpop.eup %8855 }
 0x3ad   : > { %v8858_v32 = vpop.eup %8857  ;;  %8867 = vpow2.f32 %v6933_v29  ;;  %v4250_v33 = vpack.c.bf16 %v8856_v30, %v8854_v27 }
 0x3ae   : > { %v3800_v34 = vadd.f32 1.0, %v8858_v32  ;;  %v2975_v24 = vpop.f32.mrb[240].mxu1 }
 0x3af   : > { %v8860_v35 = vpop.eup %8859  ;;  %v5215_v37 = vsel %vm5044_vm4, %v4250_v33, %v4987_v6  ;;  %v2976_v15 = vadd.f32 %v10607_v47, %v2975_v24  ;;  %v8030_v38 = vpop.f32.mrb[241].mxu1 }
 0x3b0   : > { %v3801_v39 = vadd.f32 1.0, %v8860_v35  ;;  %v7181_v40 = vcombine.low %v5215_v37, %v5215_v37  ;;  %v7182_v1 = vcombine.high %v5215_v37, %v5215_v37  ;;  %v2978_v41 = vpop.f32.mrb[242].mxu1  ;;  %8869 = vrcp.f32 %v3800_v34 }
 0x3b1   : > { %v6934_v42 = vmul.f32 -1.442695, %v2976_v15  ;;  %v2979_v28 = vadd.f32 %v10607_v47, %v2978_v41  ;;  %v8031_v43 = vpop.f32.mrb[243].mxu1 }
 0x3b2   : > { %8871 = vrcp.f32 %v3801_v39  ;;  %6008 = vst.msk [vmem:[%s9781_s20 + $0x1c0] sm:$0xf] %vm5895_vm5, %v7181_v40  ;;  %6009 = vst.msk [vmem:[%s9781_s20 + $0x1c4] sm:$0xf] %vm5895_vm5, %v7182_v1  ;;  %v8862_v44 = vpop.eup %8861 }
 0x3b3   : > { %8873 = vpow2.f32 %v6934_v42  ;;  %v6935_v0 = vmul.f32 -1.442695, %v2979_v28  ;;  %v4995_v42 = vpop.permute.xlu0 %4994 }
 0x3b4   : > { %v8864_v46 = vpop.eup %8863 }
 0x3b5   : > { %v8866_v49 = vpop.eup %8865  ;;  %8875 = vpow2.f32 %v6935_v0  ;;  %v4251_v50 = vpack.c.bf16 %v8864_v46, %v8862_v44 }
 0x3b6   : > { %v3802_v51 = vadd.f32 1.0, %v8866_v49  ;;  %v2983_v52 = vpop.f32.mrb[244].mxu1 }
 0x3b7   : > { %v8868_v53 = vpop.eup %8867  ;;  %v5218_v55 = vsel %vm5044_vm4, %v4251_v50, %v4989_v48  ;;  %v2984_v56 = vadd.f32 %v10607_v47, %v2983_v52  ;;  %v8034_v57 = vpop.f32.mrb[245].mxu1 }
 0x3b8   : > { %v3803_v31 = vadd.f32 1.0, %v8868_v53  ;;  %v7183_v58 = vcombine.low %v5218_v55, %v5218_v55  ;;  %v7184_v59 = vcombine.high %v5218_v55, %v5218_v55  ;;  %v2986_v45 = vpop.f32.mrb[246].mxu1  ;;  %8877 = vrcp.f32 %v3802_v51 }
 0x3b9   : > { %v6936_v60 = vmul.f32 -1.442695, %v2984_v56  ;;  %v2987_v61 = vadd.f32 %v10607_v47, %v2986_v45  ;;  %v8035_v62 = vpop.f32.mrb[247].mxu1 }
 0x3ba   : > { %8879 = vrcp.f32 %v3803_v31  ;;  %6010 = vst.msk [vmem:[%s9781_s20 + $0x1c8] sm:$0xf] %vm5895_vm5, %v7183_v58  ;;  %6011 = vst.msk [vmem:[%s9781_s20 + $0x1cc] sm:$0xf] %vm5895_vm5, %v7184_v59  ;;  %v8870_v63 = vpop.eup %8869 }
 0x3bb   : > { %8881 = vpow2.f32 %v6936_v60  ;;  %v6937_v2 = vmul.f32 -1.442695, %v2987_v61  ;;  %v4997_v60 = vpop.permute.xlu1 %4996 }
 0x3bc   : > { %v8872_v3 = vpop.eup %8871 }
 0x3bd   : > { %v8874_v5 = vpop.eup %8873  ;;  %8883 = vpow2.f32 %v6937_v2  ;;  %v4252_v7 = vpack.c.bf16 %v8872_v3, %v8870_v63 }
 0x3be   : > { %v3804_v8 = vadd.f32 1.0, %v8874_v5  ;;  %v2991_v9 = vpop.f32.mrb[248].mxu1 }
 0x3bf   : > { %v8876_v10 = vpop.eup %8875  ;;  %v5221_v11 = vsel %vm5044_vm4, %v4252_v7, %v4991_v4  ;;  %v2992_v12 = vadd.f32 %v10607_v47, %v2991_v9  ;;  %v8038_v13 = vpop.f32.mrb[249].mxu1 }
 0x3c0   : > { %v3805_v14 = vadd.f32 1.0, %v8876_v10  ;;  %v7185_v16 = vcombine.low %v5221_v11, %v5221_v11  ;;  %v7186_v17 = vcombine.high %v5221_v11, %v5221_v11  ;;  %v2994_v54 = vpop.f32.mrb[250].mxu1  ;;  %8885 = vrcp.f32 %v3804_v8 }
 0x3c1   : > { %v6938_v18 = vmul.f32 -1.442695, %v2992_v12  ;;  %v2995_v19 = vadd.f32 %v10607_v47, %v2994_v54  ;;  %v8039_v20 = vpop.f32.mrb[251].mxu1 }
 0x3c2   : > { %8887 = vrcp.f32 %v3805_v14  ;;  %6012 = vst.msk [vmem:[%s9781_s20 + $0x1d0] sm:$0xf] %vm5895_vm5, %v7185_v16  ;;  %6013 = vst.msk [vmem:[%s9781_s20 + $0x1d4] sm:$0xf] %vm5895_vm5, %v7186_v17  ;;  %v8878_v21 = vpop.eup %8877 }
 0x3c3   : > { %8889 = vpow2.f32 %v6938_v18  ;;  %v6939_v22 = vmul.f32 -1.442695, %v2995_v19  ;;  %v4999_v18 = vpop.permute.xlu0 %4998 }
 0x3c4   : > { %v8880_v23 = vpop.eup %8879 }
 0x3c5   : > { %v8882_v36 = vpop.eup %8881  ;;  %8891 = vpow2.f32 %v6939_v22  ;;  %v4253_v26 = vpack.c.bf16 %v8880_v23, %v8878_v21 }
 0x3c6   : > { %v3806_v27 = vadd.f32 1.0, %v8882_v36  ;;  %v2999_v29 = vpop.f32.mrb[252].mxu1 }
 0x3c7   : > { %v8884_v30 = vpop.eup %8883  ;;  %v5224_v6 = vsel %vm5044_vm4, %v4253_v26, %v4993_v25  ;;  %v3000_v32 = vadd.f32 %v10607_v47, %v2999_v29  ;;  %v8042_v33 = vpop.f32.mrb[253].mxu1 }
 0x3c8   : > { %v3807_v34 = vadd.f32 1.0, %v8884_v30  ;;  %v7187_v24 = vcombine.low %v5224_v6, %v5224_v6  ;;  %v7188_v35 = vcombine.high %v5224_v6, %v5224_v6  ;;  %v3002_v37 = vpop.f32.mrb[254].mxu1  ;;  %8893 = vrcp.f32 %v3806_v27 }
 0x3c9   : > { %v6940_v15 = vmul.f32 -1.442695, %v3000_v32  ;;  %v3003_v38 = vadd.f32 %v10607_v47, %v3002_v37  ;;  %v8043_v39 = vpop.f32.mrb[255].mxu1 }
 0x3ca   : > { %8895 = vrcp.f32 %v3807_v34  ;;  %6014 = vst.msk [vmem:[%s9781_s20 + $0x1d8] sm:$0xf] %vm5895_vm5, %v7187_v24  ;;  %6015 = vst.msk [vmem:[%s9781_s20 + $0x1dc] sm:$0xf] %vm5895_vm5, %v7188_v35  ;;  %v8886_v40 = vpop.eup %8885 }
 0x3cb   : > { %8897 = vpow2.f32 %v6940_v15  ;;  %v6941_v1 = vmul.f32 -1.442695, %v3003_v38  ;;  %v5001_v15 = vpop.permute.xlu1 %5000 }
 0x3cc   : > { %v8888_v41 = vpop.eup %8887 }
 0x3cd   : > { %v8890_v28 = vpop.eup %8889  ;;  %8899 = vpow2.f32 %v6941_v1  ;;  %v4254_v43 = vpack.c.bf16 %v8888_v41, %v8886_v40 }
 0x3ce   : > { %v3808_v44 = vadd.f32 1.0, %v8890_v28  ;;  %v3007_v0 = vpop.f32.mrb[0].mxu1 }
 0x3cf   : > { %v8892_v46 = vpop.eup %8891  ;;  %v5227_v48 = vsel %vm5044_vm4, %v4254_v43, %v4995_v42  ;;  %v3008_v49 = vadd.f32 %v10607_v47, %v3007_v0  ;;  %v8046_v50 = vpop.f32.mrb[1].mxu1 }
 0x3d0   : > { %v3809_v51 = vadd.f32 1.0, %v8892_v46  ;;  %v7189_v52 = vcombine.low %v5227_v48, %v5227_v48  ;;  %v7190_v53 = vcombine.high %v5227_v48, %v5227_v48  ;;  %v3010_v55 = vpop.f32.mrb[2].mxu1  ;;  %8901 = vrcp.f32 %v3808_v44 }
 0x3d1   : > { %v6942_v56 = vmul.f32 -1.442695, %v3008_v49  ;;  %v3011_v57 = vadd.f32 %v10607_v47, %v3010_v55  ;;  %v8047_v31 = vpop.f32.mrb[3].mxu1 }
 0x3d2   : > { %8903 = vrcp.f32 %v3809_v51  ;;  %6016 = vst.msk [vmem:[%s9781_s20 + $0x1e0] sm:$0xf] %vm5895_vm5, %v7189_v52  ;;  %6017 = vst.msk [vmem:[%s9781_s20 + $0x1e4] sm:$0xf] %vm5895_vm5, %v7190_v53  ;;  %v8894_v58 = vpop.eup %8893 }
 0x3d3   : > { %8905 = vpow2.f32 %v6942_v56  ;;  %v6943_v59 = vmul.f32 -1.442695, %v3011_v57  ;;  %v5003_v56 = vpop.permute.xlu0 %5002 }
 0x3d4   : > { %v8896_v45 = vpop.eup %8895 }
 0x3d5   : > { %v8898_v61 = vpop.eup %8897  ;;  %8907 = vpow2.f32 %v6943_v59  ;;  %v4255_v62 = vpack.c.bf16 %v8896_v45, %v8894_v58 }
 0x3d6   : > { %v3810_v63 = vadd.f32 1.0, %v8898_v61  ;;  %v3015_v2 = vpop.f32.mrb[4].mxu1 }
 0x3d7   : > { %v8900_v3 = vpop.eup %8899  ;;  %v5230_v4 = vsel %vm5044_vm4, %v4255_v62, %v4997_v60  ;;  %v3016_v5 = vadd.f32 %v10607_v47, %v3015_v2  ;;  %v8050_v7 = vpop.f32.mrb[5].mxu1 }
 0x3d8   : > { %v3811_v8 = vadd.f32 1.0, %v8900_v3  ;;  %v7191_v9 = vcombine.low %v5230_v4, %v5230_v4  ;;  %v7192_v10 = vcombine.high %v5230_v4, %v5230_v4  ;;  %v3018_v11 = vpop.f32.mrb[6].mxu1  ;;  %8909 = vrcp.f32 %v3810_v63 }
 0x3d9   : > { %v6944_v12 = vmul.f32 -1.442695, %v3016_v5  ;;  %v3019_v13 = vadd.f32 %v10607_v47, %v3018_v11  ;;  %v8051_v14 = vpop.f32.mrb[7].mxu1 }
 0x3da   : > { %8911 = vrcp.f32 %v3811_v8  ;;  %6018 = vst.msk [vmem:[%s9781_s20 + $0x1e8] sm:$0xf] %vm5895_vm5, %v7191_v9  ;;  %6019 = vst.msk [vmem:[%s9781_s20 + $0x1ec] sm:$0xf] %vm5895_vm5, %v7192_v10  ;;  %v8902_v16 = vpop.eup %8901 }
 0x3db   : > { %8913 = vpow2.f32 %v6944_v12  ;;  %v6945_v17 = vmul.f32 -1.442695, %v3019_v13  ;;  %v5005_v12 = vpop.permute.xlu1 %5004 }
 0x3dc   : > { %v8904_v54 = vpop.eup %8903 }
 0x3dd   : > { %v8906_v19 = vpop.eup %8905  ;;  %8915 = vpow2.f32 %v6945_v17  ;;  %v4256_v20 = vpack.c.bf16 %v8904_v54, %v8902_v16 }
 0x3de   : > { %v3812_v21 = vadd.f32 1.0, %v8906_v19  ;;  %v3023_v22 = vpop.f32.mrb[8].mxu1 }
 0x3df   : > { %v8908_v23 = vpop.eup %8907  ;;  %v5233_v25 = vsel %vm5044_vm4, %v4256_v20, %v4999_v18  ;;  %v3024_v36 = vadd.f32 %v10607_v47, %v3023_v22  ;;  %v8054_v26 = vpop.f32.mrb[9].mxu1 }
 0x3e0   : > { %v3813_v27 = vadd.f32 1.0, %v8908_v23  ;;  %v7193_v29 = vcombine.low %v5233_v25, %v5233_v25  ;;  %v7194_v30 = vcombine.high %v5233_v25, %v5233_v25  ;;  %v3026_v6 = vpop.f32.mrb[10].mxu1  ;;  %8917 = vrcp.f32 %v3812_v21 }
 0x3e1   : > { %v6946_v32 = vmul.f32 -1.442695, %v3024_v36  ;;  %v3027_v33 = vadd.f32 %v10607_v47, %v3026_v6  ;;  %v8055_v34 = vpop.f32.mrb[11].mxu1 }
 0x3e2   : > { %8919 = vrcp.f32 %v3813_v27  ;;  %6020 = vst.msk [vmem:[%s9781_s20 + $0x1f0] sm:$0xf] %vm5895_vm5, %v7193_v29  ;;  %6021 = vst.msk [vmem:[%s9781_s20 + $0x1f4] sm:$0xf] %vm5895_vm5, %v7194_v30  ;;  %v8910_v24 = vpop.eup %8909 }
 0x3e3   : > { %8921 = vpow2.f32 %v6946_v32  ;;  %v6947_v35 = vmul.f32 -1.442695, %v3027_v33  ;;  %v5007_v32 = vpop.permute.xlu0 %5006 }
 0x3e4   : > { %v8912_v37 = vpop.eup %8911 }
 0x3e5   : > { %v8914_v38 = vpop.eup %8913  ;;  %8923 = vpow2.f32 %v6947_v35  ;;  %v4257_v39 = vpack.c.bf16 %v8912_v37, %v8910_v24 }
 0x3e6   : > { %v3814_v40 = vadd.f32 1.0, %v8914_v38  ;;  %v3031_v1 = vpop.f32.mrb[12].mxu1 }
 0x3e7   : > { %v8916_v41 = vpop.eup %8915  ;;  %v5236_v42 = vsel %vm5044_vm4, %v4257_v39, %v5001_v15  ;;  %v3032_v28 = vadd.f32 %v10607_v47, %v3031_v1  ;;  %v8058_v43 = vpop.f32.mrb[13].mxu1 }
 0x3e8   : > { %v3815_v44 = vadd.f32 1.0, %v8916_v41  ;;  %v7195_v0 = vcombine.low %v5236_v42, %v5236_v42  ;;  %v7196_v46 = vcombine.high %v5236_v42, %v5236_v42  ;;  %v3034_v48 = vpop.f32.mrb[14].mxu1  ;;  %8925 = vrcp.f32 %v3814_v40 }
 0x3e9   : > { %v6948_v49 = vmul.f32 -1.442695, %v3032_v28  ;;  %v3035_v50 = vadd.f32 %v10607_v47, %v3034_v48  ;;  %v8059_v51 = vpop.f32.mrb[15].mxu1 }
 0x3ea   : > { %8927 = vrcp.f32 %v3815_v44  ;;  %6022 = vst.msk [vmem:[%s9781_s20 + $0x1f8] sm:$0xf] %vm5895_vm5, %v7195_v0  ;;  %6023 = vst.msk [vmem:[%s9781_s20 + $0x1fc] sm:$0xf] %vm5895_vm5, %v7196_v46  ;;  %v8918_v52 = vpop.eup %8917 }
 0x3eb   : > { %8929 = vpow2.f32 %v6948_v49  ;;  %v6949_v53 = vmul.f32 -1.442695, %v3035_v50  ;;  %v5009_v49 = vpop.permute.xlu1 %5008 }
 0x3ec   : > { %v8920_v55 = vpop.eup %8919 }
 0x3ed   : > { %v8922_v57 = vpop.eup %8921  ;;  %8931 = vpow2.f32 %v6949_v53  ;;  %v4258_v31 = vpack.c.bf16 %v8920_v55, %v8918_v52 }
 0x3ee   : > { %v3816_v58 = vadd.f32 1.0, %v8922_v57  ;;  %v3039_v59 = vpop.f32.mrb[16].mxu1 }
 0x3ef   : > { %v8924_v45 = vpop.eup %8923  ;;  %v5239_v60 = vsel %vm5044_vm4, %v4258_v31, %v5003_v56  ;;  %v3040_v61 = vadd.f32 %v10607_v47, %v3039_v59  ;;  %v8062_v62 = vpop.f32.mrb[17].mxu1 }
 0x3f0   : > { %v3817_v63 = vadd.f32 1.0, %v8924_v45  ;;  %v7197_v2 = vcombine.low %v5239_v60, %v5239_v60  ;;  %v7198_v3 = vcombine.high %v5239_v60, %v5239_v60  ;;  %v3042_v4 = vpop.f32.mrb[18].mxu1  ;;  %8933 = vrcp.f32 %v3816_v58  ;;  %v10770_v62 = vld [vmem:[%s11091_s4] ss:$0 sm:$0xff] }
 0x3f1   : > { %v6950_v5 = vmul.f32 -1.442695, %v3040_v61  ;;  %v3043_v7 = vadd.f32 %v10607_v47, %v3042_v4  ;;  %v8063_v8 = vpop.f32.mrb[19].mxu1 }
 0x3f2   : > { %8935 = vrcp.f32 %v3817_v63  ;;  %6024 = vst.msk [vmem:[%s9781_s20 + $0x200] sm:$0xf] %vm5895_vm5, %v7197_v2  ;;  %6025 = vst.msk [vmem:[%s9781_s20 + $0x204] sm:$0xf] %vm5895_vm5, %v7198_v3  ;;  %v8926_v9 = vpop.eup %8925 }
 0x3f3   : > { %8937 = vpow2.f32 %v6950_v5  ;;  %v6951_v10 = vmul.f32 -1.442695, %v3043_v7  ;;  %v5011_v5 = vpop.permute.xlu0 %5010 }
 0x3f4   : > { %v8928_v11 = vpop.eup %8927 }
 0x3f5   : > { %v8930_v13 = vpop.eup %8929  ;;  %8939 = vpow2.f32 %v6951_v10  ;;  %v4259_v14 = vpack.c.bf16 %v8928_v11, %v8926_v9 }
 0x3f6   : > { %v3818_v16 = vadd.f32 1.0, %v8930_v13  ;;  %v3047_v17 = vpop.f32.mrb[20].mxu1 }
 0x3f7   : > { %v8932_v54 = vpop.eup %8931  ;;  %v5242_v18 = vsel %vm5044_vm4, %v4259_v14, %v5005_v12  ;;  %v3048_v19 = vadd.f32 %v10607_v47, %v3047_v17  ;;  %v8066_v20 = vpop.f32.mrb[21].mxu1 }
 0x3f8   : > { %v3819_v21 = vadd.f32 1.0, %v8932_v54  ;;  %v7199_v22 = vcombine.low %v5242_v18, %v5242_v18  ;;  %v7200_v23 = vcombine.high %v5242_v18, %v5242_v18  ;;  %v3050_v25 = vpop.f32.mrb[22].mxu1  ;;  %8941 = vrcp.f32 %v3818_v16 }
 0x3f9   : > { %v6952_v36 = vmul.f32 -1.442695, %v3048_v19  ;;  %v3051_v26 = vadd.f32 %v10607_v47, %v3050_v25  ;;  %v8067_v27 = vpop.f32.mrb[23].mxu1 }
 0x3fa   : > { %8943 = vrcp.f32 %v3819_v21  ;;  %6026 = vst.msk [vmem:[%s9781_s20 + $0x208] sm:$0xf] %vm5895_vm5, %v7199_v22  ;;  %6027 = vst.msk [vmem:[%s9781_s20 + $0x20c] sm:$0xf] %vm5895_vm5, %v7200_v23  ;;  %v8934_v29 = vpop.eup %8933 }
 0x3fb   : > { %8945 = vpow2.f32 %v6952_v36  ;;  %v6953_v30 = vmul.f32 -1.442695, %v3051_v26  ;;  %v5013_v36 = vpop.permute.xlu1 %5012 }
 0x3fc   : > { %v8936_v6 = vpop.eup %8935 }
 0x3fd   : > { %v8938_v33 = vpop.eup %8937  ;;  %8947 = vpow2.f32 %v6953_v30  ;;  %v4260_v34 = vpack.c.bf16 %v8936_v6, %v8934_v29 }
 0x3fe   : > { %v3820_v24 = vadd.f32 1.0, %v8938_v33  ;;  %v3055_v35 = vpop.f32.mrb[24].mxu1 }
 0x3ff   : > { %v8940_v37 = vpop.eup %8939  ;;  %v5245_v15 = vsel %vm5044_vm4, %v4260_v34, %v5007_v32  ;;  %v3056_v38 = vadd.f32 %v10607_v47, %v3055_v35  ;;  %v8070_v39 = vpop.f32.mrb[25].mxu1 }
 0x400   : > { %v3821_v40 = vadd.f32 1.0, %v8940_v37  ;;  %v7201_v1 = vcombine.low %v5245_v15, %v5245_v15  ;;  %v7202_v41 = vcombine.high %v5245_v15, %v5245_v15  ;;  %v3058_v42 = vpop.f32.mrb[26].mxu1  ;;  %8949 = vrcp.f32 %v3820_v24 }
 0x401   : > { %v6954_v28 = vmul.f32 -1.442695, %v3056_v38  ;;  %v3059_v43 = vadd.f32 %v10607_v47, %v3058_v42  ;;  %v8071_v44 = vpop.f32.mrb[27].mxu1 }
 0x402   : > { %8951 = vrcp.f32 %v3821_v40  ;;  %6028 = vst.msk [vmem:[%s9781_s20 + $0x210] sm:$0xf] %vm5895_vm5, %v7201_v1  ;;  %6029 = vst.msk [vmem:[%s9781_s20 + $0x214] sm:$0xf] %vm5895_vm5, %v7202_v41  ;;  %v8942_v0 = vpop.eup %8941 }
 0x403   : > { %8953 = vpow2.f32 %v6954_v28  ;;  %v6955_v46 = vmul.f32 -1.442695, %v3059_v43  ;;  %v5015_v28 = vpop.permute.xlu0 %5014 }
 0x404   : > { %v8944_v48 = vpop.eup %8943 }
 0x405   : > { %v8946_v50 = vpop.eup %8945  ;;  %8955 = vpow2.f32 %v6955_v46  ;;  %v4261_v51 = vpack.c.bf16 %v8944_v48, %v8942_v0 }
 0x406   : > { %v3822_v52 = vadd.f32 1.0, %v8946_v50  ;;  %v3063_v53 = vpop.f32.mrb[28].mxu1 }
 0x407   : > { %v8948_v55 = vpop.eup %8947  ;;  %v5248_v56 = vsel %vm5044_vm4, %v4261_v51, %v5009_v49  ;;  %v3064_v57 = vadd.f32 %v10607_v47, %v3063_v53  ;;  %v8074_v31 = vpop.f32.mrb[29].mxu1 }
 0x408   : > { %v3823_v58 = vadd.f32 1.0, %v8948_v55  ;;  %v7203_v59 = vcombine.low %v5248_v56, %v5248_v56  ;;  %v7204_v45 = vcombine.high %v5248_v56, %v5248_v56  ;;  %v3066_v60 = vpop.f32.mrb[30].mxu1  ;;  %8957 = vrcp.f32 %v3822_v52 }
 0x409   : > { %v6956_v61 = vmul.f32 -1.442695, %v3064_v57  ;;  %v3067_v63 = vadd.f32 %v10770_v62, %v3066_v60  ;;  %v8075_v2 = vpop.f32.mrb[31].mxu1 }
 0x40a   : > { %8959 = vrcp.f32 %v3823_v58  ;;  %6030 = vst.msk [vmem:[%s9781_s20 + $0x218] sm:$0xf] %vm5895_vm5, %v7203_v59  ;;  %6031 = vst.msk [vmem:[%s9781_s20 + $0x21c] sm:$0xf] %vm5895_vm5, %v7204_v45  ;;  %v8950_v47 = vpop.eup %8949 }
 0x40b   : > { %8961 = vpow2.f32 %v6956_v61  ;;  %v6957_v3 = vmul.f32 -1.442695, %v3067_v63  ;;  %v5017_v61 = vpop.permute.xlu1 %5016 }
 0x40c   : > { %v8952_v4 = vpop.eup %8951 }
 0x40d   : > { %v8954_v7 = vpop.eup %8953  ;;  %8963 = vpow2.f32 %v6957_v3  ;;  %v4262_v8 = vpack.c.bf16 %v8952_v4, %v8950_v47 }
 0x40e   : > { %v3824_v9 = vadd.f32 1.0, %v8954_v7  ;;  %v3071_v10 = vpop.f32.mrb[32].mxu1 }
 0x40f   : > { %v8956_v11 = vpop.eup %8955  ;;  %v5251_v12 = vsel %vm5044_vm4, %v4262_v8, %v5011_v5  ;;  %v3072_v13 = vadd.f32 %v10770_v62, %v3071_v10  ;;  %v8078_v14 = vpop.f32.mrb[33].mxu1 }
 0x410   : > { %v3825_v16 = vadd.f32 1.0, %v8956_v11  ;;  %v7205_v17 = vcombine.low %v5251_v12, %v5251_v12  ;;  %v7206_v54 = vcombine.high %v5251_v12, %v5251_v12  ;;  %v3074_v18 = vpop.f32.mrb[34].mxu1  ;;  %8965 = vrcp.f32 %v3824_v9 }
 0x411   : > { %v6958_v19 = vmul.f32 -1.442695, %v3072_v13  ;;  %v3075_v20 = vadd.f32 %v10770_v62, %v3074_v18  ;;  %v8079_v21 = vpop.f32.mrb[35].mxu1 }
 0x412   : > { %8967 = vrcp.f32 %v3825_v16  ;;  %6032 = vst.msk [vmem:[%s9781_s20 + $0x220] sm:$0xf] %vm5895_vm5, %v7205_v17  ;;  %6033 = vst.msk [vmem:[%s9781_s20 + $0x224] sm:$0xf] %vm5895_vm5, %v7206_v54  ;;  %v8958_v22 = vpop.eup %8957 }
 0x413   : > { %8969 = vpow2.f32 %v6958_v19  ;;  %v6959_v23 = vmul.f32 -1.442695, %v3075_v20  ;;  %v5019_v19 = vpop.permute.xlu0 %5018 }
 0x414   : > { %v8960_v25 = vpop.eup %8959 }
 0x415   : > { %v8962_v26 = vpop.eup %8961  ;;  %8971 = vpow2.f32 %v6959_v23  ;;  %v4263_v27 = vpack.c.bf16 %v8960_v25, %v8958_v22 }
 0x416   : > { %v3826_v29 = vadd.f32 1.0, %v8962_v26  ;;  %v3079_v30 = vpop.f32.mrb[36].mxu1 }
 0x417   : > { %v8964_v6 = vpop.eup %8963  ;;  %v5254_v32 = vsel %vm5044_vm4, %v4263_v27, %v5013_v36  ;;  %v3080_v33 = vadd.f32 %v10770_v62, %v3079_v30  ;;  %v8082_v34 = vpop.f32.mrb[37].mxu1 }
 0x418   : > { %v3827_v24 = vadd.f32 1.0, %v8964_v6  ;;  %v7207_v35 = vcombine.low %v5254_v32, %v5254_v32  ;;  %v7208_v37 = vcombine.high %v5254_v32, %v5254_v32  ;;  %v3082_v15 = vpop.f32.mrb[38].mxu1  ;;  %8973 = vrcp.f32 %v3826_v29 }
 0x419   : > { %v6960_v38 = vmul.f32 -1.442695, %v3080_v33  ;;  %v3083_v39 = vadd.f32 %v10770_v62, %v3082_v15  ;;  %v8083_v40 = vpop.f32.mrb[39].mxu1 }
 0x41a   : > { %8975 = vrcp.f32 %v3827_v24  ;;  %6034 = vst.msk [vmem:[%s9781_s20 + $0x228] sm:$0xf] %vm5895_vm5, %v7207_v35  ;;  %6035 = vst.msk [vmem:[%s9781_s20 + $0x22c] sm:$0xf] %vm5895_vm5, %v7208_v37  ;;  %v8966_v1 = vpop.eup %8965 }
 0x41b   : > { %8977 = vpow2.f32 %v6960_v38  ;;  %v6961_v41 = vmul.f32 -1.442695, %v3083_v39  ;;  %v5021_v38 = vpop.permute.xlu1 %5020 }
 0x41c   : > { %v8968_v42 = vpop.eup %8967 }
 0x41d   : > { %v8970_v43 = vpop.eup %8969  ;;  %8979 = vpow2.f32 %v6961_v41  ;;  %v4264_v44 = vpack.c.bf16 %v8968_v42, %v8966_v1 }
 0x41e   : > { %v3828_v0 = vadd.f32 1.0, %v8970_v43  ;;  %v3087_v46 = vpop.f32.mrb[40].mxu1 }
 0x41f   : > { %v8972_v48 = vpop.eup %8971  ;;  %v5257_v49 = vsel %vm5044_vm4, %v4264_v44, %v5015_v28  ;;  %v3088_v50 = vadd.f32 %v10770_v62, %v3087_v46  ;;  %v8086_v51 = vpop.f32.mrb[41].mxu1 }
 0x420   : > { %v3829_v52 = vadd.f32 1.0, %v8972_v48  ;;  %v7209_v53 = vcombine.low %v5257_v49, %v5257_v49  ;;  %v7210_v55 = vcombine.high %v5257_v49, %v5257_v49  ;;  %v3090_v56 = vpop.f32.mrb[42].mxu1  ;;  %8981 = vrcp.f32 %v3828_v0 }
 0x421   : > { %v6962_v57 = vmul.f32 -1.442695, %v3088_v50  ;;  %v3091_v31 = vadd.f32 %v10770_v62, %v3090_v56  ;;  %v8087_v58 = vpop.f32.mrb[43].mxu1 }
 0x422   : > { %8983 = vrcp.f32 %v3829_v52  ;;  %6036 = vst.msk [vmem:[%s9781_s20 + $0x230] sm:$0xf] %vm5895_vm5, %v7209_v53  ;;  %6037 = vst.msk [vmem:[%s9781_s20 + $0x234] sm:$0xf] %vm5895_vm5, %v7210_v55  ;;  %v8974_v59 = vpop.eup %8973 }
 0x423   : > { %8985 = vpow2.f32 %v6962_v57  ;;  %v6963_v45 = vmul.f32 -1.442695, %v3091_v31  ;;  %v5023_v57 = vpop.permute.xlu0 %5022 }
 0x424   : > { %v8976_v60 = vpop.eup %8975 }
 0x425   : > { %v8978_v63 = vpop.eup %8977  ;;  %8987 = vpow2.f32 %v6963_v45  ;;  %v4265_v2 = vpack.c.bf16 %v8976_v60, %v8974_v59 }
 0x426   : > { %v3830_v47 = vadd.f32 1.0, %v8978_v63  ;;  %v3095_v3 = vpop.f32.mrb[44].mxu1 }
 0x427   : > { %v8980_v4 = vpop.eup %8979  ;;  %v5260_v5 = vsel %vm5044_vm4, %v4265_v2, %v5017_v61  ;;  %v3096_v7 = vadd.f32 %v10770_v62, %v3095_v3  ;;  %v8090_v8 = vpop.f32.mrb[45].mxu1 }
 0x428   : > { %v3831_v9 = vadd.f32 1.0, %v8980_v4  ;;  %v7211_v10 = vcombine.low %v5260_v5, %v5260_v5  ;;  %v7212_v11 = vcombine.high %v5260_v5, %v5260_v5  ;;  %v3098_v12 = vpop.f32.mrb[46].mxu1  ;;  %8989 = vrcp.f32 %v3830_v47 }
 0x429   : > { %v6964_v13 = vmul.f32 -1.442695, %v3096_v7  ;;  %v3099_v14 = vadd.f32 %v10770_v62, %v3098_v12  ;;  %v8091_v16 = vpop.f32.mrb[47].mxu1 }
 0x42a   : > { %8991 = vrcp.f32 %v3831_v9  ;;  %6038 = vst.msk [vmem:[%s9781_s20 + $0x238] sm:$0xf] %vm5895_vm5, %v7211_v10  ;;  %6039 = vst.msk [vmem:[%s9781_s20 + $0x23c] sm:$0xf] %vm5895_vm5, %v7212_v11  ;;  %v8982_v17 = vpop.eup %8981 }
 0x42b   : > { %8993 = vpow2.f32 %v6964_v13  ;;  %v6965_v54 = vmul.f32 -1.442695, %v3099_v14  ;;  %v5025_v13 = vpop.permute.xlu1 %5024 }
 0x42c   : > { %v8984_v18 = vpop.eup %8983 }
 0x42d   : > { %v8986_v20 = vpop.eup %8985  ;;  %8995 = vpow2.f32 %v6965_v54  ;;  %v4266_v21 = vpack.c.bf16 %v8984_v18, %v8982_v17 }
 0x42e   : > { %v3832_v22 = vadd.f32 1.0, %v8986_v20  ;;  %v3103_v23 = vpop.f32.mrb[48].mxu1 }
 0x42f   : > { %v8988_v25 = vpop.eup %8987  ;;  %v5263_v36 = vsel %vm5044_vm4, %v4266_v21, %v5019_v19  ;;  %v3104_v26 = vadd.f32 %v10770_v62, %v3103_v23  ;;  %v8094_v27 = vpop.f32.mrb[49].mxu1 }
 0x430   : > { %v3833_v29 = vadd.f32 1.0, %v8988_v25  ;;  %v7213_v30 = vcombine.low %v5263_v36, %v5263_v36  ;;  %v7214_v6 = vcombine.high %v5263_v36, %v5263_v36  ;;  %v3106_v32 = vpop.f32.mrb[50].mxu1  ;;  %8997 = vrcp.f32 %v3832_v22 }
 0x431   : > { %v6966_v33 = vmul.f32 -1.442695, %v3104_v26  ;;  %v3107_v34 = vadd.f32 %v10770_v62, %v3106_v32  ;;  %v8095_v24 = vpop.f32.mrb[51].mxu1 }
 0x432   : > { %8999 = vrcp.f32 %v3833_v29  ;;  %6040 = vst.msk [vmem:[%s9781_s20 + $0x240] sm:$0xf] %vm5895_vm5, %v7213_v30  ;;  %6041 = vst.msk [vmem:[%s9781_s20 + $0x244] sm:$0xf] %vm5895_vm5, %v7214_v6  ;;  %v8990_v35 = vpop.eup %8989 }
 0x433   : > { %9001 = vpow2.f32 %v6966_v33  ;;  %v6967_v37 = vmul.f32 -1.442695, %v3107_v34  ;;  %v5027_v33 = vpop.permute.xlu0 %5026 }
 0x434   : > { %v8992_v15 = vpop.eup %8991 }
 0x435   : > { %v8994_v39 = vpop.eup %8993  ;;  %9003 = vpow2.f32 %v6967_v37  ;;  %v4267_v40 = vpack.c.bf16 %v8992_v15, %v8990_v35 }
 0x436   : > { %v3834_v1 = vadd.f32 1.0, %v8994_v39  ;;  %v3111_v41 = vpop.f32.mrb[52].mxu1 }
 0x437   : > { %v8996_v42 = vpop.eup %8995  ;;  %v5266_v28 = vsel %vm5044_vm4, %v4267_v40, %v5021_v38  ;;  %v3112_v43 = vadd.f32 %v10770_v62, %v3111_v41  ;;  %v8098_v44 = vpop.f32.mrb[53].mxu1 }
 0x438   : > { %v3835_v0 = vadd.f32 1.0, %v8996_v42  ;;  %v7215_v46 = vcombine.low %v5266_v28, %v5266_v28  ;;  %v7216_v48 = vcombine.high %v5266_v28, %v5266_v28  ;;  %v3114_v49 = vpop.f32.mrb[54].mxu1  ;;  %9005 = vrcp.f32 %v3834_v1 }
 0x439   : > { %v6968_v50 = vmul.f32 -1.442695, %v3112_v43  ;;  %v3115_v51 = vadd.f32 %v10770_v62, %v3114_v49  ;;  %v8099_v52 = vpop.f32.mrb[55].mxu1 }
 0x43a   : > { %9007 = vrcp.f32 %v3835_v0  ;;  %6042 = vst.msk [vmem:[%s9781_s20 + $0x248] sm:$0xf] %vm5895_vm5, %v7215_v46  ;;  %6043 = vst.msk [vmem:[%s9781_s20 + $0x24c] sm:$0xf] %vm5895_vm5, %v7216_v48  ;;  %v8998_v53 = vpop.eup %8997 }
 0x43b   : > { %9009 = vpow2.f32 %v6968_v50  ;;  %v6969_v55 = vmul.f32 -1.442695, %v3115_v51  ;;  %v5029_v50 = vpop.permute.xlu1 %5028 }
 0x43c   : > { %v9000_v56 = vpop.eup %8999 }
 0x43d   : > { %v9002_v31 = vpop.eup %9001  ;;  %9011 = vpow2.f32 %v6969_v55  ;;  %v4268_v58 = vpack.c.bf16 %v9000_v56, %v8998_v53 }
 0x43e   : > { %v3836_v59 = vadd.f32 1.0, %v9002_v31  ;;  %v3119_v45 = vpop.f32.mrb[56].mxu1 }
 0x43f   : > { %v9004_v60 = vpop.eup %9003  ;;  %v5269_v61 = vsel %vm5044_vm4, %v4268_v58, %v5023_v57  ;;  %v3120_v63 = vadd.f32 %v10770_v62, %v3119_v45  ;;  %v8102_v2 = vpop.f32.mrb[57].mxu1 }
 0x440   : > { %v3837_v47 = vadd.f32 1.0, %v9004_v60  ;;  %v7217_v3 = vcombine.low %v5269_v61, %v5269_v61  ;;  %v7218_v4 = vcombine.high %v5269_v61, %v5269_v61  ;;  %v3122_v5 = vpop.f32.mrb[58].mxu1  ;;  %9013 = vrcp.f32 %v3836_v59 }
 0x441   : > { %v6970_v7 = vmul.f32 -1.442695, %v3120_v63  ;;  %v3123_v8 = vadd.f32 %v10770_v62, %v3122_v5  ;;  %v8103_v9 = vpop.f32.mrb[59].mxu1 }
 0x442   : > { %9015 = vrcp.f32 %v3837_v47  ;;  %6044 = vst.msk [vmem:[%s9781_s20 + $0x250] sm:$0xf] %vm5895_vm5, %v7217_v3  ;;  %6045 = vst.msk [vmem:[%s9781_s20 + $0x254] sm:$0xf] %vm5895_vm5, %v7218_v4  ;;  %v9006_v10 = vpop.eup %9005 }
 0x443   : > { %9017 = vpow2.f32 %v6970_v7  ;;  %v6971_v11 = vmul.f32 -1.442695, %v3123_v8  ;;  %v5031_v7 = vpop.permute.xlu0 %5030 }
 0x444   : > { %v9008_v12 = vpop.eup %9007 }
 0x445   : > { %v9010_v14 = vpop.eup %9009  ;;  %9019 = vpow2.f32 %v6971_v11  ;;  %v4269_v16 = vpack.c.bf16 %v9008_v12, %v9006_v10 }
 0x446   : > { %v3838_v17 = vadd.f32 1.0, %v9010_v14  ;;  %v3127_v54 = vpop.f32.mrb[60].mxu1 }
 0x447   : > { %v9012_v18 = vpop.eup %9011  ;;  %v5272_v19 = vsel %vm5044_vm4, %v4269_v16, %v5025_v13  ;;  %v3128_v20 = vadd.f32 %v10770_v62, %v3127_v54  ;;  %v8106_v21 = vpop.f32.mrb[61].mxu1 }
 0x448   : > { %v3839_v22 = vadd.f32 1.0, %v9012_v18  ;;  %v7219_v23 = vcombine.low %v5272_v19, %v5272_v19  ;;  %v7220_v25 = vcombine.high %v5272_v19, %v5272_v19  ;;  %v3130_v36 = vpop.f32.mrb[62].mxu1  ;;  %9021 = vrcp.f32 %v3838_v17 }
 0x449   : > { %v6972_v26 = vmul.f32 -1.442695, %v3128_v20  ;;  %v3131_v27 = vadd.f32 %v10770_v62, %v3130_v36  ;;  %v8107_v29 = vpop.f32.mrb[63].mxu1 }
 0x44a   : > { %9023 = vrcp.f32 %v3839_v22  ;;  %6046 = vst.msk [vmem:[%s9781_s20 + $0x258] sm:$0xf] %vm5895_vm5, %v7219_v23  ;;  %6047 = vst.msk [vmem:[%s9781_s20 + $0x25c] sm:$0xf] %vm5895_vm5, %v7220_v25  ;;  %v9014_v30 = vpop.eup %9013 }
 0x44b   : > { %9025 = vpow2.f32 %v6972_v26  ;;  %v6973_v6 = vmul.f32 -1.442695, %v3131_v27  ;;  %v5033_v26 = vpop.permute.xlu1 %5032 }
 0x44c   : > { %v9016_v32 = vpop.eup %9015 }
 0x44d   : > { %v9018_v34 = vpop.eup %9017  ;;  %9027 = vpow2.f32 %v6973_v6  ;;  %v4270_v24 = vpack.c.bf16 %v9016_v32, %v9014_v30 }
 0x44e   : > { %v3840_v35 = vadd.f32 1.0, %v9018_v34  ;;  %v3135_v37 = vpop.f32.mrb[64].mxu1 }
 0x44f   : > { %v9020_v15 = vpop.eup %9019  ;;  %v5275_v38 = vsel %vm5044_vm4, %v4270_v24, %v5027_v33  ;;  %v3136_v39 = vadd.f32 %v10770_v62, %v3135_v37  ;;  %v8110_v40 = vpop.f32.mrb[65].mxu1 }
 0x450   : > { %v3841_v1 = vadd.f32 1.0, %v9020_v15  ;;  %v7221_v41 = vcombine.low %v5275_v38, %v5275_v38  ;;  %v7222_v42 = vcombine.high %v5275_v38, %v5275_v38  ;;  %v3138_v28 = vpop.f32.mrb[66].mxu1  ;;  %9029 = vrcp.f32 %v3840_v35 }
 0x451   : > { %v6974_v43 = vmul.f32 -1.442695, %v3136_v39  ;;  %v3139_v44 = vadd.f32 %v10770_v62, %v3138_v28  ;;  %v8111_v0 = vpop.f32.mrb[67].mxu1 }
 0x452   : > { %9031 = vrcp.f32 %v3841_v1  ;;  %6048 = vst.msk [vmem:[%s9781_s20 + $0x260] sm:$0xf] %vm5895_vm5, %v7221_v41  ;;  %6049 = vst.msk [vmem:[%s9781_s20 + $0x264] sm:$0xf] %vm5895_vm5, %v7222_v42  ;;  %v9022_v46 = vpop.eup %9021 }
 0x453   : > { %9033 = vpow2.f32 %v6974_v43  ;;  %v6975_v48 = vmul.f32 -1.442695, %v3139_v44  ;;  %v5035_v43 = vpop.permute.xlu0 %5034 }
 0x454   : > { %v9024_v49 = vpop.eup %9023 }
 0x455   : > { %v9026_v51 = vpop.eup %9025  ;;  %9035 = vpow2.f32 %v6975_v48  ;;  %v4271_v52 = vpack.c.bf16 %v9024_v49, %v9022_v46 }
 0x456   : > { %v3842_v53 = vadd.f32 1.0, %v9026_v51  ;;  %v3143_v55 = vpop.f32.mrb[68].mxu1 }
 0x457   : > { %v9028_v56 = vpop.eup %9027  ;;  %v5278_v57 = vsel %vm5044_vm4, %v4271_v52, %v5029_v50  ;;  %v3144_v31 = vadd.f32 %v10770_v62, %v3143_v55  ;;  %v8114_v58 = vpop.f32.mrb[69].mxu1 }
 0x458   : > { %v3843_v59 = vadd.f32 1.0, %v9028_v56  ;;  %v7223_v45 = vcombine.low %v5278_v57, %v5278_v57  ;;  %v7224_v60 = vcombine.high %v5278_v57, %v5278_v57  ;;  %v3146_v61 = vpop.f32.mrb[70].mxu1  ;;  %9037 = vrcp.f32 %v3842_v53 }
 0x459   : > { %v6976_v63 = vmul.f32 -1.442695, %v3144_v31  ;;  %v3147_v2 = vadd.f32 %v10770_v62, %v3146_v61  ;;  %v8115_v47 = vpop.f32.mrb[71].mxu1 }
 0x45a   : > { %9039 = vrcp.f32 %v3843_v59  ;;  %6050 = vst.msk [vmem:[%s9781_s20 + $0x268] sm:$0xf] %vm5895_vm5, %v7223_v45  ;;  %6051 = vst.msk [vmem:[%s9781_s20 + $0x26c] sm:$0xf] %vm5895_vm5, %v7224_v60  ;;  %v9030_v3 = vpop.eup %9029 }
 0x45b   : > { %9041 = vpow2.f32 %v6976_v63  ;;  %v6977_v4 = vmul.f32 -1.442695, %v3147_v2  ;;  %v5037_v63 = vpop.permute.xlu1 %5036 }
 0x45c   : > { %v9032_v5 = vpop.eup %9031 }
 0x45d   : > { %v9034_v8 = vpop.eup %9033  ;;  %9043 = vpow2.f32 %v6977_v4  ;;  %v4272_v9 = vpack.c.bf16 %v9032_v5, %v9030_v3 }
 0x45e   : > { %v3844_v10 = vadd.f32 1.0, %v9034_v8  ;;  %v3151_v11 = vpop.f32.mrb[72].mxu1 }
 0x45f   : > { %v9036_v12 = vpop.eup %9035  ;;  %v5281_v13 = vsel %vm5044_vm4, %v4272_v9, %v5031_v7  ;;  %v3152_v14 = vadd.f32 %v10770_v62, %v3151_v11  ;;  %v8118_v16 = vpop.f32.mrb[73].mxu1 }
 0x460   : > { %v3845_v17 = vadd.f32 1.0, %v9036_v12  ;;  %v7225_v54 = vcombine.low %v5281_v13, %v5281_v13  ;;  %v7226_v18 = vcombine.high %v5281_v13, %v5281_v13  ;;  %v3154_v19 = vpop.f32.mrb[74].mxu1  ;;  %9045 = vrcp.f32 %v3844_v10  ;;  %v5039_v11 = vpop.permute.xlu0 %5038 }
 0x461   : > { %v6978_v20 = vmul.f32 -1.442695, %v3152_v14  ;;  %v3155_v21 = vadd.f32 %v10770_v62, %v3154_v19  ;;  %v8119_v22 = vpop.f32.mrb[75].mxu1 }
 0x462   : > { %9047 = vrcp.f32 %v3845_v17  ;;  %6052 = vst.msk [vmem:[%s9781_s20 + $0x270] sm:$0xf] %vm5895_vm5, %v7225_v54  ;;  %6053 = vst.msk [vmem:[%s9781_s20 + $0x274] sm:$0xf] %vm5895_vm5, %v7226_v18  ;;  %v9038_v23 = vpop.eup %9037  ;;  %v5041_v22 = vpop.permute.xlu1 %5040 }
 0x463   : > { %9049 = vpow2.f32 %v6978_v20  ;;  %v6979_v25 = vmul.f32 -1.442695, %v3155_v21 }
 0x464   : > { %v9040_v36 = vpop.eup %9039 }
 0x465   : > { %v9042_v27 = vpop.eup %9041  ;;  %9051 = vpow2.f32 %v6979_v25  ;;  %v4273_v29 = vpack.c.bf16 %v9040_v36, %v9038_v23 }
 0x466   : > { %v3846_v30 = vadd.f32 1.0, %v9042_v27  ;;  %v3159_v6 = vpop.f32.mrb[76].mxu1 }
 0x467   : > { %v9044_v32 = vpop.eup %9043  ;;  %v5284_v33 = vsel %vm5044_vm4, %v4273_v29, %v5033_v26  ;;  %v3160_v34 = vadd.f32 %v10770_v62, %v3159_v6  ;;  %v8122_v24 = vpop.f32.mrb[77].mxu1 }
 0x468   : > { %v3847_v35 = vadd.f32 1.0, %v9044_v32  ;;  %v7227_v37 = vcombine.low %v5284_v33, %v5284_v33  ;;  %v7228_v15 = vcombine.high %v5284_v33, %v5284_v33  ;;  %v3162_v38 = vpop.f32.mrb[78].mxu1  ;;  %9053 = vrcp.f32 %v3846_v30  ;;  %v5043_v30 = vpop.permute.xlu0 %5042 }
 0x469   : > { %v6980_v39 = vmul.f32 -1.442695, %v3160_v34  ;;  %v3163_v40 = vadd.f32 %v10770_v62, %v3162_v38  ;;  %v8123_v1 = vpop.f32.mrb[79].mxu1 }
 0x46a   : > { %9055 = vrcp.f32 %v3847_v35  ;;  %6054 = vst.msk [vmem:[%s9781_s20 + $0x278] sm:$0xf] %vm5895_vm5, %v7227_v37  ;;  %6055 = vst.msk [vmem:[%s9781_s20 + $0x27c] sm:$0xf] %vm5895_vm5, %v7228_v15  ;;  %v9046_v41 = vpop.eup %9045 }
 0x46b   : > { %9057 = vpow2.f32 %v6980_v39  ;;  %v6981_v42 = vmul.f32 -1.442695, %v3163_v40 }
 0x46c   : > { %v9048_v28 = vpop.eup %9047 }
 0x46d   : > { %v9050_v44 = vpop.eup %9049  ;;  %9059 = vpow2.f32 %v6981_v42  ;;  %v4274_v0 = vpack.c.bf16 %v9048_v28, %v9046_v41 }
 0x46e   : > { %v3848_v46 = vadd.f32 1.0, %v9050_v44  ;;  %v3167_v48 = vpop.f32.mrb[80].mxu1 }
 0x46f   : > { %v9052_v49 = vpop.eup %9051  ;;  %v5287_v50 = vsel %vm5044_vm4, %v4274_v0, %v5035_v43  ;;  %v3168_v51 = vadd.f32 %v10770_v62, %v3167_v48  ;;  %v8126_v52 = vpop.f32.mrb[81].mxu1 }
 0x470   : > { %v3849_v53 = vadd.f32 1.0, %v9052_v49  ;;  %v7229_v55 = vcombine.low %v5287_v50, %v5287_v50  ;;  %v7230_v56 = vcombine.high %v5287_v50, %v5287_v50  ;;  %v3170_v57 = vpop.f32.mrb[82].mxu1  ;;  %9061 = vrcp.f32 %v3848_v46 }
 0x471   : > { %v6982_v31 = vmul.f32 -1.442695, %v3168_v51  ;;  %v3171_v58 = vadd.f32 %v10770_v62, %v3170_v57  ;;  %v8127_v59 = vpop.f32.mrb[83].mxu1 }
 0x472   : > { %9063 = vrcp.f32 %v3849_v53  ;;  %6056 = vst.msk [vmem:[%s9781_s20 + $0x280] sm:$0xf] %vm5895_vm5, %v7229_v55  ;;  %6057 = vst.msk [vmem:[%s9781_s20 + $0x284] sm:$0xf] %vm5895_vm5, %v7230_v56  ;;  %v9054_v45 = vpop.eup %9053 }
 0x473   : > { %9065 = vpow2.f32 %v6982_v31  ;;  %v6983_v60 = vmul.f32 -1.442695, %v3171_v58 }
 0x474   : > { %v9056_v61 = vpop.eup %9055 }
 0x475   : > { %v9058_v2 = vpop.eup %9057  ;;  %9067 = vpow2.f32 %v6983_v60  ;;  %v4275_v47 = vpack.c.bf16 %v9056_v61, %v9054_v45 }
 0x476   : > { %v3850_v3 = vadd.f32 1.0, %v9058_v2 }
 0x477   : > { %v9060_v4 = vpop.eup %9059  ;;  %v5290_v62 = vsel %vm5044_vm4, %v4275_v47, %v5037_v63 }
 0x478   : > { %v3851_v5 = vadd.f32 1.0, %v9060_v4  ;;  %v7231_v7 = vcombine.low %v5290_v62, %v5290_v62  ;;  %v7232_v8 = vcombine.high %v5290_v62, %v5290_v62  ;;  %9069 = vrcp.f32 %v3850_v3 }
 0x47a   : > { %9071 = vrcp.f32 %v3851_v5  ;;  %6058 = vst.msk [vmem:[%s9781_s20 + $0x288] sm:$0xf] %vm5895_vm5, %v7231_v7  ;;  %6059 = vst.msk [vmem:[%s9781_s20 + $0x28c] sm:$0xf] %vm5895_vm5, %v7232_v8  ;;  %v9062_v9 = vpop.eup %9061 }
 0x47c   : > { %v9064_v10 = vpop.eup %9063 }
 0x47d   : > { %v9066_v12 = vpop.eup %9065  ;;  %v4276_v13 = vpack.c.bf16 %v9064_v10, %v9062_v9 }
 0x47e   : > { %v3852_v14 = vadd.f32 1.0, %v9066_v12 }
 0x47f   : > { %v9068_v16 = vpop.eup %9067  ;;  %v5293_v17 = vsel %vm5044_vm4, %v4276_v13, %v5039_v11 }
 0x480   : > { %v3853_v54 = vadd.f32 1.0, %v9068_v16  ;;  %v7233_v18 = vcombine.low %v5293_v17, %v5293_v17  ;;  %v7234_v19 = vcombine.high %v5293_v17, %v5293_v17  ;;  %9073 = vrcp.f32 %v3852_v14 }
 0x482   : > { %9075 = vrcp.f32 %v3853_v54  ;;  %6060 = vst.msk [vmem:[%s9781_s20 + $0x290] sm:$0xf] %vm5895_vm5, %v7233_v18  ;;  %6061 = vst.msk [vmem:[%s9781_s20 + $0x294] sm:$0xf] %vm5895_vm5, %v7234_v19  ;;  %v9070_v20 = vpop.eup %9069 }
 0x484   : > { %v9072_v21 = vpop.eup %9071 }
 0x485   : > { %v4277_v23 = vpack.c.bf16 %v9072_v21, %v9070_v20 }
 0x487   : > { %v5296_v25 = vsel %vm5044_vm4, %v4277_v23, %v5041_v22 }
 0x488   : > { %v7235_v36 = vcombine.low %v5296_v25, %v5296_v25  ;;  %v7236_v26 = vcombine.high %v5296_v25, %v5296_v25 }
 0x48a   : > { %6062 = vst.msk [vmem:[%s9781_s20 + $0x298] sm:$0xf] %vm5895_vm5, %v7235_v36  ;;  %6063 = vst.msk [vmem:[%s9781_s20 + $0x29c] sm:$0xf] %vm5895_vm5, %v7236_v26  ;;  %v9074_v27 = vpop.eup %9073 }
 0x48c   : > { %v9076_v29 = vpop.eup %9075  ;;  %6072 = sbr.rel (!%p9238_p4) target bundleno = 1262 (0x4ee), region = 48 }
 0x48d   : > { %v4278_v6 = vpack.c.bf16 %v9076_v29, %v9074_v27 }
 0x48f   : > { %v5299_v32 = vsel %vm5044_vm4, %v4278_v6, %v5043_v30 }
 0x490   : > { %v7237_v33 = vcombine.low %v5299_v32, %v5299_v32  ;;  %v7238_v34 = vcombine.high %v5299_v32, %v5299_v32 }
 0x492   : > { %6064 = vst.msk [vmem:[%s9781_s20 + $0x2a0] sm:$0xf] %vm5895_vm5, %v7237_v33  ;;  %6065 = vst.msk [vmem:[%s9781_s20 + $0x2a4] sm:$0xf] %vm5895_vm5, %v7238_v34 }
 0x493   : > { %s11102_s27 = smov (!%p6075_p8, %s6074_s27), 170 }
 0x494   : > { %s7239_s11 = sshll.u32 %s11102_s27, 6 }
 0x495   : > { %p7242_p9 = scmp.eq.s32.totalorder %s7239_s11, 0 }
 0x496   : > { %s10901_s12 = sshrl.u32 (!%p7242_p9), %s11102_s27, 6 }
 0x497   : > { %6083 = sbr.rel (%p7242_p9) target bundleno = 1262 (0x4ee), region = 52  ;;  %p7243_p10 = scmp.le.s32.totalorder (!%p7242_p9), %s10901_s12, 0 }
 0x49e   : > { %6494 = sbr.rel (%p7243_p10) target bundleno = 1241 (0x4d9), region = 127  ;;  %s11095_s24 = smov (!%p7243_p10), %s10895_s9 }
 0x49f   : > { %s11096_s29 = smov (!%p7243_p10), %s9781_s20  ;;  %s10910_s10 = smov (!%p7243_p10), 0  }
 0x4a0   : > { %s10912_s23 = smov (!%p7243_p10), 0  }
 0x4a5 LB: >> { %v6099_v24 = vld [vmem:[%s9149_s29] sm:$0xf]  ;;  %v6101_v35 = vld [vmem:[%s9149_s29 + $0x4] sm:$0xf]  ;;  %v6103_v37 = vld [vmem:[%s9149_s29 + $0x8] sm:$0xf]  ;;  %s9157_s23 = sphi %s10912_s23, %s6093_s23   ;;  %s9153_s10 = sphi %s10910_s10, %s11097_s10   ;;  %s9149_s29 = sphi %s11096_s29, %s6232_s29   ;;  %s9145_s24 = sphi %s11095_s24, %s6233_s24  }
 0x4a6   : >> { %6100 = vst [vmem:[%s9145_s24] sm:$0xf] %v6099_v24  ;;  %6102 = vst [vmem:[%s9145_s24 + $0x4] sm:$0xf] %v6101_v35  ;;  %v6105_v15 = vld [vmem:[%s9149_s29 + $0xc] sm:$0xf]  ;;  %s6227_s14 = sadd.s32 1, %s9153_s10 }
 0x4a7   : >> { %6104 = vst [vmem:[%s9145_s24 + $0x8] sm:$0xf] %v6103_v37  ;;  %v6107_v38 = vld [vmem:[%s9149_s29 + $0x10] sm:$0xf]  ;;  %v6109_v39 = vld [vmem:[%s9149_s29 + $0x14] sm:$0xf]  ;;  %p6228_p11 = scmp.ge.s32.totalorder %s6227_s14, %s10901_s12 }
 0x4a8   : >> { %6106 = vst [vmem:[%s9145_s24 + $0xc] sm:$0xf] %v6105_v15  ;;  %6108 = vst [vmem:[%s9145_s24 + $0x10] sm:$0xf] %v6107_v38  ;;  %v6111_v40 = vld [vmem:[%s9149_s29 + $0x18] sm:$0xf] }
 0x4a9   : >> { %6110 = vst [vmem:[%s9145_s24 + $0x14] sm:$0xf] %v6109_v39  ;;  %v6113_v1 = vld [vmem:[%s9149_s29 + $0x1c] sm:$0xf]  ;;  %v6115_v41 = vld [vmem:[%s9149_s29 + $0x20] sm:$0xf] }
 0x4aa   : >> { %6112 = vst [vmem:[%s9145_s24 + $0x18] sm:$0xf] %v6111_v40  ;;  %6114 = vst [vmem:[%s9145_s24 + $0x1c] sm:$0xf] %v6113_v1  ;;  %v6117_v42 = vld [vmem:[%s9149_s29 + $0x24] sm:$0xf] }
 0x4ab   : >> { %6116 = vst [vmem:[%s9145_s24 + $0x20] sm:$0xf] %v6115_v41  ;;  %v6119_v28 = vld [vmem:[%s9149_s29 + $0x28] sm:$0xf]  ;;  %v6121_v43 = vld [vmem:[%s9149_s29 + $0x2c] sm:$0xf] }
 0x4ac   : >> { %6118 = vst [vmem:[%s9145_s24 + $0x24] sm:$0xf] %v6117_v42  ;;  %6120 = vst [vmem:[%s9145_s24 + $0x28] sm:$0xf] %v6119_v28  ;;  %v6123_v44 = vld [vmem:[%s9149_s29 + $0x30] sm:$0xf] }
 0x4ad   : >> { %6122 = vst [vmem:[%s9145_s24 + $0x2c] sm:$0xf] %v6121_v43  ;;  %v6125_v0 = vld [vmem:[%s9149_s29 + $0x34] sm:$0xf]  ;;  %v6127_v46 = vld [vmem:[%s9149_s29 + $0x38] sm:$0xf] }
 0x4ae   : >> { %6124 = vst [vmem:[%s9145_s24 + $0x30] sm:$0xf] %v6123_v44  ;;  %6126 = vst [vmem:[%s9145_s24 + $0x34] sm:$0xf] %v6125_v0  ;;  %v6129_v48 = vld [vmem:[%s9149_s29 + $0x3c] sm:$0xf] }
 0x4af   : >> { %6128 = vst [vmem:[%s9145_s24 + $0x38] sm:$0xf] %v6127_v46  ;;  %v6131_v49 = vld [vmem:[%s9149_s29 + $0x40] sm:$0xf]  ;;  %v6133_v50 = vld [vmem:[%s9149_s29 + $0x44] sm:$0xf] }
 0x4b0   : >> { %6130 = vst [vmem:[%s9145_s24 + $0x3c] sm:$0xf] %v6129_v48  ;;  %6132 = vst [vmem:[%s9145_s24 + $0x40] sm:$0xf] %v6131_v49  ;;  %v6135_v51 = vld [vmem:[%s9149_s29 + $0x48] sm:$0xf] }
 0x4b1   : >> { %6134 = vst [vmem:[%s9145_s24 + $0x44] sm:$0xf] %v6133_v50  ;;  %v6137_v52 = vld [vmem:[%s9149_s29 + $0x4c] sm:$0xf]  ;;  %v6139_v53 = vld [vmem:[%s9149_s29 + $0x50] sm:$0xf] }
 0x4b2   : >> { %6136 = vst [vmem:[%s9145_s24 + $0x48] sm:$0xf] %v6135_v51  ;;  %6138 = vst [vmem:[%s9145_s24 + $0x4c] sm:$0xf] %v6137_v52  ;;  %v6141_v55 = vld [vmem:[%s9149_s29 + $0x54] sm:$0xf] }
 0x4b3   : >> { %6140 = vst [vmem:[%s9145_s24 + $0x50] sm:$0xf] %v6139_v53  ;;  %v6143_v56 = vld [vmem:[%s9149_s29 + $0x58] sm:$0xf]  ;;  %v6145_v57 = vld [vmem:[%s9149_s29 + $0x5c] sm:$0xf] }
 0x4b4   : >> { %6142 = vst [vmem:[%s9145_s24 + $0x54] sm:$0xf] %v6141_v55  ;;  %6144 = vst [vmem:[%s9145_s24 + $0x58] sm:$0xf] %v6143_v56  ;;  %v6147_v31 = vld [vmem:[%s9149_s29 + $0x60] sm:$0xf] }
 0x4b5   : >> { %6146 = vst [vmem:[%s9145_s24 + $0x5c] sm:$0xf] %v6145_v57  ;;  %v6149_v58 = vld [vmem:[%s9149_s29 + $0x64] sm:$0xf]  ;;  %v6151_v59 = vld [vmem:[%s9149_s29 + $0x68] sm:$0xf] }
 0x4b6   : >> { %6148 = vst [vmem:[%s9145_s24 + $0x60] sm:$0xf] %v6147_v31  ;;  %6150 = vst [vmem:[%s9145_s24 + $0x64] sm:$0xf] %v6149_v58  ;;  %v6153_v45 = vld [vmem:[%s9149_s29 + $0x6c] sm:$0xf] }
 0x4b7   : >> { %6152 = vst [vmem:[%s9145_s24 + $0x68] sm:$0xf] %v6151_v59  ;;  %v6155_v60 = vld [vmem:[%s9149_s29 + $0x70] sm:$0xf]  ;;  %v6157_v61 = vld [vmem:[%s9149_s29 + $0x74] sm:$0xf] }
 0x4b8   : >> { %6154 = vst [vmem:[%s9145_s24 + $0x6c] sm:$0xf] %v6153_v45  ;;  %6156 = vst [vmem:[%s9145_s24 + $0x70] sm:$0xf] %v6155_v60  ;;  %v6159_v63 = vld [vmem:[%s9149_s29 + $0x78] sm:$0xf] }
 0x4b9   : >> { %6158 = vst [vmem:[%s9145_s24 + $0x74] sm:$0xf] %v6157_v61  ;;  %v6161_v2 = vld [vmem:[%s9149_s29 + $0x7c] sm:$0xf]  ;;  %v6163_v47 = vld [vmem:[%s9149_s29 + $0x80] sm:$0xf] }
 0x4ba   : >> { %6160 = vst [vmem:[%s9145_s24 + $0x78] sm:$0xf] %v6159_v63  ;;  %6162 = vst [vmem:[%s9145_s24 + $0x7c] sm:$0xf] %v6161_v2  ;;  %v6165_v3 = vld [vmem:[%s9149_s29 + $0x84] sm:$0xf] }
 0x4bb   : >> { %6164 = vst [vmem:[%s9145_s24 + $0x80] sm:$0xf] %v6163_v47  ;;  %v6167_v4 = vld [vmem:[%s9149_s29 + $0x88] sm:$0xf]  ;;  %v6169_v62 = vld [vmem:[%s9149_s29 + $0x8c] sm:$0xf] }
 0x4bc   : >> { %6166 = vst [vmem:[%s9145_s24 + $0x84] sm:$0xf] %v6165_v3  ;;  %6168 = vst [vmem:[%s9145_s24 + $0x88] sm:$0xf] %v6167_v4  ;;  %v6171_v5 = vld [vmem:[%s9149_s29 + $0x90] sm:$0xf] }
 0x4bd   : >> { %6170 = vst [vmem:[%s9145_s24 + $0x8c] sm:$0xf] %v6169_v62  ;;  %v6173_v7 = vld [vmem:[%s9149_s29 + $0x94] sm:$0xf]  ;;  %v6175_v8 = vld [vmem:[%s9149_s29 + $0x98] sm:$0xf] }
 0x4be   : >> { %6172 = vst [vmem:[%s9145_s24 + $0x90] sm:$0xf] %v6171_v5  ;;  %6174 = vst [vmem:[%s9145_s24 + $0x94] sm:$0xf] %v6173_v7  ;;  %v6177_v9 = vld [vmem:[%s9149_s29 + $0x9c] sm:$0xf] }
 0x4bf   : >> { %6176 = vst [vmem:[%s9145_s24 + $0x98] sm:$0xf] %v6175_v8  ;;  %v6179_v10 = vld [vmem:[%s9149_s29 + $0xa0] sm:$0xf]  ;;  %v6181_v11 = vld [vmem:[%s9149_s29 + $0xa4] sm:$0xf] }
 0x4c0   : >> { %6178 = vst [vmem:[%s9145_s24 + $0x9c] sm:$0xf] %v6177_v9  ;;  %6180 = vst [vmem:[%s9145_s24 + $0xa0] sm:$0xf] %v6179_v10  ;;  %v6183_v12 = vld [vmem:[%s9149_s29 + $0xa8] sm:$0xf] }
 0x4c1   : >> { %6182 = vst [vmem:[%s9145_s24 + $0xa4] sm:$0xf] %v6181_v11  ;;  %v6185_v13 = vld [vmem:[%s9149_s29 + $0xac] sm:$0xf]  ;;  %v6187_v14 = vld [vmem:[%s9149_s29 + $0xb0] sm:$0xf] }
 0x4c2   : >> { %6184 = vst [vmem:[%s9145_s24 + $0xa8] sm:$0xf] %v6183_v12  ;;  %6186 = vst [vmem:[%s9145_s24 + $0xac] sm:$0xf] %v6185_v13  ;;  %v6189_v16 = vld [vmem:[%s9149_s29 + $0xb4] sm:$0xf] }
 0x4c3   : >> { %6188 = vst [vmem:[%s9145_s24 + $0xb0] sm:$0xf] %v6187_v14  ;;  %v6191_v17 = vld [vmem:[%s9149_s29 + $0xb8] sm:$0xf]  ;;  %v6193_v54 = vld [vmem:[%s9149_s29 + $0xbc] sm:$0xf] }
 0x4c4   : >> { %6190 = vst [vmem:[%s9145_s24 + $0xb4] sm:$0xf] %v6189_v16  ;;  %6192 = vst [vmem:[%s9145_s24 + $0xb8] sm:$0xf] %v6191_v17  ;;  %v6195_v18 = vld [vmem:[%s9149_s29 + $0xc0] sm:$0xf] }
 0x4c5   : >> { %6194 = vst [vmem:[%s9145_s24 + $0xbc] sm:$0xf] %v6193_v54  ;;  %v6197_v19 = vld [vmem:[%s9149_s29 + $0xc4] sm:$0xf]  ;;  %v6199_v20 = vld [vmem:[%s9149_s29 + $0xc8] sm:$0xf] }
 0x4c6   : >> { %6196 = vst [vmem:[%s9145_s24 + $0xc0] sm:$0xf] %v6195_v18  ;;  %6198 = vst [vmem:[%s9145_s24 + $0xc4] sm:$0xf] %v6197_v19  ;;  %v6201_v21 = vld [vmem:[%s9149_s29 + $0xcc] sm:$0xf] }
 0x4c7   : >> { %6200 = vst [vmem:[%s9145_s24 + $0xc8] sm:$0xf] %v6199_v20  ;;  %v6203_v22 = vld [vmem:[%s9149_s29 + $0xd0] sm:$0xf]  ;;  %v6205_v23 = vld [vmem:[%s9149_s29 + $0xd4] sm:$0xf] }
 0x4c8   : >> { %6202 = vst [vmem:[%s9145_s24 + $0xcc] sm:$0xf] %v6201_v21  ;;  %6204 = vst [vmem:[%s9145_s24 + $0xd0] sm:$0xf] %v6203_v22  ;;  %v6207_v25 = vld [vmem:[%s9149_s29 + $0xd8] sm:$0xf] }
 0x4c9   : >> { %6206 = vst [vmem:[%s9145_s24 + $0xd4] sm:$0xf] %v6205_v23  ;;  %v6209_v36 = vld [vmem:[%s9149_s29 + $0xdc] sm:$0xf]  ;;  %v6211_v26 = vld [vmem:[%s9149_s29 + $0xe0] sm:$0xf] }
 0x4ca   : >> { %6208 = vst [vmem:[%s9145_s24 + $0xd8] sm:$0xf] %v6207_v25  ;;  %6210 = vst [vmem:[%s9145_s24 + $0xdc] sm:$0xf] %v6209_v36  ;;  %v6213_v27 = vld [vmem:[%s9149_s29 + $0xe4] sm:$0xf] }
 0x4cb   : >> { %6212 = vst [vmem:[%s9145_s24 + $0xe0] sm:$0xf] %v6211_v26  ;;  %v6215_v29 = vld [vmem:[%s9149_s29 + $0xe8] sm:$0xf]  ;;  %v6217_v30 = vld [vmem:[%s9149_s29 + $0xec] sm:$0xf] }
 0x4cc   : >> { %6214 = vst [vmem:[%s9145_s24 + $0xe4] sm:$0xf] %v6213_v27  ;;  %6216 = vst [vmem:[%s9145_s24 + $0xe8] sm:$0xf] %v6215_v29  ;;  %v6219_v6 = vld [vmem:[%s9149_s29 + $0xf0] sm:$0xf] }
 0x4cd   : >> { %6218 = vst [vmem:[%s9145_s24 + $0xec] sm:$0xf] %v6217_v30  ;;  %v6221_v32 = vld [vmem:[%s9149_s29 + $0xf4] sm:$0xf]  ;;  %v6223_v33 = vld [vmem:[%s9149_s29 + $0xf8] sm:$0xf] }
 0x4ce   : >> { %6220 = vst [vmem:[%s9145_s24 + $0xf0] sm:$0xf] %v6219_v6  ;;  %6222 = vst [vmem:[%s9145_s24 + $0xf4] sm:$0xf] %v6221_v32  ;;  %v6225_v34 = vld [vmem:[%s9149_s29 + $0xfc] sm:$0xf] }
 0x4cf   : >> { %6224 = vst [vmem:[%s9145_s24 + $0xf8] sm:$0xf] %v6223_v33  ;;  %6226 = vst [vmem:[%s9145_s24 + $0xfc] sm:$0xf] %v6225_v34  ;;  %s11104_s14 = smov (%p6228_p11, %s6227_s14), 0  ;;  %s6093_s23 = sadd.s32 1, %s9157_s23  }
 0x4d0   : >> { %s7244_s16 = sshll.u32 %s11104_s14, 8  ;;  %p6092_p12 = scmp.ge.s32.totalorder %s6093_s23, %s10901_s12 }
 0x4d1   : >> { %s6232_s29 = scalar_lea.vmem %s9781_s20, %s7244_s16 [#allocation2]   ;;  %s6233_s24 = scalar_lea.vmem %s10895_s9, %s7244_s16  }
 0x4d2   : >> { %s11097_s10 = smov %s11104_s14  ;;  %6095 = sbr.rel (!%p6092_p12) target bundleno = 1189 (0x4a5), region = 133 }
 0x4d9 PF: > { %s11069_s17 = sand.u32 63, %s11102_s27   ;;  %s7255_s18 = sshll.u32 %s10901_s12, 8 }
 0x4da   : > { %s6238_s19 = scalar_lea.vmem %s9781_s20, %s7255_s18 [#allocation2]   ;;  %s6240_s21 = scalar_lea.vmem %s10895_s9, %s7255_s18  }
 0x4db   : > { %p7249_p13 = scmp.le.s32.totalorder %s11069_s17, 0 }
 0x4dc   : > { %s9159_s26 = smov (!%p7249_p13), %s6240_s21   ;;  %s9163_s15 = smov (!%p7249_p13), %s6238_s19  }
 0x4dd   : > { %6508 = sbr.rel (%p7249_p13) target bundleno = 1262 (0x4ee), region = 138  ;;  %s9167_s13 = smov (!%p7249_p13), 0  }
 0x4de   : > { %s9171_s30 = smov (!%p7249_p13), 0  }
 0x4e4 LB: >> { %v6250_v24 = vld [vmem:[%s9165_s15] sm:$0xf]  ;;  %s6252_s27 = sadd.s32 1, %s9169_s13  ;;  %s6244_s30 = sadd.s32 1, %s9173_s30   ;;  %s9173_s30 = sphi %s9171_s30, %s6244_s30   ;;  %s9169_s13 = sphi %s9167_s13, %s9168_s13   ;;  %s9165_s15 = sphi %s9163_s15, %s6257_s15   ;;  %s9161_s26 = sphi %s9159_s26, %s6258_s26  }
 0x4e5   : >> { %6251 = vst [vmem:[%s9161_s26] sm:$0xf] %v6250_v24  ;;  %p6253_p0 = scmp.ge.s32.totalorder %s6252_s27, %s11069_s17  ;;  %p6243_p1 = scmp.ge.s32.totalorder %s6244_s30, %s11069_s17 }
 0x4e7   : >> { %s11106_s27 = smov (%p6253_p0, %s6252_s27), 0  ;;  %6246 = sbr.rel (!%p6243_p1) target bundleno = 1252 (0x4e4), region = 144 }
 0x4e8   : >> { %s7250_s20 = sshll.u32 %s11106_s27, 2  ;;  %s9168_s13 = smov %s11106_s27  }
 0x4e9   : >> { %s6257_s15 = scalar_lea.vmem %s6238_s19, %s7250_s20 [#allocation2]   ;;  %s6258_s26 = scalar_lea.vmem %s6240_s21, %s7250_s20  }
 0x4ee PF: > { %p13_p2 = scmp.ge.s32.totalorder %s9228_s25, 4   ;;  %s11098_s21 = smov %s9137_s22 }
 0x4ef   : > { %s11099_s22 = smov %s9236_s28  ;;  %s11100_s23 = smov %s9228_s25 }
 0x4f0   :  { %15 = sbr.rel (!%p13_p2) target bundleno = 2 (0x2), region = 155 }

</bundles_post_ra>
